<compile_context>
chip_gen: v7x
topology: tpu7x:2x2x1
jax: 0.10.0
libtpu: 0.0.40
codegen_flags: <defaults>
</compile_context>

<pallas_src>
import jax
import jax.numpy as jnp
from jax import lax
from jax.experimental import pallas as pl
from jax.experimental.pallas import tpu as pltpu

# ------------------------- synthetic "conf" -------------------------
BOUND = 1.0            # conf.model.bound (scene bounding sphere)
WHITE_BG = True        # conf.model.white_bg
N_SAMPLES = 8          # sampler samples per ray
HIDDEN = 32            # SDF / color hidden width
FEAT = 16              # SDF feature dim
LAPLACE_BETA = 0.1     # LaplaceDensity beta
INV_BETA = 1.0 / LAPLACE_BETA
RAY_TILE = 128         # rays per Pallas grid step (lane width); NS = 1024


def _render_kernel(o_ref, d_ref, zd_ref,
                   w1t_ref, b1_ref, w2_ref, b2_ref, w1g_ref,
                   wc1p_ref, wc1d_ref, wc1n_ref, wc1f_ref, bc1_ref,
                   wc2_ref, bc2_ref,
                   ray_ref, samp_ref):
    f32 = jnp.float32
    S, TR = N_SAMPLES, RAY_TILE

    o = o_ref[...]                       # (3, TR)
    d = d_ref[...]                       # (3, TR)
    z_s = zd_ref[0:1, :]                 # (1, NS)  sample depths (sample-major lanes)
    delta = zd_ref[1:2, :]               # (1, NS)  sample intervals (last = 1e10)

    # ---- points along rays: lane-tile-aligned replication of per-ray o, d ----
    d_exp = jnp.concatenate([d] * S, axis=1)                       # (3, NS)
    pts = jnp.concatenate([o] * S, axis=1) + d_exp * z_s           # (3, NS)

    # ---- SDF network (1 hidden layer, softplus) + analytic input-gradient ----
    pre = jnp.dot(w1t_ref[...], pts, preferred_element_type=f32) + b1_ref[...]   # (H, NS)
    e = jnp.exp(-jnp.abs(pre))                  # shared exp for softplus + derivative
    h = jnp.maximum(pre, 0.0) + jnp.log1p(e)    # softplus(pre)
    r = 1.0 / (1.0 + e)
    sig = jnp.where(pre >= 0.0, r, e * r)       # softplus'(pre) = sigmoid(pre)
    # grad[c, j] = sum_h w1[c,h] * w2s[h] * sigmoid(pre[h,j])   (w1g = w1 * w2s, host)
    grad = jnp.dot(w1g_ref[...], sig, preferred_element_type=f32)                # (3, NS)
    sf = jnp.dot(w2_ref[...], h, preferred_element_type=f32) + b2_ref[...]       # (1+F, NS)
    feat = sf[0:FEAT, :]                                                         # (F, NS)
    sdf = sf[FEAT:FEAT + 1, :]                                                   # (1, NS)

    # ---- LaplaceDensity (VolSDF):  density = Psi_beta(-sdf) / beta ----
    s_neg = -sdf
    es = jnp.exp(-jnp.abs(s_neg) * INV_BETA)
    psi = jnp.where(s_neg <= 0.0, 0.5 * es, 1.0 - 0.5 * es)
    density = psi * INV_BETA                                                     # (1, NS)

    # ---- ColorNetwork(points, dirs, normals, feat)  (app disabled) ----
    sumsq = jnp.sum(grad * grad, axis=0, keepdims=True)                          # (1, NS)
    n_in = grad * lax.rsqrt(sumsq)               # torch: grad / ||grad|| (no eps)
    hc = (jnp.dot(wc1p_ref[...], pts, preferred_element_type=f32)
          + jnp.dot(wc1d_ref[...], d_exp, preferred_element_type=f32)
          + jnp.dot(wc1n_ref[...], n_in, preferred_element_type=f32)
          + jnp.dot(wc1f_ref[...], feat, preferred_element_type=f32)
          + bc1_ref[...])                                                        # (H, NS)
    hc = jnp.maximum(hc, 0.0)
    rgbs = jax.nn.sigmoid(jnp.dot(wc2_ref[...], hc, preferred_element_type=f32)
                          + bc2_ref[...])                                        # (3, NS)

    # normalized gradient for compositing (torch: grad / (||grad|| + 1e-6))
    gn = grad * pl.reciprocal(jnp.sqrt(sumsq) + 1e-6, approx=True)               # (3, NS)

    # ---- volume rendering: per-ray transmittance cumprod + composite ----
    # exact identity: 1 - alpha = exp(-density * delta); sample-major lanes make the
    # per-ray sample groups lane-tile aligned, so this is a tiny unrolled VPU loop.
    log_t = -density * delta                                                     # (1, NS)
    trans = jnp.ones((1, TR), f32)
    rgb_acc = jnp.zeros((3, TR), f32)
    dist_acc = jnp.zeros((1, TR), f32)
    nrm_acc = jnp.zeros((3, TR), f32)
    opac = jnp.zeros((1, TR), f32)
    for s in range(S):
        lo, hi = s * TR, (s + 1) * TR
        one_m_alpha = jnp.exp(log_t[:, lo:hi])          # (1, TR)
        w = (1.0 - one_m_alpha) * trans                 # weights = alpha * T
        rgb_acc = rgb_acc + w * rgbs[:, lo:hi]
        dist_acc = dist_acc + w * z_s[:, lo:hi]
        nrm_acc = nrm_acc + w * gn[:, lo:hi]
        opac = opac + w
        trans = trans * one_m_alpha
    if WHITE_BG:
        rgb_acc = rgb_acc + (1.0 - opac)                # rgb += (1 - opacity)

    # ---- lane-dense packed stores ----
    ray_ref[0:3, :] = rgb_acc                           # [rgb | dist | normal | opac]
    ray_ref[3:4, :] = dist_acc
    ray_ref[4:7, :] = nrm_acc
    ray_ref[7:8, :] = opac

    samp_ref[0:3, :] = grad                             # [grad | sdf]
    samp_ref[3:4, :] = sdf


def init_params(key):
    ks = jax.random.split(key, 10)
    g = lambda k, shape, sc: (sc * jax.random.normal(k, shape)).astype(jnp.float32)
    H, F = HIDDEN, FEAT
    # "reference" parameterization (matches the torch module layout) ...
    w1 = g(ks[0], (3, H), 0.5)
    b1 = g(ks[1], (1, H), 0.1)
    w2s = g(ks[2], (1, H), 0.5)                    # sdf head (row vector)
    b2s = jnp.full((1, 1), 0.1, jnp.float32)
    w2f = g(ks[3], (H, F), 0.3)                    # feature head
    b2f = g(ks[4], (1, F), 0.05)
    wc1p = g(ks[5], (3, H), 0.4)                   # color net first layer, split by input
    wc1d = g(ks[6], (3, H), 0.4)
    wc1n = g(ks[7], (3, H), 0.4)
    wc1f = g(ks[8], (F, H), 0.3)
    bc1 = jnp.zeros((1, H), jnp.float32)
    wc2 = g(ks[9], (H, 3), 0.3)
    bc2 = jnp.zeros((1, 3), jnp.float32)

    # ... repacked for the lane-flipped kernel (output-channels leading)
    w1t_k = jnp.transpose(w1)                                   # (H, 3)
    b1_k = jnp.transpose(b1)                                    # (H, 1)
    w2_k = jnp.concatenate([jnp.transpose(w2f), w2s], axis=0)   # (F+1, H): [feat; sdf]
    b2_k = jnp.concatenate([jnp.transpose(b2f), b2s], axis=0)   # (F+1, 1)
    w1g_k = w1 * w2s                                            # (3, H): sdf-head-scaled
    wc1p_k = jnp.transpose(wc1p)                                # (H, 3)
    wc1d_k = jnp.transpose(wc1d)                                # (H, 3)
    wc1n_k = jnp.transpose(wc1n)                                # (H, 3)
    wc1f_k = jnp.transpose(wc1f)                                # (H, F)
    bc1_k = jnp.transpose(bc1)                                  # (H, 1)
    wc2_k = jnp.transpose(wc2)                                  # (3, H)
    bc2_k = jnp.transpose(bc2)                                  # (3, 1)
    return (w1t_k, b1_k, w2_k, b2_k, w1g_k,
            wc1p_k, wc1d_k, wc1n_k, wc1f_k, bc1_k, wc2_k, bc2_k)


def render_rays(params, o_t, d_t, zd):
    """o_t, d_t: (3, N_pad); zd: (2, N_pad*S) sample-major.  Returns (8,N_pad),(4,N_pad*S)."""
    Np = o_t.shape[1]
    S, TR = N_SAMPLES, RAY_TILE
    NS = TR * S
    assert Np % TR == 0
    grid = (Np // TR,)

    def const(p):
        nd = p.ndim
        return pl.BlockSpec(p.shape, lambda i, _nd=nd: (0,) * _nd)

    in_specs = ([pl.BlockSpec((3, TR), lambda i: (0, i)),
                 pl.BlockSpec((3, TR), lambda i: (0, i)),
                 pl.BlockSpec((2, NS), lambda i: (0, i))]
                + [const(p) for p in params])
    out_specs = [
        pl.BlockSpec((8, TR), lambda i: (0, i)),        # per-ray slab [rgb|dist|normal|opac]
        pl.BlockSpec((4, NS), lambda i: (0, i)),        # per-sample slab [grad|sdf]
    ]
    out_shape = (
        jax.ShapeDtypeStruct((8, Np), jnp.float32),
        jax.ShapeDtypeStruct((4, Np * S), jnp.float32),
    )
    return pl.pallas_call(
        _render_kernel,
        grid=grid,
        in_specs=in_specs,
        out_specs=out_specs,
        out_shape=out_shape,
        compiler_params=pltpu.CompilerParams(dimension_semantics=("parallel",)),
    )(o_t, d_t, zd, *params)


def forward(params, sample):
    rays_o, rays_d = sample['rays_o'], sample['rays_d']      # (B, R, 3)
    depth_scale, pose = sample['depth_scale'], sample['pose']
    B, R = rays_o.shape[:2]
    S = N_SAMPLES
    TR = RAY_TILE
    N = B * R
    o = rays_o.reshape(-1, 3).astype(jnp.float32)
    d = rays_d.reshape(-1, 3).astype(jnp.float32)

    # pad ray count to a multiple of RAY_TILE with benign rays (sliced off afterwards)
    N_pad = ((N + TR - 1) // TR) * TR
    pad = N_pad - N
    if pad:
        o = jnp.concatenate([o, jnp.zeros((pad, 3), jnp.float32)], axis=0)
        d_fill = jnp.tile(jnp.array([[0.0, 0.0, 1.0]], jnp.float32), (pad, 1))
        d = jnp.concatenate([d, d_fill], axis=0)
    n_tiles = N_pad // TR

    # TODO(synk): ErrorBoundSampler.get_z_vals (error-bounded up-sampling) replaced by
    # uniform sampling between the ray / bounding-sphere intersections.
    dd = jnp.sum(d * d, -1)
    bq = jnp.sum(o * d, -1) / dd
    cq = (jnp.sum(o * o, -1) - BOUND ** 2) / dd
    disc = bq * bq - cq
    outside = (disc < 0.0)[:N]       # returned as a mask only (no host sync / print)
    sq = jnp.sqrt(jnp.maximum(disc, 0.0))
    near = jnp.maximum(-bq - sq, 0.0)
    far = jnp.maximum(-bq + sq, near + 1e-3)
    t = jnp.linspace(0.0, 1.0, S, dtype=jnp.float32)
    z = near[:, None] + (far - near)[:, None] * t[None, :]            # (N_pad, S)

    # sample intervals (neuralangelo volume_rendering_alphas: dist_far = 1e10)
    delta = jnp.concatenate(
        [z[:, 1:] - z[:, :-1], jnp.full((N_pad, 1), 1e10, jnp.float32)], axis=1)

    # channel-leading / sample-major lane packing: column (tile, sample, ray-in-tile)
    def to_lanes(x):   # (N_pad, S) -> (N_pad*S,) ordered (tile, s, r)
        return jnp.transpose(x.reshape(n_tiles, TR, S), (0, 2, 1)).reshape(-1)
    zd = jnp.stack([to_lanes(z), to_lanes(delta)], axis=0)            # (2, N_pad*S)
    o_t = jnp.transpose(o)                                            # (3, N_pad)
    d_t = jnp.transpose(d)                                            # (3, N_pad)

    ray_slab, samp_slab = render_rays(params, o_t, d_t, zd)

    rgb = jnp.transpose(ray_slab[0:3, :N]).reshape(B, R, 3)
    dist = jnp.transpose(ray_slab[3:4, :N]).reshape(B, R, 1)
    normal = jnp.transpose(ray_slab[4:7, :N]).reshape(B, R, 3)

    samp = jnp.transpose(samp_slab.reshape(4, n_tiles, S, TR), (1, 3, 2, 0))
    samp = samp.reshape(N_pad, S, 4)[:N]                              # (N, S, [grad|sdf])
    grad = samp[:, :, 0:3].reshape(B, R, S, 3)
    sdf = samp[:, :, 3:4].reshape(B, R, S, 1)

    depth = dist * depth_scale
    # normal = (R_w2c @ normal^T)^T
    R_w2c = jnp.swapaxes(pose[:, :3, :3], 1, 2)
    normal = jnp.einsum('bij,brj->bri', R_w2c, normal)

    output = {
        'outside': outside.reshape(B, R, 1),
        'rgb': rgb,
        'depth': depth,
        'normal': normal,
        'gradient': grad,
        'sdf': sdf,
    }
    # TODO(synk): training-mode eikonal / hessian branch (sample_points_in_cube,
    # sample_neighbours_near_plane, hessian) omitted; eval-mode forward only.
    return output


if __name__ == "__main__":
    key = jax.random.PRNGKey(0)
    ko, kd, ks, kp = jax.random.split(key, 4)
    params = init_params(jax.random.PRNGKey(42))

    B, R = 2, 8
    rays_o = 0.3 * jax.random.normal(ko, (B, R, 3), jnp.float32)        # inside the sphere
    rays_d = jax.random.normal(kd, (B, R, 3), jnp.float32)
    rays_d = rays_d / jnp.linalg.norm(rays_d, axis=-1, keepdims=True)
    depth_scale = 1.0 + 0.01 * jax.random.normal(ks, (B, R, 1), jnp.float32)
    M = jax.random.normal(kp, (B, 3, 3), jnp.float32)
    Q, _ = jnp.linalg.qr(M)                                             # camera rotations
    pose = jnp.zeros((B, 4, 4), jnp.float32).at[:, :3, :3].set(Q).at[:, 3, 3].set(1.0)
    indices = jnp.arange(B, dtype=jnp.int32)

    sample = {'idx': indices, 'rays_o': rays_o, 'rays_d': rays_d,
              'depth_scale': depth_scale, 'pose': pose}

    out = forward(params, sample)
    jax.block_until_ready(out)

    assert out['rgb'].shape == (B, R, 3)
    assert out['depth'].shape == (B, R, 1)
    assert out['normal'].shape == (B, R, 3)
    assert out['gradient'].shape == (B, R, N_SAMPLES, 3)
    assert out['sdf'].shape == (B, R, N_SAMPLES, 1)
    for k in ('rgb', 'depth', 'normal', 'gradient', 'sdf'):
        assert bool(jnp.isfinite(out[k]).all()), f"non-finite output in {k}"
    print("KERNEL_OK")
</pallas_src>

<mosaic_0001>
module attributes {stable_mosaic.version = 11 : i64} {
  func.func @_render_kernel(%arg0: i32, %arg1: memref<3x128xf32, #tpu.memory_space<vmem>>, %arg2: memref<3x128xf32, #tpu.memory_space<vmem>>, %arg3: memref<2x1024xf32, #tpu.memory_space<vmem>>, %arg4: memref<32x3xf32, #tpu.memory_space<vmem>>, %arg5: memref<32x1xf32, #tpu.memory_space<vmem>>, %arg6: memref<17x32xf32, #tpu.memory_space<vmem>>, %arg7: memref<17x1xf32, #tpu.memory_space<vmem>>, %arg8: memref<3x32xf32, #tpu.memory_space<vmem>>, %arg9: memref<32x3xf32, #tpu.memory_space<vmem>>, %arg10: memref<32x3xf32, #tpu.memory_space<vmem>>, %arg11: memref<32x3xf32, #tpu.memory_space<vmem>>, %arg12: memref<32x16xf32, #tpu.memory_space<vmem>>, %arg13: memref<32x1xf32, #tpu.memory_space<vmem>>, %arg14: memref<3x32xf32, #tpu.memory_space<vmem>>, %arg15: memref<3x1xf32, #tpu.memory_space<vmem>>, %arg16: memref<8x128xf32, #tpu.memory_space<vmem>>, %arg17: memref<4x1024xf32, #tpu.memory_space<vmem>>) attributes {dimension_semantics = [#tpu.dimension_semantics<parallel>], iteration_bounds = array<i64: 1>, scalar_prefetch = 0 : i64, scratch_operands = 0 : i64, tpu.core_type = #tpu.core_type<tc>, window_params = [{transform_indices = @transform_0, window_bounds = array<i64: 3, 128>}, {transform_indices = @transform_1, window_bounds = array<i64: 3, 128>}, {transform_indices = @transform_2, window_bounds = array<i64: 2, 1024>}, {pipeline_mode = #tpu.pipeline_mode<synchronous>, transform_indices = @transform_3, window_bounds = array<i64: 32, 3>}, {pipeline_mode = #tpu.pipeline_mode<synchronous>, transform_indices = @transform_4, window_bounds = array<i64: 32, 1>}, {pipeline_mode = #tpu.pipeline_mode<synchronous>, transform_indices = @transform_5, window_bounds = array<i64: 17, 32>}, {pipeline_mode = #tpu.pipeline_mode<synchronous>, transform_indices = @transform_6, window_bounds = array<i64: 17, 1>}, {pipeline_mode = #tpu.pipeline_mode<synchronous>, transform_indices = @transform_7, window_bounds = array<i64: 3, 32>}, {pipeline_mode = #tpu.pipeline_mode<synchronous>, transform_indices = @transform_8, window_bounds = array<i64: 32, 3>}, {pipeline_mode = #tpu.pipeline_mode<synchronous>, transform_indices = @transform_9, window_bounds = array<i64: 32, 3>}, {pipeline_mode = #tpu.pipeline_mode<synchronous>, transform_indices = @transform_10, window_bounds = array<i64: 32, 3>}, {pipeline_mode = #tpu.pipeline_mode<synchronous>, transform_indices = @transform_11, window_bounds = array<i64: 32, 16>}, {pipeline_mode = #tpu.pipeline_mode<synchronous>, transform_indices = @transform_12, window_bounds = array<i64: 32, 1>}, {pipeline_mode = #tpu.pipeline_mode<synchronous>, transform_indices = @transform_13, window_bounds = array<i64: 3, 32>}, {pipeline_mode = #tpu.pipeline_mode<synchronous>, transform_indices = @transform_14, window_bounds = array<i64: 3, 1>}, {transform_indices = @transform_15, window_bounds = array<i64: 8, 128>}, {transform_indices = @transform_16, window_bounds = array<i64: 4, 1024>}]} {
    %c0 = arith.constant 0 : index
    %c0_0 = arith.constant 0 : index
    %0 = vector.load %arg1[%c0, %c0_0] : memref<3x128xf32, #tpu.memory_space<vmem>>, vector<3x128xf32>
    %c0_1 = arith.constant 0 : index
    %c0_2 = arith.constant 0 : index
    %1 = vector.load %arg2[%c0_1, %c0_2] : memref<3x128xf32, #tpu.memory_space<vmem>>, vector<3x128xf32>
    %c0_3 = arith.constant 0 : index
    %c0_4 = arith.constant 0 : index
    %2 = vector.load %arg3[%c0_3, %c0_4] : memref<2x1024xf32, #tpu.memory_space<vmem>>, vector<1x1024xf32>
    %c1 = arith.constant 1 : index
    %c0_5 = arith.constant 0 : index
    %3 = vector.load %arg3[%c1, %c0_5] : memref<2x1024xf32, #tpu.memory_space<vmem>>, vector<1x1024xf32>
    %4 = tpu.concatenate %1, %1, %1, %1, %1, %1, %1, %1 in 1 : vector<3x128xf32>, vector<3x128xf32>, vector<3x128xf32>, vector<3x128xf32>, vector<3x128xf32>, vector<3x128xf32>, vector<3x128xf32>, vector<3x128xf32> -> vector<3x1024xf32>
    %5 = tpu.concatenate %0, %0, %0, %0, %0, %0, %0, %0 in 1 : vector<3x128xf32>, vector<3x128xf32>, vector<3x128xf32>, vector<3x128xf32>, vector<3x128xf32>, vector<3x128xf32>, vector<3x128xf32>, vector<3x128xf32> -> vector<3x1024xf32>
    %6 = vector.broadcast %2 : vector<1x1024xf32> to vector<3x1024xf32>
    %7 = arith.mulf %4, %6 : vector<3x1024xf32>
    %8 = arith.addf %5, %7 : vector<3x1024xf32>
    %c0_6 = arith.constant 0 : index
    %c0_7 = arith.constant 0 : index
    %9 = vector.load %arg4[%c0_6, %c0_7] : memref<32x3xf32, #tpu.memory_space<vmem>>, vector<32x3xf32>
    %cst = arith.constant dense<0.000000e+00> : vector<32x1024xf32>
    %10 = tpu.matmul %9, %8, %cst {dimension_numbers = #tpu.dot_dimension_numbers<[1], [0], [0], [1], [0, 0, 1, 1], [], []>} : vector<32x3xf32>, vector<3x1024xf32>, vector<32x1024xf32> -> vector<32x1024xf32>
    %c0_8 = arith.constant 0 : index
    %c0_9 = arith.constant 0 : index
    %11 = vector.load %arg5[%c0_8, %c0_9] : memref<32x1xf32, #tpu.memory_space<vmem>>, vector<32x1xf32>
    %12 = vector.broadcast %11 : vector<32x1xf32> to vector<32x1024xf32>
    %13 = arith.addf %10, %12 : vector<32x1024xf32>
    %14 = math.absf %13 : vector<32x1024xf32>
    %cst_10 = arith.constant 0.000000e+00 : f32
    %15 = vector.broadcast %cst_10 : f32 to vector<32x1024xf32>
    %16 = arith.subf %15, %14 : vector<32x1024xf32>
    %17 = math.exp %16 : vector<32x1024xf32>
    %cst_11 = arith.constant 0.000000e+00 : f32
    %18 = vector.broadcast %cst_11 : f32 to vector<32x1024xf32>
    %19 = arith.maximumf %13, %18 : vector<32x1024xf32>
    %20 = math.log1p %17 : vector<32x1024xf32>
    %21 = arith.addf %19, %20 : vector<32x1024xf32>
    %cst_12 = arith.constant 1.000000e+00 : f32
    %22 = vector.broadcast %cst_12 : f32 to vector<32x1024xf32>
    %23 = arith.addf %22, %17 : vector<32x1024xf32>
    %cst_13 = arith.constant 1.000000e+00 : f32
    %24 = vector.broadcast %cst_13 : f32 to vector<32x1024xf32>
    %25 = arith.divf %24, %23 : vector<32x1024xf32>
    %cst_14 = arith.constant 0.000000e+00 : f32
    %26 = vector.broadcast %cst_14 : f32 to vector<32x1024xf32>
    %27 = arith.cmpf oge, %13, %26 : vector<32x1024xf32>
    %28 = arith.mulf %17, %25 : vector<32x1024xf32>
    %29 = arith.select %27, %25, %28 : vector<32x1024xi1>, vector<32x1024xf32>
    %c0_15 = arith.constant 0 : index
    %c0_16 = arith.constant 0 : index
    %30 = vector.load %arg8[%c0_15, %c0_16] : memref<3x32xf32, #tpu.memory_space<vmem>>, vector<3x32xf32>
    %cst_17 = arith.constant dense<0.000000e+00> : vector<3x1024xf32>
    %31 = tpu.matmul %30, %29, %cst_17 {dimension_numbers = #tpu.dot_dimension_numbers<[1], [0], [0], [1], [0, 0, 1, 1], [], []>} : vector<3x32xf32>, vector<32x1024xf32>, vector<3x1024xf32> -> vector<3x1024xf32>
    %c0_18 = arith.constant 0 : index
    %c0_19 = arith.constant 0 : index
    %32 = vector.load %arg6[%c0_18, %c0_19] : memref<17x32xf32, #tpu.memory_space<vmem>>, vector<17x32xf32>
    %cst_20 = arith.constant dense<0.000000e+00> : vector<17x1024xf32>
    %33 = tpu.matmul %32, %21, %cst_20 {dimension_numbers = #tpu.dot_dimension_numbers<[1], [0], [0], [1], [0, 0, 1, 1], [], []>} : vector<17x32xf32>, vector<32x1024xf32>, vector<17x1024xf32> -> vector<17x1024xf32>
    %c0_21 = arith.constant 0 : index
    %c0_22 = arith.constant 0 : index
    %34 = vector.load %arg7[%c0_21, %c0_22] : memref<17x1xf32, #tpu.memory_space<vmem>>, vector<17x1xf32>
    %35 = vector.broadcast %34 : vector<17x1xf32> to vector<17x1024xf32>
    %36 = arith.addf %33, %35 : vector<17x1024xf32>
    %37 = vector.extract_strided_slice %36 {offsets = [0, 0], sizes = [16, 1024], strides = [1, 1]} : vector<17x1024xf32> to vector<16x1024xf32>
    %38 = vector.extract_strided_slice %36 {offsets = [16, 0], sizes = [1, 1024], strides = [1, 1]} : vector<17x1024xf32> to vector<1x1024xf32>
    %cst_23 = arith.constant 0.000000e+00 : f32
    %39 = vector.broadcast %cst_23 : f32 to vector<1x1024xf32>
    %40 = arith.subf %39, %38 : vector<1x1024xf32>
    %41 = math.absf %40 : vector<1x1024xf32>
    %cst_24 = arith.constant 0.000000e+00 : f32
    %42 = vector.broadcast %cst_24 : f32 to vector<1x1024xf32>
    %43 = arith.subf %42, %41 : vector<1x1024xf32>
    %cst_25 = arith.constant 1.000000e+01 : f32
    %44 = vector.broadcast %cst_25 : f32 to vector<1x1024xf32>
    %45 = arith.mulf %43, %44 : vector<1x1024xf32>
    %46 = math.exp %45 : vector<1x1024xf32>
    %cst_26 = arith.constant 0.000000e+00 : f32
    %47 = vector.broadcast %cst_26 : f32 to vector<1x1024xf32>
    %48 = arith.cmpf ole, %40, %47 : vector<1x1024xf32>
    %cst_27 = arith.constant 5.000000e-01 : f32
    %49 = vector.broadcast %cst_27 : f32 to vector<1x1024xf32>
    %50 = arith.mulf %49, %46 : vector<1x1024xf32>
    %cst_28 = arith.constant 5.000000e-01 : f32
    %51 = vector.broadcast %cst_28 : f32 to vector<1x1024xf32>
    %52 = arith.mulf %51, %46 : vector<1x1024xf32>
    %cst_29 = arith.constant 1.000000e+00 : f32
    %53 = vector.broadcast %cst_29 : f32 to vector<1x1024xf32>
    %54 = arith.subf %53, %52 : vector<1x1024xf32>
    %55 = arith.select %48, %50, %54 : vector<1x1024xi1>, vector<1x1024xf32>
    %cst_30 = arith.constant 1.000000e+01 : f32
    %56 = vector.broadcast %cst_30 : f32 to vector<1x1024xf32>
    %57 = arith.mulf %55, %56 : vector<1x1024xf32>
    %58 = arith.mulf %31, %31 : vector<3x1024xf32>
    %cst_31 = arith.constant dense<0.000000e+00> : vector<1024xf32>
    %59 = vector.multi_reduction <add>, %58, %cst_31 [0] : vector<3x1024xf32> to vector<1024xf32>
    %60 = vector.shape_cast %59 : vector<1024xf32> to vector<1x1024xf32>
    %61 = math.rsqrt %60 : vector<1x1024xf32>
    %62 = vector.broadcast %61 : vector<1x1024xf32> to vector<3x1024xf32>
    %63 = arith.mulf %31, %62 : vector<3x1024xf32>
    %c0_32 = arith.constant 0 : index
    %c0_33 = arith.constant 0 : index
    %64 = vector.load %arg9[%c0_32, %c0_33] : memref<32x3xf32, #tpu.memory_space<vmem>>, vector<32x3xf32>
    %cst_34 = arith.constant dense<0.000000e+00> : vector<32x1024xf32>
    %65 = tpu.matmul %64, %8, %cst_34 {dimension_numbers = #tpu.dot_dimension_numbers<[1], [0], [0], [1], [0, 0, 1, 1], [], []>} : vector<32x3xf32>, vector<3x1024xf32>, vector<32x1024xf32> -> vector<32x1024xf32>
    %c0_35 = arith.constant 0 : index
    %c0_36 = arith.constant 0 : index
    %66 = vector.load %arg10[%c0_35, %c0_36] : memref<32x3xf32, #tpu.memory_space<vmem>>, vector<32x3xf32>
    %cst_37 = arith.constant dense<0.000000e+00> : vector<32x1024xf32>
    %67 = tpu.matmul %66, %4, %cst_37 {dimension_numbers = #tpu.dot_dimension_numbers<[1], [0], [0], [1], [0, 0, 1, 1], [], []>} : vector<32x3xf32>, vector<3x1024xf32>, vector<32x1024xf32> -> vector<32x1024xf32>
    %68 = arith.addf %65, %67 : vector<32x1024xf32>
    %c0_38 = arith.constant 0 : index
    %c0_39 = arith.constant 0 : index
    %69 = vector.load %arg11[%c0_38, %c0_39] : memref<32x3xf32, #tpu.memory_space<vmem>>, vector<32x3xf32>
    %cst_40 = arith.constant dense<0.000000e+00> : vector<32x1024xf32>
    %70 = tpu.matmul %69, %63, %cst_40 {dimension_numbers = #tpu.dot_dimension_numbers<[1], [0], [0], [1], [0, 0, 1, 1], [], []>} : vector<32x3xf32>, vector<3x1024xf32>, vector<32x1024xf32> -> vector<32x1024xf32>
    %71 = arith.addf %68, %70 : vector<32x1024xf32>
    %c0_41 = arith.constant 0 : index
    %c0_42 = arith.constant 0 : index
    %72 = vector.load %arg12[%c0_41, %c0_42] : memref<32x16xf32, #tpu.memory_space<vmem>>, vector<32x16xf32>
    %cst_43 = arith.constant dense<0.000000e+00> : vector<32x1024xf32>
    %73 = tpu.matmul %72, %37, %cst_43 {dimension_numbers = #tpu.dot_dimension_numbers<[1], [0], [0], [1], [0, 0, 1, 1], [], []>} : vector<32x16xf32>, vector<16x1024xf32>, vector<32x1024xf32> -> vector<32x1024xf32>
    %74 = arith.addf %71, %73 : vector<32x1024xf32>
    %c0_44 = arith.constant 0 : index
    %c0_45 = arith.constant 0 : index
    %75 = vector.load %arg13[%c0_44, %c0_45] : memref<32x1xf32, #tpu.memory_space<vmem>>, vector<32x1xf32>
    %76 = vector.broadcast %75 : vector<32x1xf32> to vector<32x1024xf32>
    %77 = arith.addf %74, %76 : vector<32x1024xf32>
    %cst_46 = arith.constant 0.000000e+00 : f32
    %78 = vector.broadcast %cst_46 : f32 to vector<32x1024xf32>
    %79 = arith.maximumf %77, %78 : vector<32x1024xf32>
    %c0_47 = arith.constant 0 : index
    %c0_48 = arith.constant 0 : index
    %80 = vector.load %arg14[%c0_47, %c0_48] : memref<3x32xf32, #tpu.memory_space<vmem>>, vector<3x32xf32>
    %cst_49 = arith.constant dense<0.000000e+00> : vector<3x1024xf32>
    %81 = tpu.matmul %80, %79, %cst_49 {dimension_numbers = #tpu.dot_dimension_numbers<[1], [0], [0], [1], [0, 0, 1, 1], [], []>} : vector<3x32xf32>, vector<32x1024xf32>, vector<3x1024xf32> -> vector<3x1024xf32>
    %c0_50 = arith.constant 0 : index
    %c0_51 = arith.constant 0 : index
    %82 = vector.load %arg15[%c0_50, %c0_51] : memref<3x1xf32, #tpu.memory_space<vmem>>, vector<3x1xf32>
    %83 = vector.broadcast %82 : vector<3x1xf32> to vector<3x1024xf32>
    %84 = arith.addf %81, %83 : vector<3x1024xf32>
    %85 = arith.negf %84 : vector<3x1024xf32>
    %86 = math.exp %85 : vector<3x1024xf32>
    %cst_52 = arith.constant 1.000000e+00 : f32
    %87 = vector.broadcast %cst_52 : f32 to vector<3x1024xf32>
    %88 = arith.addf %87, %86 : vector<3x1024xf32>
    %89 = arith.divf %87, %88 : vector<3x1024xf32>
    %90 = math.sqrt %60 : vector<1x1024xf32>
    %cst_53 = arith.constant 9.99999997E-7 : f32
    %91 = vector.broadcast %cst_53 : f32 to vector<1x1024xf32>
    %92 = arith.addf %90, %91 : vector<1x1024xf32>
    %93 = tpu.reciprocal %92 {approx = true} : vector<1x1024xf32> -> vector<1x1024xf32>
    %94 = vector.broadcast %93 : vector<1x1024xf32> to vector<3x1024xf32>
    %95 = arith.mulf %31, %94 : vector<3x1024xf32>
    %cst_54 = arith.constant 0.000000e+00 : f32
    %96 = vector.broadcast %cst_54 : f32 to vector<1x1024xf32>
    %97 = arith.subf %96, %57 : vector<1x1024xf32>
    %98 = arith.mulf %97, %3 : vector<1x1024xf32>
    %cst_55 = arith.constant 1.000000e+00 : f32
    %99 = vector.broadcast %cst_55 : f32 to vector<1x128xf32>
    %cst_56 = arith.constant 0.000000e+00 : f32
    %100 = vector.broadcast %cst_56 : f32 to vector<3x128xf32>
    %cst_57 = arith.constant 0.000000e+00 : f32
    %101 = vector.broadcast %cst_57 : f32 to vector<1x128xf32>
    %cst_58 = arith.constant 0.000000e+00 : f32
    %102 = vector.broadcast %cst_58 : f32 to vector<3x128xf32>
    %cst_59 = arith.constant 0.000000e+00 : f32
    %103 = vector.broadcast %cst_59 : f32 to vector<1x128xf32>
    %104 = vector.extract_strided_slice %98 {offsets = [0, 0], sizes = [1, 128], strides = [1, 1]} : vector<1x1024xf32> to vector<1x128xf32>
    %105 = math.exp %104 : vector<1x128xf32>
    %cst_60 = arith.constant 1.000000e+00 : f32
    %106 = vector.broadcast %cst_60 : f32 to vector<1x128xf32>
    %107 = arith.subf %106, %105 : vector<1x128xf32>
    %108 = arith.mulf %107, %99 : vector<1x128xf32>
    %109 = vector.extract_strided_slice %89 {offsets = [0, 0], sizes = [3, 128], strides = [1, 1]} : vector<3x1024xf32> to vector<3x128xf32>
    %110 = vector.broadcast %108 : vector<1x128xf32> to vector<3x128xf32>
    %111 = arith.mulf %110, %109 : vector<3x128xf32>
    %112 = arith.addf %100, %111 : vector<3x128xf32>
    %113 = vector.extract_strided_slice %2 {offsets = [0, 0], sizes = [1, 128], strides = [1, 1]} : vector<1x1024xf32> to vector<1x128xf32>
    %114 = arith.mulf %108, %113 : vector<1x128xf32>
    %115 = arith.addf %101, %114 : vector<1x128xf32>
    %116 = vector.extract_strided_slice %95 {offsets = [0, 0], sizes = [3, 128], strides = [1, 1]} : vector<3x1024xf32> to vector<3x128xf32>
    %117 = vector.broadcast %108 : vector<1x128xf32> to vector<3x128xf32>
    %118 = arith.mulf %117, %116 : vector<3x128xf32>
    %119 = arith.addf %102, %118 : vector<3x128xf32>
    %120 = arith.addf %103, %108 : vector<1x128xf32>
    %121 = arith.mulf %99, %105 : vector<1x128xf32>
    %122 = vector.extract_strided_slice %98 {offsets = [0, 128], sizes = [1, 128], strides = [1, 1]} : vector<1x1024xf32> to vector<1x128xf32>
    %123 = math.exp %122 : vector<1x128xf32>
    %cst_61 = arith.constant 1.000000e+00 : f32
    %124 = vector.broadcast %cst_61 : f32 to vector<1x128xf32>
    %125 = arith.subf %124, %123 : vector<1x128xf32>
    %126 = arith.mulf %125, %121 : vector<1x128xf32>
    %127 = vector.extract_strided_slice %89 {offsets = [0, 128], sizes = [3, 128], strides = [1, 1]} : vector<3x1024xf32> to vector<3x128xf32>
    %128 = vector.broadcast %126 : vector<1x128xf32> to vector<3x128xf32>
    %129 = arith.mulf %128, %127 : vector<3x128xf32>
    %130 = arith.addf %112, %129 : vector<3x128xf32>
    %131 = vector.extract_strided_slice %2 {offsets = [0, 128], sizes = [1, 128], strides = [1, 1]} : vector<1x1024xf32> to vector<1x128xf32>
    %132 = arith.mulf %126, %131 : vector<1x128xf32>
    %133 = arith.addf %115, %132 : vector<1x128xf32>
    %134 = vector.extract_strided_slice %95 {offsets = [0, 128], sizes = [3, 128], strides = [1, 1]} : vector<3x1024xf32> to vector<3x128xf32>
    %135 = vector.broadcast %126 : vector<1x128xf32> to vector<3x128xf32>
    %136 = arith.mulf %135, %134 : vector<3x128xf32>
    %137 = arith.addf %119, %136 : vector<3x128xf32>
    %138 = arith.addf %120, %126 : vector<1x128xf32>
    %139 = arith.mulf %121, %123 : vector<1x128xf32>
    %140 = vector.extract_strided_slice %98 {offsets = [0, 256], sizes = [1, 128], strides = [1, 1]} : vector<1x1024xf32> to vector<1x128xf32>
    %141 = math.exp %140 : vector<1x128xf32>
    %cst_62 = arith.constant 1.000000e+00 : f32
    %142 = vector.broadcast %cst_62 : f32 to vector<1x128xf32>
    %143 = arith.subf %142, %141 : vector<1x128xf32>
    %144 = arith.mulf %143, %139 : vector<1x128xf32>
    %145 = vector.extract_strided_slice %89 {offsets = [0, 256], sizes = [3, 128], strides = [1, 1]} : vector<3x1024xf32> to vector<3x128xf32>
    %146 = vector.broadcast %144 : vector<1x128xf32> to vector<3x128xf32>
    %147 = arith.mulf %146, %145 : vector<3x128xf32>
    %148 = arith.addf %130, %147 : vector<3x128xf32>
    %149 = vector.extract_strided_slice %2 {offsets = [0, 256], sizes = [1, 128], strides = [1, 1]} : vector<1x1024xf32> to vector<1x128xf32>
    %150 = arith.mulf %144, %149 : vector<1x128xf32>
    %151 = arith.addf %133, %150 : vector<1x128xf32>
    %152 = vector.extract_strided_slice %95 {offsets = [0, 256], sizes = [3, 128], strides = [1, 1]} : vector<3x1024xf32> to vector<3x128xf32>
    %153 = vector.broadcast %144 : vector<1x128xf32> to vector<3x128xf32>
    %154 = arith.mulf %153, %152 : vector<3x128xf32>
    %155 = arith.addf %137, %154 : vector<3x128xf32>
    %156 = arith.addf %138, %144 : vector<1x128xf32>
    %157 = arith.mulf %139, %141 : vector<1x128xf32>
    %158 = vector.extract_strided_slice %98 {offsets = [0, 384], sizes = [1, 128], strides = [1, 1]} : vector<1x1024xf32> to vector<1x128xf32>
    %159 = math.exp %158 : vector<1x128xf32>
    %cst_63 = arith.constant 1.000000e+00 : f32
    %160 = vector.broadcast %cst_63 : f32 to vector<1x128xf32>
    %161 = arith.subf %160, %159 : vector<1x128xf32>
    %162 = arith.mulf %161, %157 : vector<1x128xf32>
    %163 = vector.extract_strided_slice %89 {offsets = [0, 384], sizes = [3, 128], strides = [1, 1]} : vector<3x1024xf32> to vector<3x128xf32>
    %164 = vector.broadcast %162 : vector<1x128xf32> to vector<3x128xf32>
    %165 = arith.mulf %164, %163 : vector<3x128xf32>
    %166 = arith.addf %148, %165 : vector<3x128xf32>
    %167 = vector.extract_strided_slice %2 {offsets = [0, 384], sizes = [1, 128], strides = [1, 1]} : vector<1x1024xf32> to vector<1x128xf32>
    %168 = arith.mulf %162, %167 : vector<1x128xf32>
    %169 = arith.addf %151, %168 : vector<1x128xf32>
    %170 = vector.extract_strided_slice %95 {offsets = [0, 384], sizes = [3, 128], strides = [1, 1]} : vector<3x1024xf32> to vector<3x128xf32>
    %171 = vector.broadcast %162 : vector<1x128xf32> to vector<3x128xf32>
    %172 = arith.mulf %171, %170 : vector<3x128xf32>
    %173 = arith.addf %155, %172 : vector<3x128xf32>
    %174 = arith.addf %156, %162 : vector<1x128xf32>
    %175 = arith.mulf %157, %159 : vector<1x128xf32>
    %176 = vector.extract_strided_slice %98 {offsets = [0, 512], sizes = [1, 128], strides = [1, 1]} : vector<1x1024xf32> to vector<1x128xf32>
    %177 = math.exp %176 : vector<1x128xf32>
    %cst_64 = arith.constant 1.000000e+00 : f32
    %178 = vector.broadcast %cst_64 : f32 to vector<1x128xf32>
    %179 = arith.subf %178, %177 : vector<1x128xf32>
    %180 = arith.mulf %179, %175 : vector<1x128xf32>
    %181 = vector.extract_strided_slice %89 {offsets = [0, 512], sizes = [3, 128], strides = [1, 1]} : vector<3x1024xf32> to vector<3x128xf32>
    %182 = vector.broadcast %180 : vector<1x128xf32> to vector<3x128xf32>
    %183 = arith.mulf %182, %181 : vector<3x128xf32>
    %184 = arith.addf %166, %183 : vector<3x128xf32>
    %185 = vector.extract_strided_slice %2 {offsets = [0, 512], sizes = [1, 128], strides = [1, 1]} : vector<1x1024xf32> to vector<1x128xf32>
    %186 = arith.mulf %180, %185 : vector<1x128xf32>
    %187 = arith.addf %169, %186 : vector<1x128xf32>
    %188 = vector.extract_strided_slice %95 {offsets = [0, 512], sizes = [3, 128], strides = [1, 1]} : vector<3x1024xf32> to vector<3x128xf32>
    %189 = vector.broadcast %180 : vector<1x128xf32> to vector<3x128xf32>
    %190 = arith.mulf %189, %188 : vector<3x128xf32>
    %191 = arith.addf %173, %190 : vector<3x128xf32>
    %192 = arith.addf %174, %180 : vector<1x128xf32>
    %193 = arith.mulf %175, %177 : vector<1x128xf32>
    %194 = vector.extract_strided_slice %98 {offsets = [0, 640], sizes = [1, 128], strides = [1, 1]} : vector<1x1024xf32> to vector<1x128xf32>
    %195 = math.exp %194 : vector<1x128xf32>
    %cst_65 = arith.constant 1.000000e+00 : f32
    %196 = vector.broadcast %cst_65 : f32 to vector<1x128xf32>
    %197 = arith.subf %196, %195 : vector<1x128xf32>
    %198 = arith.mulf %197, %193 : vector<1x128xf32>
    %199 = vector.extract_strided_slice %89 {offsets = [0, 640], sizes = [3, 128], strides = [1, 1]} : vector<3x1024xf32> to vector<3x128xf32>
    %200 = vector.broadcast %198 : vector<1x128xf32> to vector<3x128xf32>
    %201 = arith.mulf %200, %199 : vector<3x128xf32>
    %202 = arith.addf %184, %201 : vector<3x128xf32>
    %203 = vector.extract_strided_slice %2 {offsets = [0, 640], sizes = [1, 128], strides = [1, 1]} : vector<1x1024xf32> to vector<1x128xf32>
    %204 = arith.mulf %198, %203 : vector<1x128xf32>
    %205 = arith.addf %187, %204 : vector<1x128xf32>
    %206 = vector.extract_strided_slice %95 {offsets = [0, 640], sizes = [3, 128], strides = [1, 1]} : vector<3x1024xf32> to vector<3x128xf32>
    %207 = vector.broadcast %198 : vector<1x128xf32> to vector<3x128xf32>
    %208 = arith.mulf %207, %206 : vector<3x128xf32>
    %209 = arith.addf %191, %208 : vector<3x128xf32>
    %210 = arith.addf %192, %198 : vector<1x128xf32>
    %211 = arith.mulf %193, %195 : vector<1x128xf32>
    %212 = vector.extract_strided_slice %98 {offsets = [0, 768], sizes = [1, 128], strides = [1, 1]} : vector<1x1024xf32> to vector<1x128xf32>
    %213 = math.exp %212 : vector<1x128xf32>
    %cst_66 = arith.constant 1.000000e+00 : f32
    %214 = vector.broadcast %cst_66 : f32 to vector<1x128xf32>
    %215 = arith.subf %214, %213 : vector<1x128xf32>
    %216 = arith.mulf %215, %211 : vector<1x128xf32>
    %217 = vector.extract_strided_slice %89 {offsets = [0, 768], sizes = [3, 128], strides = [1, 1]} : vector<3x1024xf32> to vector<3x128xf32>
    %218 = vector.broadcast %216 : vector<1x128xf32> to vector<3x128xf32>
    %219 = arith.mulf %218, %217 : vector<3x128xf32>
    %220 = arith.addf %202, %219 : vector<3x128xf32>
    %221 = vector.extract_strided_slice %2 {offsets = [0, 768], sizes = [1, 128], strides = [1, 1]} : vector<1x1024xf32> to vector<1x128xf32>
    %222 = arith.mulf %216, %221 : vector<1x128xf32>
    %223 = arith.addf %205, %222 : vector<1x128xf32>
    %224 = vector.extract_strided_slice %95 {offsets = [0, 768], sizes = [3, 128], strides = [1, 1]} : vector<3x1024xf32> to vector<3x128xf32>
    %225 = vector.broadcast %216 : vector<1x128xf32> to vector<3x128xf32>
    %226 = arith.mulf %225, %224 : vector<3x128xf32>
    %227 = arith.addf %209, %226 : vector<3x128xf32>
    %228 = arith.addf %210, %216 : vector<1x128xf32>
    %229 = arith.mulf %211, %213 : vector<1x128xf32>
    %230 = vector.extract_strided_slice %98 {offsets = [0, 896], sizes = [1, 128], strides = [1, 1]} : vector<1x1024xf32> to vector<1x128xf32>
    %231 = math.exp %230 : vector<1x128xf32>
    %cst_67 = arith.constant 1.000000e+00 : f32
    %232 = vector.broadcast %cst_67 : f32 to vector<1x128xf32>
    %233 = arith.subf %232, %231 : vector<1x128xf32>
    %234 = arith.mulf %233, %229 : vector<1x128xf32>
    %235 = vector.extract_strided_slice %89 {offsets = [0, 896], sizes = [3, 128], strides = [1, 1]} : vector<3x1024xf32> to vector<3x128xf32>
    %236 = vector.broadcast %234 : vector<1x128xf32> to vector<3x128xf32>
    %237 = arith.mulf %236, %235 : vector<3x128xf32>
    %238 = arith.addf %220, %237 : vector<3x128xf32>
    %239 = vector.extract_strided_slice %2 {offsets = [0, 896], sizes = [1, 128], strides = [1, 1]} : vector<1x1024xf32> to vector<1x128xf32>
    %240 = arith.mulf %234, %239 : vector<1x128xf32>
    %241 = arith.addf %223, %240 : vector<1x128xf32>
    %242 = vector.extract_strided_slice %95 {offsets = [0, 896], sizes = [3, 128], strides = [1, 1]} : vector<3x1024xf32> to vector<3x128xf32>
    %243 = vector.broadcast %234 : vector<1x128xf32> to vector<3x128xf32>
    %244 = arith.mulf %243, %242 : vector<3x128xf32>
    %245 = arith.addf %227, %244 : vector<3x128xf32>
    %246 = arith.addf %228, %234 : vector<1x128xf32>
    %cst_68 = arith.constant 1.000000e+00 : f32
    %247 = vector.broadcast %cst_68 : f32 to vector<1x128xf32>
    %248 = arith.subf %247, %246 : vector<1x128xf32>
    %249 = vector.broadcast %248 : vector<1x128xf32> to vector<3x128xf32>
    %250 = arith.addf %238, %249 : vector<3x128xf32>
    %c0_69 = arith.constant 0 : index
    %c0_70 = arith.constant 0 : index
    %251 = vector.load %arg16[%c0_69, %c0_70] : memref<8x128xf32, #tpu.memory_space<vmem>>, vector<3x128xf32>
    tpu.vector_store %arg16[%c0_69, %c0_70], %250 {strides = array<i32>} : memref<8x128xf32, #tpu.memory_space<vmem>>, vector<3x128xf32>,
    %c3 = arith.constant 3 : index
    %c0_71 = arith.constant 0 : index
    %252 = vector.load %arg16[%c3, %c0_71] : memref<8x128xf32, #tpu.memory_space<vmem>>, vector<1x128xf32>
    tpu.vector_store %arg16[%c3, %c0_71], %241 {strides = array<i32>} : memref<8x128xf32, #tpu.memory_space<vmem>>, vector<1x128xf32>,
    %c4 = arith.constant 4 : index
    %c0_72 = arith.constant 0 : index
    %253 = vector.load %arg16[%c4, %c0_72] : memref<8x128xf32, #tpu.memory_space<vmem>>, vector<3x128xf32>
    tpu.vector_store %arg16[%c4, %c0_72], %245 {strides = array<i32>} : memref<8x128xf32, #tpu.memory_space<vmem>>, vector<3x128xf32>,
    %c7 = arith.constant 7 : index
    %c0_73 = arith.constant 0 : index
    %254 = vector.load %arg16[%c7, %c0_73] : memref<8x128xf32, #tpu.memory_space<vmem>>, vector<1x128xf32>
    tpu.vector_store %arg16[%c7, %c0_73], %246 {strides = array<i32>} : memref<8x128xf32, #tpu.memory_space<vmem>>, vector<1x128xf32>,
    %c0_74 = arith.constant 0 : index
    %c0_75 = arith.constant 0 : index
    %255 = vector.load %arg17[%c0_74, %c0_75] : memref<4x1024xf32, #tpu.memory_space<vmem>>, vector<3x1024xf32>
    tpu.vector_store %arg17[%c0_74, %c0_75], %31 {strides = array<i32>} : memref<4x1024xf32, #tpu.memory_space<vmem>>, vector<3x1024xf32>,
    %c3_76 = arith.constant 3 : index
    %c0_77 = arith.constant 0 : index
    %256 = vector.load %arg17[%c3_76, %c0_77] : memref<4x1024xf32, #tpu.memory_space<vmem>>, vector<1x1024xf32>
    tpu.vector_store %arg17[%c3_76, %c0_77], %38 {strides = array<i32>} : memref<4x1024xf32, #tpu.memory_space<vmem>>, vector<1x1024xf32>,
    return
  }
  func.func @transform_0(%arg0: i32) -> (i32, i32) {
    %c0_i32 = arith.constant 0 : i32
    %c0_i32_0 = arith.constant 0 : i32
    return %c0_i32, %arg0 : i32, i32
  }
  func.func @transform_1(%arg0: i32) -> (i32, i32) {
    %c0_i32 = arith.constant 0 : i32
    %c0_i32_0 = arith.constant 0 : i32
    return %c0_i32, %arg0 : i32, i32
  }
  func.func @transform_2(%arg0: i32) -> (i32, i32) {
    %c0_i32 = arith.constant 0 : i32
    %c0_i32_0 = arith.constant 0 : i32
    return %c0_i32, %arg0 : i32, i32
  }
  func.func @transform_3(%arg0: i32) -> (i32, i32) {
    %c0_i32 = arith.constant 0 : i32
    %c0_i32_0 = arith.constant 0 : i32
    %c0_i32_1 = arith.constant 0 : i32
    return %c0_i32, %c0_i32_0 : i32, i32
  }
  func.func @transform_4(%arg0: i32) -> (i32, i32) {
    %c0_i32 = arith.constant 0 : i32
    %c0_i32_0 = arith.constant 0 : i32
    %c0_i32_1 = arith.constant 0 : i32
    return %c0_i32, %c0_i32_0 : i32, i32
  }
  func.func @transform_5(%arg0: i32) -> (i32, i32) {
    %c0_i32 = arith.constant 0 : i32
    %c0_i32_0 = arith.constant 0 : i32
    %c0_i32_1 = arith.constant 0 : i32
    return %c0_i32, %c0_i32_0 : i32, i32
  }
  func.func @transform_6(%arg0: i32) -> (i32, i32) {
    %c0_i32 = arith.constant 0 : i32
    %c0_i32_0 = arith.constant 0 : i32
    %c0_i32_1 = arith.constant 0 : i32
    return %c0_i32, %c0_i32_0 : i32, i32
  }
  func.func @transform_7(%arg0: i32) -> (i32, i32) {
    %c0_i32 = arith.constant 0 : i32
    %c0_i32_0 = arith.constant 0 : i32
    %c0_i32_1 = arith.constant 0 : i32
    return %c0_i32, %c0_i32_0 : i32, i32
  }
  func.func @transform_8(%arg0: i32) -> (i32, i32) {
    %c0_i32 = arith.constant 0 : i32
    %c0_i32_0 = arith.constant 0 : i32
    %c0_i32_1 = arith.constant 0 : i32
    return %c0_i32, %c0_i32_0 : i32, i32
  }
  func.func @transform_9(%arg0: i32) -> (i32, i32) {
    %c0_i32 = arith.constant 0 : i32
    %c0_i32_0 = arith.constant 0 : i32
    %c0_i32_1 = arith.constant 0 : i32
    return %c0_i32, %c0_i32_0 : i32, i32
  }
  func.func @transform_10(%arg0: i32) -> (i32, i32) {
    %c0_i32 = arith.constant 0 : i32
    %c0_i32_0 = arith.constant 0 : i32
    %c0_i32_1 = arith.constant 0 : i32
    return %c0_i32, %c0_i32_0 : i32, i32
  }
  func.func @transform_11(%arg0: i32) -> (i32, i32) {
    %c0_i32 = arith.constant 0 : i32
    %c0_i32_0 = arith.constant 0 : i32
    %c0_i32_1 = arith.constant 0 : i32
    return %c0_i32, %c0_i32_0 : i32, i32
  }
  func.func @transform_12(%arg0: i32) -> (i32, i32) {
    %c0_i32 = arith.constant 0 : i32
    %c0_i32_0 = arith.constant 0 : i32
    %c0_i32_1 = arith.constant 0 : i32
    return %c0_i32, %c0_i32_0 : i32, i32
  }
  func.func @transform_13(%arg0: i32) -> (i32, i32) {
    %c0_i32 = arith.constant 0 : i32
    %c0_i32_0 = arith.constant 0 : i32
    %c0_i32_1 = arith.constant 0 : i32
    return %c0_i32, %c0_i32_0 : i32, i32
  }
  func.func @transform_14(%arg0: i32) -> (i32, i32) {
    %c0_i32 = arith.constant 0 : i32
    %c0_i32_0 = arith.constant 0 : i32
    %c0_i32_1 = arith.constant 0 : i32
    return %c0_i32, %c0_i32_0 : i32, i32
  }
  func.func @transform_15(%arg0: i32) -> (i32, i32) {
    %c0_i32 = arith.constant 0 : i32
    %c0_i32_0 = arith.constant 0 : i32
    return %c0_i32, %arg0 : i32, i32
  }
  func.func @transform_16(%arg0: i32) -> (i32, i32) {
    %c0_i32 = arith.constant 0 : i32
    %c0_i32_0 = arith.constant 0 : i32
    return %c0_i32, %arg0 : i32, i32
  }
}

</mosaic_0001>

<bundles_post_ra>
// kernel: tpu_custom_call.1
= control target key start
LH: loop header
LB: loop body
LE: loop exit
PB: predicated region body
PF: predicated region fallthrough
CT: control target
= control target key end

     0   :  { %s6913_s0 = inlined_call_operand.vmem [shape: f32[3,128], index: 0, kind: input, shape index: {}]   ;;  %s6914_s1 = inlined_call_operand.vmem [shape: f32[3,128], index: 1, kind: input, shape index: {}]   ;;  %s6915_s2 = inlined_call_operand.vmem [shape: f32[2,1024], index: 2, kind: input, shape index: {}]   ;;  %s6916_s3 = inlined_call_operand.vmem [shape: f32[32,3], index: 3, kind: input, shape index: {}]   ;;  %s6917_s4 = inlined_call_operand.vmem [shape: f32[32,1], index: 4, kind: input, shape index: {}]   ;;  %s6918_s5 = inlined_call_operand.vmem [shape: f32[17,32], index: 5, kind: input, shape index: {}]   ;;  %s6919_s6 = inlined_call_operand.vmem [shape: f32[17,1], index: 6, kind: input, shape index: {}]   ;;  %s6920_s7 = inlined_call_operand.vmem [shape: f32[3,32], index: 7, kind: input, shape index: {}]   ;;  %s6921_s8 = inlined_call_operand.vmem [shape: f32[32,3], index: 8, kind: input, shape index: {}]   ;;  %s6922_s9 = inlined_call_operand.vmem [shape: f32[32,3], index: 9, kind: input, shape index: {}]   ;;  %s6923_s10 = inlined_call_operand.vmem [shape: f32[32,3], index: 10, kind: input, shape index: {}]   ;;  %s6924_s11 = inlined_call_operand.vmem [shape: f32[32,16], index: 11, kind: input, shape index: {}]   ;;  %s6925_s12 = inlined_call_operand.vmem [shape: f32[32,1], index: 12, kind: input, shape index: {}]   ;;  %s6926_s13 = inlined_call_operand.vmem [shape: f32[3,32], index: 13, kind: input, shape index: {}]   ;;  %s6927_s14 = inlined_call_operand.vmem [shape: f32[3,1], index: 14, kind: input, shape index: {}]   ;;  %s6928_s15 = inlined_call_operand.hbm [shape: f32[8,128], index: 15, kind: output, shape index: {0}]   ;;  %s6929_s16 = inlined_call_operand.hbm [shape: f32[4,1024], index: 16, kind: output, shape index: {1}]  }
   0x1   :  { %7022 = sst [smem:[#allocation72_spill]] %s6913_s0 }
   0x2   :  { %22 = vsyncpa [#allocation3], 0  ;;  %v60_v0 = vlaneseq  ;;  %v6937_v2 = vmov 0.0   ;;  %v56_v3 = vld [vmem:[%s6915_s2] ss:$2 sm:$0xff]  ;;  %v4829_v4 = vmov 0  }
   0x3   :  { %246 = vmatprep.mubr.f32.mxu0 %v6937_v2  ;;  %335 = vmatprep.mubr.f32.mxu1 %v6937_v2  ;;  %v120_v5 = vld [vmem:[%s6917_s4] sm:$0xff]  ;;  %v122_v6 = vld [vmem:[%s6917_s4 + $0x10] sm:$0xff]  ;;  %v121_v16 = vld [vmem:[%s6917_s4 + $0x8] sm:$0xff]  ;;  %vm157_vm0 = vcmask 1042432   ;;  %s7027_s20 = sld [smem:[#allocation72_spill]] }
   0x4   :  { %v4918_v1 = vshrl.u32 %v60_v0, 7  ;;  %4488 = vset.pattern.permute.xlu0 %v4829_v4  ;;  %4489 = vset.pattern.permute.xlu1 %v4829_v4  ;;  %v55_v7 = vld [vmem:[%s6914_s1] sm:$0x7]  ;;  %v123_v19 = vld [vmem:[%s6917_s4 + $0x18] sm:$0xff] }
   0x5   :  { %126 = vperm.xlu0 %4488, %v120_v5   ;;  %136 = vperm.xlu1 %4489, %v122_v6  }
   0x6   :  { %7023 = vst [vmem:[#allocation8_spill] sm:$0xff] %v4918_v1  ;;  %v6936_v8 = vsub.s32 1, %v4918_v1  ;;  %v6934_v9 = vsub.s32 3, %v4918_v1  ;;  %v4937_v10 = vsub.s32 0, %v4918_v1  ;;  %v6935_v11 = vsub.s32 2, %v4918_v1 }
   0x7   :  { %v6931_v12 = vsub.s32 5, %v4918_v1  ;;  %v6930_v13 = vsub.s32 7, %v4918_v1  ;;  %v6933_v14 = vsub.s32 4, %v4918_v1  ;;  %v6932_v15 = vsub.s32 6, %v4918_v1 }
   0x8   :  { %7024 = vst [vmem:[#allocation9_spill] sm:$0xff] %v4937_v10  ;;  %v4949_v17 = vrot.slane %v56_v3, %v6936_v8  ;;  %v4953_v18 = vrot.slane %v56_v3, %v6934_v9  ;;  %v63_v21 = vrot.slane %v56_v3, %v4937_v10  ;;  %v4964_v22 = vrot.slane %v56_v3, %v6935_v11 }
   0x9   :  { %v54_v20 = vld [vmem:[%s7027_s20] sm:$0x7]  ;;  %v4968_v23 = vrot.slane %v56_v3, %v6931_v12  ;;  %v4972_v24 = vrot.slane %v56_v3, %v6930_v13 }
   0xa   :  { %7025 = vst [vmem:[#allocation10_spill] sm:$0xff] %v4949_v17  ;;  %7026 = vst [vmem:[#allocation11_spill] sm:$0xff] %v4953_v18 }
   0xb   :  { %7028 = vst [vmem:[#allocation12_spill] sm:$0xff] %v4964_v22  ;;  %7029 = vst [vmem:[#allocation13_spill] sm:$0xff] %v4968_v23 }
   0xc   :  { %7030 = vst [vmem:[#allocation14_spill] sm:$0xff] %v4972_v24 }
   0xd   :  { %23 = vsyncpa [#allocation5], 0  ;;  %v101_v25 = vmul.f32 %v4949_v17, %v55_v7  ;;  %v103_v26 = vmul.f32 %v4953_v18, %v55_v7  ;;  %v4978_v27 = vrot.slane %v56_v3, %v6933_v14  ;;  %v4982_v28 = vrot.slane %v56_v3, %v6932_v15  ;;  %131 = vperm.xlu0 %4488, %v121_v16   ;;  %v116_v39 = vld [vmem:[%s6916_s3] sm:$0xff]  ;;  %v117_v44 = vld [vmem:[%s6916_s3 + $0x8] sm:$0xff] }
   0xe   :  { %v100_v29 = vmul.f32 %v63_v21, %v55_v7  ;;  %v102_v30 = vmul.f32 %v4964_v22, %v55_v7  ;;  %v105_v31 = vmul.f32 %v4968_v23, %v55_v7  ;;  %v107_v32 = vmul.f32 %v4972_v24, %v55_v7  ;;  %141 = vperm.xlu1 %4489, %v123_v19   ;;  %v1502_v45 = vld [vmem:[%s6919_s6] sm:$0xff]  ;;  %v1503_v46 = vld [vmem:[%s6919_s6 + $0x8] sm:$0xff]  ;;  %v118_v47 = vld [vmem:[%s6916_s3 + $0x10] sm:$0xff] }
   0xf   :  { %7031 = vst [vmem:[#allocation15_spill] sm:$0xff] %v4978_v27  ;;  %7032 = vst [vmem:[#allocation16_spill] sm:$0xff] %v4982_v28  ;;  %v4987_v33 = vadd.f32 %v101_v25, %v54_v20  ;;  %v4989_v34 = vadd.f32 %v103_v26, %v54_v20  ;;  %v104_v35 = vmul.f32 %v4978_v27, %v55_v7  ;;  %vm7012_vm1 = vcmask 23552   ;;  %v3342_v48 = vld [vmem:[%s6925_s12] sm:$0xff]  ;;  %v3343_v49 = vld [vmem:[%s6925_s12 + $0x8] sm:$0xff] }
  0x10   :  { %v106_v36 = vmul.f32 %v4982_v28, %v55_v7  ;;  %v4993_v37 = vadd.f32 %v100_v29, %v54_v20  ;;  %v4995_v38 = vadd.f32 %v102_v30, %v54_v20  ;;  %v5004_v40 = vadd.f32 %v105_v31, %v54_v20  ;;  %v119_v50 = vld [vmem:[%s6916_s3 + $0x18] sm:$0xff]  ;;  %v3344_v51 = vld [vmem:[%s6925_s12 + $0x10] sm:$0xff]  ;;  %v3431_v54 = vld [vmem:[%s6927_s14] sm:$0x7] }
  0x11   :  { %7033 = vst [vmem:[#allocation17_spill] sm:$0xff] %v4987_v33  ;;  %7034 = vst [vmem:[#allocation18_spill] sm:$0xff] %v4989_v34  ;;  %4153 = vmatprep.subr.msk.mxu0 %vm157_vm0, %v4987_v33  ;;  %4159 = vmatprep.subr.msk.mxu1 %vm157_vm0, %v4989_v34  ;;  %v5006_v41 = vadd.f32 %v107_v32, %v54_v20  ;;  %v5012_v42 = vadd.f32 %v104_v35, %v54_v20  ;;  %v3345_v52 = vld [vmem:[%s6925_s12 + $0x18] sm:$0xff]  ;;  %v1504_v53 = vld [vmem:[%s6919_s6 + $0x10] sm:$0x1] }
  0x12   :  { %7035 = vst [vmem:[#allocation19_spill] sm:$0xff] %v4993_v37  ;;  %7036 = vst [vmem:[#allocation20_spill] sm:$0xff] %v4995_v38  ;;  %4154 = vmatpush1.msk.msra.mxu0 %vm157_vm0, %v4993_v37  ;;  %4160 = vmatpush1.msk.msra.mxu1 %vm157_vm0, %v4995_v38  ;;  %v5014_v43 = vadd.f32 %v106_v36, %v54_v20 }
  0x13   :  { %7037 = vst [vmem:[#allocation21_spill] sm:$0xff] %v5004_v40  ;;  %7038 = vst [vmem:[#allocation22_spill] sm:$0xff] %v5006_v41  ;;  %4155 = vmatmul.mubr.msk.f32.vlgmr.msra.gmra.mrb[0].mxu0 %vm7012_vm1, %v116_v39  ;;  %4161 = vmatmul.mubr.msk.f32.vlgmr.msra.gmra.mrb[0].mxu1 %vm7012_vm1, %v116_v39 }
  0x14   :  { %7039 = vst [vmem:[#allocation23_spill] sm:$0xff] %v5012_v42  ;;  %7040 = vst [vmem:[#allocation24_spill] sm:$0xff] %v5014_v43  ;;  %252 = vmatprep.mubr.f32.mxu0 %v6937_v2  ;;  %341 = vmatprep.mubr.f32.mxu1 %v6937_v2 }
  0x15   :  { %4165 = vmatprep.subr.msk.mxu0 %vm157_vm0, %v5004_v40  ;;  %4171 = vmatprep.subr.msk.mxu1 %vm157_vm0, %v5006_v41 }
  0x16   :  { %4166 = vmatpush1.msk.msra.mxu0 %vm157_vm0, %v5012_v42  ;;  %4172 = vmatpush1.msk.msra.mxu1 %vm157_vm0, %v5014_v43 }
  0x17   :  { %4156 = vmatmul.mubr.msk.f32.gmra.mrb[2].mxu0 %vm7012_vm1, %v117_v44  ;;  %4162 = vmatmul.mubr.msk.f32.gmra.mrb[2].mxu1 %vm7012_vm1, %v117_v44 }
  0x18   :  { %258 = vmatprep.mubr.f32.mxu0 %v6937_v2  ;;  %347 = vmatprep.mubr.f32.mxu1 %v6937_v2 }
  0x19   :  { %1507 = vperm.xlu0 %4488, %v1502_v45   ;;  %1512 = vperm.xlu1 %4489, %v1503_v46  }
  0x1b   :  { %4157 = vmatmul.mubr.msk.f32.gmra.mrb[4].mxu0 %vm7012_vm1, %v118_v47  ;;  %4163 = vmatmul.mubr.msk.f32.gmra.mrb[4].mxu1 %vm7012_vm1, %v118_v47 }
  0x1c   :  { %264 = vmatprep.mubr.f32.mxu0 %v6937_v2  ;;  %353 = vmatprep.mubr.f32.mxu1 %v6937_v2 }
  0x1d   :  { %3348 = vperm.xlu0 %4488, %v3342_v48   ;;  %3353 = vperm.xlu1 %4489, %v3343_v49  }
  0x1f   :  { %4158 = vmatmul.mubr.msk.f32.gmra.mrb[6].mxu0 %vm7012_vm1, %v119_v50  ;;  %4164 = vmatmul.mubr.msk.f32.gmra.mrb[6].mxu1 %vm7012_vm1, %v119_v50 }
  0x20   :  { %424 = vmatprep.mubr.f32.mxu0 %v6937_v2  ;;  %513 = vmatprep.mubr.f32.mxu1 %v6937_v2 }
  0x21   :  { %3358 = vperm.xlu0 %4488, %v3344_v51   ;;  %3363 = vperm.xlu1 %4489, %v3345_v52  }
  0x23   :  { %4167 = vmatmul.mubr.msk.f32.vlgmr.msra.gmra.mrb[8].mxu0 %vm7012_vm1, %v116_v39  ;;  %4173 = vmatmul.mubr.msk.f32.vlgmr.msra.gmra.mrb[8].mxu1 %vm7012_vm1, %v116_v39 }
  0x24   :  { %430 = vmatprep.mubr.f32.mxu0 %v6937_v2  ;;  %519 = vmatprep.mubr.f32.mxu1 %v6937_v2 }
  0x25   :  { %1517 = vperm.xlu0 %4488, %v1504_v53   ;;  %3434 = vperm.xlu1 %4489, %v3431_v54  }
  0x27   :  { %4168 = vmatmul.mubr.msk.f32.gmra.mrb[10].mxu0 %vm7012_vm1, %v117_v44  ;;  %4174 = vmatmul.mubr.msk.f32.gmra.mrb[10].mxu1 %vm7012_vm1, %v117_v44 }
  0x28   :  { %436 = vmatprep.mubr.f32.mxu0 %v6937_v2  ;;  %525 = vmatprep.mubr.f32.mxu1 %v6937_v2 }
  0x2b   :  { %4169 = vmatmul.mubr.msk.f32.gmra.mrb[12].mxu0 %vm7012_vm1, %v118_v47  ;;  %4175 = vmatmul.mubr.msk.f32.gmra.mrb[12].mxu1 %vm7012_vm1, %v118_v47 }
  0x2c   :  { %442 = vmatprep.mubr.f32.mxu0 %v6937_v2  ;;  %531 = vmatprep.mubr.f32.mxu1 %v6937_v2 }
  0x2f   :  { %4170 = vmatmul.mubr.msk.f32.gmra.mrb[14].mxu0 %vm7012_vm1, %v119_v50  ;;  %4176 = vmatmul.mubr.msk.f32.gmra.mrb[14].mxu1 %vm7012_vm1, %v119_v50 }
  0x30   :  { %1279 = vmatprep.mubr.f32.mxu0 %v6937_v2  ;;  %1350 = vmatprep.mubr.f32.mxu1 %v6937_v2 }
  0x84   :  { %v5089_v55 = vpop.permute.xlu0 %126  ;;  %v5111_v30 = vpop.permute.xlu1 %136 }
  0x8c   :  { %v5099_v3 = vpop.permute.xlu0 %131 }
  0xe6   :  { %v248_v56 = vpop.f32.mrb[0].mxu0  ;;  %v337_v57 = vpop.f32.mrb[0].mxu1 }
  0xe7   :  { %v5092_v58 = vadd.f32 %v248_v56, %v5089_v55  ;;  %v5095_v59 = vadd.f32 %v337_v57, %v5089_v55  ;;  %v250_v60 = vpop.f32.mrb[1].mxu0  ;;  %v339_v61 = vpop.f32.mrb[1].mxu1 }
  0xe8   :  { %v5108_v26 = vadd.f32 %v250_v60, %v5089_v55  ;;  %v5114_v31 = vadd.f32 %v339_v61, %v5089_v55 }
  0xe9   :  { %v538_v62 = vand.u32 2147483647, %v5092_v58  ;;  %v540_v63 = vand.u32 2147483647, %v5095_v59  ;;  %vm1114_vm3 = vcmp.ge.f32.partialorder %v5092_v58, 0.0  ;;  %vm1116_vm5 = vcmp.ge.f32.partialorder %v5095_v59, 0.0 }
  0xea   :  { %v254_v0 = vpop.f32.mrb[2].mxu0  ;;  %v343_v6 = vpop.f32.mrb[2].mxu1  ;;  %7041 = vst [vmem:[#allocation25_spill] sm:$0xff] %v5108_v26  ;;  %7042 = vst [vmem:[#allocation26_spill] sm:$0xff] %v5114_v31  ;;  %v539_v49 = vand.u32 2147483647, %v5108_v26 }
  0xeb   :  { %v570_v4 = vsub.f32 0.0, %v538_v62  ;;  %v572_v5 = vsub.f32 0.0, %v540_v63  ;;  %v5102_v7 = vadd.f32 %v254_v0, %v5099_v3  ;;  %v256_v16 = vpop.f32.mrb[3].mxu0  ;;  %v345_v19 = vpop.f32.mrb[3].mxu1  ;;  %v5105_v25 = vadd.f32 %v343_v6, %v5099_v3 }
  0xec   :  { %v5118_v39 = vadd.f32 %v256_v16, %v5099_v3  ;;  %v541_v52 = vand.u32 2147483647, %v5114_v31  ;;  %v571_v62 = vsub.f32 0.0, %v539_v49  ;;  %v5143_v16 = vadd.f32 %v345_v19, %v5099_v3 }
  0xed   :  { %v602_v20 = vmul.f32 1.442695, %v570_v4  ;;  %v606_v21 = vmul.f32 1.442695, %v572_v5  ;;  %v546_v29 = vand.u32 2147483647, %v5102_v7 }
  0xee   :  { %v548_v32 = vand.u32 2147483647, %v5105_v25  ;;  %v260_v35 = vpop.f32.mrb[4].mxu0  ;;  %7043 = vst [vmem:[#allocation27_spill] sm:$0xff] %v5118_v39  ;;  %v349_v44 = vpop.f32.mrb[4].mxu1  ;;  %v573_v6 = vsub.f32 0.0, %v541_v52 }
  0xef   :  { %4490 = vpow2.f32 %v602_v20  ;;  %v578_v36 = vsub.f32 0.0, %v546_v29  ;;  %v5120_v45 = vpop.f32.mrb[5].mxu0  ;;  %v5123_v47 = vadd.f32 %v260_v35, %v5111_v30  ;;  %v5125_v48 = vpop.f32.mrb[5].mxu1  ;;  %v547_v53 = vand.u32 2147483647, %v5118_v39  ;;  %7044 = vst [vmem:[#allocation28_spill] sm:$0xff] %v5143_v16 }
  0xf0   :  { %4492 = vpow2.f32 %v606_v21  ;;  %v580_v46 = vsub.f32 0.0, %v548_v32  ;;  %v5136_v0 = vadd.f32 %v349_v44, %v5111_v30  ;;  %v608_v19 = vmul.f32 1.442695, %v573_v6 }
  0xf1   :  { %v618_v50 = vmul.f32 1.442695, %v578_v36  ;;  %v554_v56 = vand.u32 2147483647, %v5123_v47  ;;  %v579_v29 = vsub.f32 0.0, %v547_v53  ;;  %vm1122_vm8 = vcmp.ge.f32.partialorder %v5102_v7, 0.0 }
  0xf2   :  { %v266_v51 = vpop.f32.mrb[6].mxu0  ;;  %v622_v54 = vmul.f32 1.442695, %v580_v46  ;;  %v355_v57 = vpop.f32.mrb[6].mxu1  ;;  %v604_v36 = vmul.f32 1.442695, %v571_v62 }
  0xf3   :  { %4494 = vpow2.f32 %v618_v50  ;;  %v5131_v60 = vpop.f32.mrb[7].mxu0  ;;  %v5133_v61 = vpop.f32.mrb[7].mxu1  ;;  %v586_v63 = vsub.f32 0.0, %v554_v56  ;;  %v556_v44 = vand.u32 2147483647, %v5136_v0  ;;  %vm1124_vm9 = vcmp.ge.f32.partialorder %v5105_v25, 0.0 }
  0xf4   :  { %4496 = vpow2.f32 %v622_v54  ;;  %v549_v52 = vand.u32 2147483647, %v5143_v16  ;;  %v620_v13 = vmul.f32 1.442695, %v579_v29  ;;  %v5163_v54 = vpop.permute.xlu1 %141  ;;  %vm1130_vm11 = vcmp.ge.f32.partialorder %v5123_v47, 0.0 }
  0xf5   :  { %v634_v32 = vmul.f32 1.442695, %v586_v63  ;;  %v588_v15 = vsub.f32 0.0, %v556_v44  ;;  %v5179_v8 = vadd.f32 %v266_v51, %v5163_v54  ;;  %vm1132_vm13 = vcmp.ge.f32.partialorder %v5136_v0, 0.0 }
  0xf6   :  { %v5138_v4 = vpop.f32.mrb[8].mxu0  ;;  %v5140_v5 = vpop.f32.mrb[8].mxu1  ;;  %v581_v9 = vsub.f32 0.0, %v549_v52 }
  0xf7   :  { %v5145_v20 = vpop.f32.mrb[9].mxu0  ;;  %v5147_v21 = vpop.f32.mrb[9].mxu1  ;;  %4498 = vpow2.f32 %v634_v32  ;;  %v638_v28 = vmul.f32 1.442695, %v588_v15  ;;  %v562_v52 = vand.u32 2147483647, %v5179_v8  ;;  %v5202_v15 = vadd.f32 %v355_v57, %v5163_v54 }
  0xf8   :  { %4500 = vpow2.f32 %v604_v36  ;;  %v624_v51 = vmul.f32 1.442695, %v581_v9  ;;  %v5193_v36 = vadd.f32 %v5120_v45, %v5111_v30 }
  0xf9   :  { %v5149_v35 = vpop.eup %4490  ;;  %4502 = vpow2.f32 %v608_v19  ;;  %v594_v57 = vsub.f32 0.0, %v562_v52  ;;  %v564_v43 = vand.u32 2147483647, %v5202_v15 }
  0xfa   :  { %v5152_v46 = vpop.f32.mrb[10].mxu0  ;;  %v5154_v49 = vpop.f32.mrb[10].mxu1  ;;  %v698_v62 = vadd.f32 1.0, %v5149_v35  ;;  %4504 = vpow2.f32 %v620_v13  ;;  %7045 = vst [vmem:[#allocation29_spill] sm:$0xff] %v5193_v36  ;;  %v5210_v13 = vadd.f32 %v5125_v48, %v5111_v30  ;;  %v704_v19 = vand.u32 2147483647, %v5149_v35 }
  0xfb   :  { %v5156_v50 = vpop.eup %4492  ;;  %v5159_v56 = vpop.f32.mrb[11].mxu0  ;;  %v555_v17 = vand.u32 2147483647, %v5193_v36  ;;  %v650_v1 = vmul.f32 1.442695, %v594_v57  ;;  %v596_v37 = vsub.f32 0.0, %v564_v43 }
  0xfc   :  { %v5161_v53 = vpop.f32.mrb[11].mxu1  ;;  %v716_v12 = vadd.f32 1.0, %v5156_v50  ;;  %4506 = vlog2.f32 %v698_v62  ;;  %7046 = vst [vmem:[#allocation30_spill] sm:$0xff] %v5210_v13  ;;  %v719_v48 = vmul.f32 -0.5, %v5156_v50  ;;  %vm5231_vm2 = vcmp.lt.f32.partialorder %v704_v19, 0.0004427343 }
  0xfd   :  { %v5166_v63 = vpop.eup %4494  ;;  %v587_v40 = vsub.f32 0.0, %v555_v17  ;;  %v654_v31 = vmul.f32 1.442695, %v596_v37 }
  0xfe   :  { %v5169_v14 = vpop.f32.mrb[12].mxu0  ;;  %v5171_v6 = vpop.f32.mrb[12].mxu1  ;;  %v770_v2 = vadd.f32 1.0, %v5166_v63  ;;  %4508 = vlog2.f32 %v716_v12  ;;  %v773_v57 = vmul.f32 -0.5, %v5166_v63  ;;  %v720_v33 = vadd.f32 1.0, %v719_v48 }
  0xff   :  { %v5173_v29 = vpop.f32.mrb[13].mxu0  ;;  %v5175_v32 = vpop.f32.mrb[13].mxu1  ;;  %4510 = vrcp.f32 %v698_v62  ;;  %v776_v36 = vand.u32 2147483647, %v5166_v63 }
 0x100   :  { %v5184_v24 = vpop.eup %4496  ;;  %4512 = vrcp.f32 %v716_v12  ;;  %v701_v12 = vmul.f32 -0.5, %v5149_v35  ;;  %v774_v43 = vadd.f32 1.0, %v773_v57  ;;  %v721_v37 = vmul.f32 %v5156_v50, %v720_v33 }
 0x101   :  { %4514 = vlog2.f32 %v770_v2  ;;  %v788_v9 = vadd.f32 1.0, %v5184_v24  ;;  %v5212_v27 = vpop.eup %4498  ;;  %v791_v38 = vmul.f32 -0.5, %v5184_v24  ;;  %v794_v16 = vand.u32 2147483647, %v5184_v24 }
 0x102   :  { %v5188_v11 = vpop.f32.mrb[14].mxu0  ;;  %v5195_v44 = vpop.f32.mrb[14].mxu1  ;;  %4516 = vpow2.f32 %v638_v28  ;;  %v722_v28 = vand.u32 2147483647, %v5156_v50  ;;  %v842_v52 = vadd.f32 1.0, %v5212_v27  ;;  %v702_v18 = vadd.f32 1.0, %v701_v12 }
 0x103   :  { %v5197_v23 = vpop.f32.mrb[15].mxu0  ;;  %v5204_v62 = vpop.f32.mrb[15].mxu1  ;;  %4518 = vpow2.f32 %v624_v51  ;;  %v557_v51 = vand.u32 2147483647, %v5210_v13  ;;  %v845_v19 = vmul.f32 -0.5, %v5212_v27 }
 0x104   :  { %v5219_v45 = vpop.eup %4500  ;;  %4520 = vlog2.f32 %v788_v9  ;;  %vm5242_vm4 = vcmp.lt.f32.partialorder %v722_v28, 0.0004427343  ;;  %vm5250_vm6 = vcmp.lt.f32.partialorder %v776_v36, 0.0004427343  ;;  %vm5258_vm7 = vcmp.lt.f32.partialorder %v794_v16, 0.0004427343 }
 0x105   :  { %7047 = vst [vmem:[#allocation31_spill] sm:$0xff] %v5219_v45  ;;  %v5224_v42 = vpop.eup %4502  ;;  %4522 = vrcp.f32 %v770_v2  ;;  %v589_v2 = vsub.f32 0.0, %v557_v51  ;;  %v775_v36 = vmul.f32 %v5166_v63, %v774_v43 }
 0x106   :  { %7048 = vst [vmem:[#allocation32_spill] sm:$0xff] %v5224_v42  ;;  %v5229_v22 = vpop.eup %4504  ;;  %4524 = vpow2.f32 %v650_v1  ;;  %v703_v1 = vmul.f32 %v5149_v35, %v702_v18  ;;  %v792_v42 = vadd.f32 1.0, %v791_v38  ;;  %v846_v18 = vadd.f32 1.0, %v845_v19 }
 0x107   :  { %7049 = vst [vmem:[#allocation33_spill] sm:$0xff] %v5229_v22  ;;  %v4507_v10 = vpop.eup %4506  ;;  %4526 = vrcp.f32 %v788_v9  ;;  %v636_v22 = vmul.f32 1.442695, %v587_v40  ;;  %v848_v38 = vand.u32 2147483647, %v5212_v27  ;;  %v5268_v19 = vadd.f32 %v5138_v4, %v5089_v55 }
 0x108   :  { %v4509_v34 = vpop.eup %4508  ;;  %4528 = vlog2.f32 %v842_v52  ;;  %v700_v26 = vmul.f32 0.6931472, %v4507_v10  ;;  %v640_v40 = vmul.f32 1.442695, %v589_v2  ;;  %v793_v13 = vmul.f32 %v5184_v24, %v792_v42 }
 0x109   :  { %v4511_v12 = vpop.eup %4510  ;;  %v718_v48 = vmul.f32 0.6931472, %v4509_v34  ;;  %4530 = vpow2.f32 %v654_v31  ;;  %7058 = vst [vmem:[#allocation34_spill] sm:$0xff] %v5268_v19  ;;  %v5278_v41 = vmul.f32 %v5212_v27, %v846_v18  ;;  %v5283_v4 = vadd.f32 %v5131_v60, %v5163_v54 }
 0x10a   :  { %v4513_v39 = vpop.eup %4512  ;;  %v1146_v57 = vmul.f32 %v4511_v12, %v5149_v35  ;;  %4532 = vrcp.f32 %v842_v52  ;;  %v706_v33 = vsel %vm5231_vm2, %v703_v1, %v700_v26  ;;  %v690_v26 = vmax.f32 %v5179_v8, 0.0 }
 0x10b   :  { %v4515_v9 = vpop.eup %4514  ;;  %v724_v16 = vsel %vm5242_vm4, %v721_v37, %v718_v48  ;;  %v1148_v35 = vmul.f32 %v4513_v39, %v5156_v50  ;;  %4534 = vpow2.f32 %v636_v22  ;;  %v7059_v42 = vmax.f32 %v5092_v58, 0.0 }
 0x10c   :  { %v5247_v45 = vpop.eup %4516  ;;  %v772_v31 = vmul.f32 0.6931472, %v4515_v9  ;;  %v5293_v17 = vsel %vm1114_vm3, %v4511_v12, %v1146_v57  ;;  %vm5295_vm10 = vcmp.lt.f32.partialorder %v848_v38, 0.0004427343  ;;  %4536 = vpow2.f32 %v640_v40 }
 0x10d   :  { %v5255_v51 = vpop.eup %4518  ;;  %v860_v52 = vadd.f32 1.0, %v5247_v45  ;;  %v5289_v1 = vadd.f32 %v706_v33, %v7059_v42  ;;  %v7063_v60 = vmax.f32 %v5095_v59, 0.0  ;;  %v542_v58 = vand.u32 2147483647, %v5268_v19 }
 0x10e   :  { %v4521_v28 = vpop.eup %4520  ;;  %v778_v37 = vsel %vm5250_vm6, %v775_v36, %v772_v31  ;;  %v5309_v57 = vsel %vm1116_vm5, %v4513_v39, %v1148_v35  ;;  %v5314_v40 = vadd.f32 %v5133_v61, %v5163_v54  ;;  %v863_v33 = vmul.f32 -0.5, %v5247_v45 }
 0x10f   :  { %v4523_v2 = vpop.eup %4522  ;;  %7060 = vst [vmem:[#allocation35_spill] sm:$0xff] %v5289_v1  ;;  %v5302_v48 = vadd.f32 %v724_v16, %v7063_v60  ;;  %v790_v18 = vmul.f32 0.6931472, %v4521_v28  ;;  %4538 = vlog2.f32 %v860_v52  ;;  %v563_v28 = vand.u32 2147483647, %v5283_v4 }
 0x110   :  { %v5285_v50 = vpop.eup %4524  ;;  %v1154_v38 = vmul.f32 %v4523_v2, %v5166_v63  ;;  %v574_v31 = vsub.f32 0.0, %v542_v58  ;;  %v7065_v59 = vmax.f32 %v5102_v7, 0.0  ;;  %v5330_v16 = vadd.f32 %v5140_v5, %v5089_v55 }
 0x111   :  { %v4527_v9 = vpop.eup %4526  ;;  %7064 = vst [vmem:[#allocation36_spill] sm:$0xff] %v5302_v48  ;;  %v914_v10 = vadd.f32 1.0, %v5285_v50  ;;  %v796_v35 = vsel %vm5258_vm7, %v793_v13, %v790_v18  ;;  %v866_v60 = vand.u32 2147483647, %v5247_v45  ;;  %4540 = vrcp.f32 %v860_v52 }
 0x112   :  { %v4529_v12 = vpop.eup %4528  ;;  %v5323_v39 = vadd.f32 %v778_v37, %v7065_v59  ;;  %v1156_v63 = vmul.f32 %v4527_v9, %v5184_v24  ;;  %v565_v37 = vand.u32 2147483647, %v5314_v40  ;;  %v610_v59 = vmul.f32 1.442695, %v574_v31 }
 0x113   :  { %v5319_v36 = vpop.eup %4530  ;;  %v844_v42 = vmul.f32 0.6931472, %v4529_v12  ;;  %v544_v24 = vand.u32 2147483647, %v5330_v16  ;;  %v5339_v61 = vadd.f32 %v5145_v20, %v5089_v55  ;;  %v864_v22 = vadd.f32 1.0, %v863_v33 }
 0x114   :  { %7066 = vst [vmem:[#allocation37_spill] sm:$0xff] %v5323_v39  ;;  %v4533_v58 = vpop.eup %4532  ;;  %4542 = vlog2.f32 %v914_v10  ;;  %v932_v5 = vadd.f32 1.0, %v5319_v36  ;;  %v595_v34 = vsub.f32 0.0, %v563_v28  ;;  %v5344_v13 = vsel %vm1122_vm8, %v4523_v2, %v1154_v38  ;;  %v7109_v39 = vld [vmem:[#allocation33_spill] sm:$0xff] }
 0x115   :  { %7067 = vst [vmem:[#allocation38_spill] sm:$0xff] %v5339_v61  ;;  %v7068_v52 = vmax.f32 %v5105_v25, 0.0  ;;  %v5352_v12 = vsel %vm1124_vm9, %v4527_v9, %v1156_v63  ;;  %v576_v31 = vsub.f32 0.0, %v544_v24  ;;  %v5354_v20 = vpop.eup %4534  ;;  %v850_v33 = vsel %vm5295_vm10, %v5278_v41, %v844_v42 }
 0x116   :  { %v1162_v28 = vmul.f32 %v4533_v58, %v5212_v27  ;;  %v917_v7 = vmul.f32 -0.5, %v5285_v50  ;;  %4544 = vpow2.f32 %v610_v59  ;;  %v5361_v2 = vpop.eup %4536  ;;  %v597_v38 = vsub.f32 0.0, %v565_v37 }
 0x117   :  { %v5348_v18 = vadd.f32 %v796_v35, %v7068_v52  ;;  %4546 = vrcp.f32 %v914_v10  ;;  %v614_v35 = vmul.f32 1.442695, %v576_v31  ;;  %v543_v25 = vand.u32 2147483647, %v5339_v61 }
 0x118   :  { %v865_v9 = vmul.f32 %v5247_v45, %v864_v22  ;;  %vm5365_vm12 = vcmp.lt.f32.partialorder %v866_v60, 0.0004427343  ;;  %4548 = vlog2.f32 %v932_v5  ;;  %v652_v41 = vmul.f32 1.442695, %v595_v34 }
 0x119   :  { %7069 = vst [vmem:[#allocation39_spill] sm:$0xff] %v5348_v18  ;;  %v4539_v43 = vpop.eup %4538  ;;  %v7072_v27 = vmax.f32 %v5123_v47, 0.0  ;;  %4550 = vpow2.f32 %v614_v35  ;;  %v5376_v10 = vadd.f32 %v5152_v46, %v5099_v3  ;;  %v5380_v22 = vsel %vm1130_vm11, %v4533_v58, %v1162_v28 }
 0x11a   :  { %7075 = vst [vmem:[#allocation42_spill] sm:$0xff] %v5380_v22  ;;  %v920_v60 = vand.u32 2147483647, %v5285_v50  ;;  %v935_v37 = vmul.f32 -0.5, %v5319_v36  ;;  %v5386_v24 = vadd.f32 %v5154_v49, %v5099_v3  ;;  %v918_v34 = vadd.f32 1.0, %v917_v7 }
 0x11b   :  { %v5371_v42 = vadd.f32 %v850_v33, %v7072_v27  ;;  %7074 = vst [vmem:[#allocation41_spill] sm:$0xff] %v5376_v10  ;;  %v656_v52 = vmul.f32 1.442695, %v597_v38  ;;  %v575_v31 = vsub.f32 0.0, %v543_v25  ;;  %v550_v46 = vand.u32 2147483647, %v5376_v10  ;;  %v4541_v33 = vpop.eup %4540 }
 0x11c   :  { %v862_v35 = vmul.f32 0.6931472, %v4539_v43  ;;  %4552 = vrcp.f32 %v932_v5  ;;  %v5392_v47 = vadd.f32 %v5147_v21, %v5089_v55  ;;  %v552_v58 = vand.u32 2147483647, %v5386_v24 }
 0x11d   :  { %7073 = vst [vmem:[#allocation40_spill] sm:$0xff] %v5371_v42  ;;  %v938_v28 = vand.u32 2147483647, %v5319_v36  ;;  %4554 = vpow2.f32 %v652_v41  ;;  %v582_v27 = vsub.f32 0.0, %v550_v46  ;;  %vm5397_vm14 = vcmp.lt.f32.partialorder %v920_v60, 0.0004427343 }
 0x11e   :  { %v4543_v7 = vpop.eup %4542  ;;  %v936_v25 = vadd.f32 1.0, %v935_v37  ;;  %v584_v43 = vsub.f32 0.0, %v552_v58  ;;  %v5403_v5 = vadd.f32 %v5159_v56, %v5099_v3  ;;  %v919_v55 = vmul.f32 %v5285_v50, %v918_v34 }
 0x11f   :  { %v612_v21 = vmul.f32 1.442695, %v575_v31  ;;  %v626_v59 = vmul.f32 1.442695, %v582_v27  ;;  %v5408_v41 = vadd.f32 %v5161_v53, %v5099_v3  ;;  %v868_v60 = vsel %vm5365_vm12, %v865_v9, %v862_v35 }
 0x120   :  { %v5410_v46 = vpop.eup %4544  ;;  %v1164_v37 = vmul.f32 %v4541_v33, %v5247_v45  ;;  %4556 = vpow2.f32 %v656_v52  ;;  %v545_v58 = vand.u32 2147483647, %v5392_v47  ;;  %v916_v49 = vmul.f32 0.6931472, %v4543_v7 }
 0x121   :  { %v4547_v56 = vpop.eup %4546  ;;  %vm5416_vm15 = vcmp.lt.f32.partialorder %v938_v28, 0.0004427343  ;;  %v734_v31 = vadd.f32 1.0, %v5410_v46  ;;  %v630_v53 = vmul.f32 1.442695, %v584_v43  ;;  %v937_v63 = vmul.f32 %v5319_v36, %v936_v25 }
 0x122   :  { %v4549_v27 = vpop.eup %4548  ;;  %4558 = vpow2.f32 %v626_v59  ;;  %v551_v45 = vand.u32 2147483647, %v5403_v5  ;;  %v7080_v35 = vmax.f32 %v5136_v0, 0.0  ;;  %vm1138_vm2 = vcmp.ge.f32.partialorder %v5179_v8, 0.0 }
 0x123   :  { %v5425_v52 = vpop.eup %4550  ;;  %4560 = vpow2.f32 %v612_v21  ;;  %v553_v7 = vand.u32 2147483647, %v5408_v41  ;;  %v5435_v43 = vadd.f32 %v5169_v14, %v5111_v30  ;;  %v5439_v59 = vsel %vm1132_vm13, %v4541_v33, %v1164_v37 }
 0x124   :  { %v5429_v28 = vadd.f32 %v868_v60, %v7080_v35  ;;  %7082 = vst [vmem:[#allocation44_spill] sm:$0xff] %v5439_v59  ;;  %4562 = vlog2.f32 %v734_v31  ;;  %v752_v25 = vadd.f32 1.0, %v5425_v52  ;;  %v577_v9 = vsub.f32 0.0, %v545_v58 }
 0x125   :  { %v922_v60 = vsel %vm5397_vm14, %v919_v55, %v916_v49  ;;  %v1170_v35 = vmul.f32 %v4547_v56, %v5285_v50  ;;  %vm1140_vm3 = vcmp.ge.f32.partialorder %v5202_v15, 0.0  ;;  %4564 = vpow2.f32 %v630_v53 }
 0x126   :  { %7081 = vst [vmem:[#allocation43_spill] sm:$0xff] %v5429_v28  ;;  %v4553_v14 = vpop.eup %4552  ;;  %v934_v3 = vmul.f32 0.6931472, %v4549_v27  ;;  %v737_v0 = vmul.f32 -0.5, %v5410_v46  ;;  %4566 = vlog2.f32 %v752_v25  ;;  %v583_v33 = vsub.f32 0.0, %v551_v45 }
 0x127   :  { %v5448_v37 = vpop.eup %4554  ;;  %4568 = vrcp.f32 %v734_v31  ;;  %v755_v58 = vmul.f32 -0.5, %v5425_v52  ;;  %v585_v38 = vsub.f32 0.0, %v553_v7  ;;  %v558_v49 = vand.u32 2147483647, %v5435_v43 }
 0x128   :  { %v616_v50 = vmul.f32 1.442695, %v577_v9  ;;  %v5456_v53 = vadd.f32 %v5171_v6, %v5111_v30  ;;  %v5460_v27 = vadd.f32 %v922_v60, %v690_v26  ;;  %v1172_v31 = vmul.f32 %v4553_v14, %v5319_v36 }
 0x129   :  { %4570 = vrcp.f32 %v752_v25  ;;  %v590_v45 = vsub.f32 0.0, %v558_v49  ;;  %v940_v9 = vsel %vm5416_vm15, %v937_v63, %v934_v3  ;;  %v740_v55 = vand.u32 2147483647, %v5410_v46 }
 0x12a   :  { %7083 = vst [vmem:[#allocation45_spill] sm:$0xff] %v5460_v27  ;;  %v5463_v7 = vpop.eup %4556  ;;  %v628_v21 = vmul.f32 1.442695, %v583_v33  ;;  %v560_v28 = vand.u32 2147483647, %v5456_v53  ;;  %v738_v6 = vadd.f32 1.0, %v737_v0  ;;  %v5473_v36 = vsel %vm1138_vm2, %v4547_v56, %v1170_v35 }
 0x12b   :  { %v756_v42 = vadd.f32 1.0, %v755_v58  ;;  %v632_v18 = vmul.f32 1.442695, %v585_v38  ;;  %v642_v48 = vmul.f32 1.442695, %v590_v45  ;;  %7084 = vst [vmem:[#allocation46_spill] sm:$0xff] %v5473_v36  ;;  %4572 = vpow2.f32 %v616_v50 }
 0x12c   :  { %v5469_v26 = vpop.eup %4558  ;;  %v5477_v34 = vadd.f32 %v5173_v29, %v5111_v30  ;;  %v5481_v3 = vadd.f32 %v5175_v32, %v5111_v30  ;;  %v592_v0 = vsub.f32 0.0, %v560_v28  ;;  %v7087_v56 = vmax.f32 %v5202_v15, 0.0 }
 0x12d   :  { %v5483_v63 = vpop.eup %4560  ;;  %v806_v25 = vadd.f32 1.0, %v5469_v26  ;;  %4574 = vpow2.f32 %v642_v48  ;;  %v5493_v29 = vsel %vm1140_vm3, %v4553_v14, %v1172_v31  ;;  %v758_v30 = vand.u32 2147483647, %v5425_v52 }
 0x12e   :  { %7085 = vst [vmem:[#allocation47_spill] sm:$0xff] %v5477_v34  ;;  %7086 = vst [vmem:[#allocation48_spill] sm:$0xff] %v5483_v63  ;;  %v4563_v8 = vpop.eup %4562  ;;  %v5489_v35 = vadd.f32 %v940_v9, %v7087_v56  ;;  %4576 = vpow2.f32 %v628_v21  ;;  %v5499_v33 = vmul.f32 %v5410_v46, %v738_v6  ;;  %vm5501_vm4 = vcmp.lt.f32.partialorder %v740_v55, 0.0004427343 }
 0x12f   :  { %7089 = vst [vmem:[#allocation50_spill] sm:$0xff] %v5493_v29  ;;  %v5496_v32 = vpop.eup %4564  ;;  %v7091_v48 = vmov 0  ;;  %vm1118_vm5 = vcmp.ge.f32.partialorder %v5268_v19, 0.0  ;;  %v757_v28 = vmul.f32 %v5425_v52, %v756_v42  ;;  %4578 = vpow2.f32 %v632_v18 }
 0x130   :  { %7088 = vst [vmem:[#allocation49_spill] sm:$0xff] %v5489_v35  ;;  %7090 = vst [vmem:[#allocation51_spill] sm:$0xff] %v5499_v33  ;;  %v7092_v48 = vsel %vm5501_vm4, 4294967295, %v7091_v48  ;;  %v4567_v15 = vpop.eup %4566  ;;  %v824_v14 = vadd.f32 1.0, %v5496_v32  ;;  %v559_v58 = vand.u32 2147483647, %v5477_v34  ;;  %v5512_v38 = vadd.f32 %v5188_v11, %v5163_v54 }
 0x131   :  { %7093 = vst [vmem:[#allocation52_spill] sm:$0xff] %v7092_v48  ;;  %v561_v21 = vand.u32 2147483647, %v5481_v3  ;;  %v4569_v49 = vpop.eup %4568  ;;  %v754_v50 = vmul.f32 0.6931472, %v4567_v15  ;;  %vm1120_vm6 = vcmp.ge.f32.partialorder %v5330_v16, 0.0  ;;  %4580 = vlog2.f32 %v806_v25 }
 0x132   :  { %v809_v55 = vmul.f32 -0.5, %v5469_v26  ;;  %v646_v42 = vmul.f32 1.442695, %v592_v0  ;;  %vm759_vm7 = vcmp.lt.f32.partialorder %v758_v30, 0.0004427343  ;;  %4582 = vlog2.f32 %v824_v14 }
 0x133   :  { %v827_v18 = vmul.f32 -0.5, %v5496_v32  ;;  %v4571_v45 = vpop.eup %4570  ;;  %v5518_v9 = vmul.f32 0.6931472, %v4563_v8  ;;  %v760_v6 = vsel %vm759_vm7, %v757_v28, %v754_v50  ;;  %v812_v11 = vand.u32 2147483647, %v5469_v26 }
 0x134   :  { %4584 = vrcp.f32 %v806_v25  ;;  %v1150_v56 = vmul.f32 %v4569_v49, %v5410_v46  ;;  %v7095_v15 = vmax.f32 %v5330_v16, 0.0  ;;  %v591_v0 = vsub.f32 0.0, %v559_v58 }
 0x135   :  { %7094 = vst [vmem:[#allocation53_spill] sm:$0xff] %v5518_v9  ;;  %4586 = vrcp.f32 %v824_v14  ;;  %v810_v30 = vadd.f32 1.0, %v809_v55  ;;  %v593_v35 = vsub.f32 0.0, %v561_v21  ;;  %v566_v31 = vand.u32 2147483647, %v5512_v38  ;;  %v5527_v27 = vpop.eup %4572 }
 0x136   :  { %v5524_v60 = vadd.f32 %v760_v6, %v7095_v15  ;;  %4588 = vpow2.f32 %v646_v42  ;;  %v1152_v8 = vmul.f32 %v4571_v45, %v5425_v52  ;;  %v828_v28 = vadd.f32 1.0, %v827_v18 }
 0x137   :  { %v5532_v25 = vadd.f32 %v5195_v44, %v5163_v54  ;;  %v5536_v46 = vadd.f32 %v5197_v23, %v5163_v54  ;;  %v5538_v14 = vpop.eup %4574  ;;  %v830_v21 = vand.u32 2147483647, %v5496_v32  ;;  %v598_v50 = vsub.f32 0.0, %v566_v31 }
 0x138   :  { %7096 = vst [vmem:[#allocation54_spill] sm:$0xff] %v5524_v60  ;;  %v5546_v55 = vpop.eup %4576  ;;  %v5550_v44 = vsel %vm1118_vm5, %v4569_v49, %v1150_v56  ;;  %v878_v23 = vadd.f32 1.0, %v5538_v14  ;;  %v644_v42 = vmul.f32 1.442695, %v591_v0  ;;  %v5557_v15 = vmul.f32 %v5469_v26, %v810_v30 }
 0x139   :  { %7097 = vst [vmem:[#allocation55_spill] sm:$0xff] %v5536_v46  ;;  %7098 = vst [vmem:[#allocation56_spill] sm:$0xff] %v5550_v44  ;;  %v568_v18 = vand.u32 2147483647, %v5532_v25  ;;  %v5554_v6 = vpop.eup %4578  ;;  %vm5559_vm8 = vcmp.lt.f32.partialorder %v812_v11, 0.0004427343  ;;  %v5566_v49 = vsel %vm1120_vm6, %v4571_v45, %v1152_v8  ;;  %v829_v56 = vmul.f32 %v5496_v32, %v828_v28 }
 0x13a   :  { %7099 = vst [vmem:[#allocation57_spill] sm:$0xff] %v5557_v15  ;;  %v7100_v58 = vmov 0  ;;  %v648_v31 = vmul.f32 1.442695, %v593_v35  ;;  %v658_v52 = vmul.f32 1.442695, %v598_v50  ;;  %4590 = vlog2.f32 %v878_v23 }
 0x13b   :  { %v7101_v58 = vsel %vm5559_vm8, 4294967295, %v7100_v58  ;;  %v567_v60 = vand.u32 2147483647, %v5536_v46  ;;  %7103 = vst [vmem:[#allocation59_spill] sm:$0xff] %v5566_v49  ;;  %v5571_v0 = vadd.f32 %v5204_v62, %v5163_v54  ;;  %v4581_v30 = vpop.eup %4580  ;;  %v881_v11 = vmul.f32 -0.5, %v5538_v14  ;;  %v7107_v54 = vld [vmem:[#allocation31_spill] sm:$0xff] }
 0x13c   :  { %7102 = vst [vmem:[#allocation58_spill] sm:$0xff] %v7101_v58  ;;  %4592 = vrcp.f32 %v878_v23  ;;  %v600_v9 = vsub.f32 0.0, %v568_v18  ;;  %v4583_v50 = vpop.eup %4582  ;;  %vm1126_vm9 = vcmp.ge.f32.partialorder %v5376_v10, 0.0  ;;  %vm5575_vm10 = vcmp.lt.f32.partialorder %v830_v21, 0.0004427343 }
 0x13d   :  { %7104 = vst [vmem:[#allocation60_spill] sm:$0xff] %v5571_v0  ;;  %v599_v35 = vsub.f32 0.0, %v567_v60  ;;  %vm1128_vm11 = vcmp.ge.f32.partialorder %v5386_v24, 0.0  ;;  %4594 = vpow2.f32 %v658_v52  ;;  %v5582_v62 = vadd.f32 1.0, %v7107_v54 }
 0x13e   :  { %v4585_v8 = vpop.eup %4584  ;;  %v826_v28 = vmul.f32 0.6931472, %v4583_v50  ;;  %v884_v23 = vand.u32 2147483647, %v5538_v14  ;;  %4596 = vpow2.f32 %v644_v42  ;;  %v662_v60 = vmul.f32 1.442695, %v600_v9 }
 0x13f   :  { %v4587_v18 = vpop.eup %4586  ;;  %v5585_v33 = vmul.f32 0.6931472, %v4581_v30  ;;  %4598 = vpow2.f32 %v648_v31  ;;  %v660_v21 = vmul.f32 1.442695, %v599_v35  ;;  %v569_v48 = vand.u32 2147483647, %v5571_v0 }
 0x140   :  { %v5588_v19 = vpop.eup %4588  ;;  %v832_v52 = vsel %vm5575_vm10, %v829_v56, %v826_v28  ;;  %v882_v45 = vadd.f32 1.0, %v881_v11  ;;  %4600 = vpow2.f32 %v662_v60  ;;  %v5593_v50 = vadd.f32 1.0, %v7109_v39 }
 0x141   :  { %7108 = vst [vmem:[#allocation31_spill] sm:$0xff] %v5585_v33  ;;  %v7110_v42 = vmax.f32 %v5386_v24, 0.0  ;;  %v896_v30 = vadd.f32 1.0, %v5588_v19  ;;  %v899_v31 = vmul.f32 -0.5, %v5588_v19  ;;  %v1158_v1 = vmul.f32 %v4585_v8, %v5469_v26 }
 0x142   :  { %v1160_v16 = vmul.f32 %v4587_v18, %v5496_v32  ;;  %4602 = vpow2.f32 %v660_v21  ;;  %v601_v56 = vsub.f32 0.0, %v569_v48  ;;  %vm5608_vm12 = vcmp.lt.f32.partialorder %v884_v23, 0.0004427343 }
 0x143   :  { %v5597_v9 = vadd.f32 %v832_v52, %v7110_v42  ;;  %vm1134_vm13 = vcmp.ge.f32.partialorder %v5435_v43, 0.0  ;;  %4604 = vlog2.f32 %v896_v30  ;;  %v883_v26 = vmul.f32 %v5538_v14, %v882_v45  ;;  %v7114_v42 = vld [vmem:[#allocation32_spill] sm:$0xff] }
 0x144   :  { %4606 = vrcp.f32 %v896_v30  ;;  %v664_v32 = vmul.f32 1.442695, %v601_v56  ;;  %v4591_v21 = vpop.eup %4590  ;;  %v900_v52 = vadd.f32 1.0, %v899_v31  ;;  %v902_v23 = vand.u32 2147483647, %v5588_v19 }
 0x145   :  { %7111 = vst [vmem:[#allocation33_spill] sm:$0xff] %v5597_v9  ;;  %4608 = vrcp.f32 %v5582_v62  ;;  %v5621_v11 = vadd.f32 1.0, %v7114_v42  ;;  %v5625_v60 = vsel %vm1126_vm9, %v4585_v8, %v1158_v1  ;;  %v5629_v45 = vsel %vm1128_vm11, %v4587_v18, %v1160_v16 }
 0x146   :  { %v4593_v35 = vpop.eup %4592  ;;  %7116 = vst [vmem:[#allocation61_spill] sm:$0xff] %v5625_v60  ;;  %7117 = vst [vmem:[#allocation62_spill] sm:$0xff] %v5629_v45  ;;  %v880_v30 = vmul.f32 0.6931472, %v4591_v21  ;;  %4610 = vpow2.f32 %v664_v32  ;;  %v5635_v31 = vadd.f32 1.0, %v5255_v51  ;;  %v7120_v9 = vmax.f32 %v5435_v43, 0.0 }
 0x147   :  { %7115 = vst [vmem:[#allocation32_spill] sm:$0xff] %v5621_v11  ;;  %v5631_v56 = vpop.eup %4594  ;;  %4612 = vrcp.f32 %v5593_v50  ;;  %v1166_v18 = vmul.f32 %v4593_v35, %v5538_v14  ;;  %v901_v48 = vmul.f32 %v5588_v19, %v900_v52  ;;  %vm5655_vm14 = vcmp.lt.f32.partialorder %v902_v23, 0.0004427343  ;;  %v7126_v52 = vld [vmem:[#allocation25_spill] sm:$0xff]  ;;  %v7127_v23 = vld [vmem:[#allocation27_spill] sm:$0xff]  ;;  %v7132_v43 = vld [vmem:[#allocation26_spill] sm:$0xff] }
 0x148   :  { %7118 = vst [vmem:[#allocation63_spill] sm:$0xff] %v5635_v31  ;;  %v5641_v8 = vpop.eup %4596  ;;  %v886_v24 = vsel %vm5608_vm12, %v883_v26, %v880_v30  ;;  %v950_v16 = vadd.f32 1.0, %v5631_v56  ;;  %v953_v32 = vmul.f32 -0.5, %v5631_v56  ;;  %4614 = vrcp.f32 %v5621_v11 }
 0x149   :  { %v5648_v21 = vpop.eup %4598  ;;  %v5652_v33 = vadd.f32 %v886_v24, %v7120_v9  ;;  %vm1136_vm15 = vcmp.ge.f32.partialorder %v5456_v53, 0.0  ;;  %v956_v14 = vand.u32 2147483647, %v5631_v56  ;;  %v5665_v26 = vadd.f32 1.0, %v5354_v20 }
 0x14a   :  { %7119 = vst [vmem:[#allocation64_spill] sm:$0xff] %v5648_v21  ;;  %v5660_v28 = vpop.eup %4600  ;;  %4616 = vlog2.f32 %v950_v16  ;;  %v5668_v9 = vadd.f32 1.0, %v5448_v37  ;;  %vm1115_vm2 = vcmp.ge.f32.partialorder %v7126_v52, 0.0  ;;  %vm1123_vm3 = vcmp.ge.f32.partialorder %v7127_v23, 0.0 }
 0x14b   :  { %7121 = vst [vmem:[#allocation65_spill] sm:$0xff] %v5652_v33  ;;  %7124 = vst [vmem:[#allocation66_spill] sm:$0xff] %v5665_v26  ;;  %v954_v30 = vadd.f32 1.0, %v953_v32  ;;  %4618 = vrcp.f32 %v950_v16  ;;  %v968_v24 = vadd.f32 1.0, %v5660_v28  ;;  %v971_v33 = vmul.f32 -0.5, %v5660_v28 }
 0x14c   :  { %7125 = vst [vmem:[#allocation67_spill] sm:$0xff] %v5668_v9  ;;  %v5674_v15 = vpop.eup %4602  ;;  %v5678_v58 = vsel %vm1134_vm13, %v4593_v35, %v1166_v18  ;;  %4620 = vrcp.f32 %v5635_v31  ;;  %v5682_v10 = vadd.f32 1.0, %v5361_v2  ;;  %v5685_v59 = vadd.f32 1.0, %v5463_v7 }
 0x14d   :  { %7128 = vst [vmem:[#allocation25_spill] sm:$0xff] %v5674_v15  ;;  %v4605_v32 = vpop.eup %4604  ;;  %4622 = vlog2.f32 %v968_v24  ;;  %v972_v16 = vadd.f32 1.0, %v971_v33  ;;  %v974_v29 = vand.u32 2147483647, %v5660_v28  ;;  %v5689_v22 = vadd.f32 1.0, %v5483_v63 }
 0x14e   :  { %7129 = vst [vmem:[#allocation27_spill] sm:$0xff] %v5682_v10  ;;  %7130 = vst [vmem:[#allocation68_spill] sm:$0xff] %v5685_v59  ;;  %v4607_v36 = vpop.eup %4606  ;;  %vm1117_vm5 = vcmp.ge.f32.partialorder %v7132_v43, 0.0  ;;  %v898_v35 = vmul.f32 0.6931472, %v4605_v32  ;;  %4624 = vrcp.f32 %v968_v24  ;;  %v955_v63 = vmul.f32 %v5631_v56, %v954_v30  ;;  %v7135_v24 = vld [vmem:[#allocation28_spill] sm:$0xff] }
 0x14f   :  { %7131 = vst [vmem:[#allocation69_spill] sm:$0xff] %v5689_v22  ;;  %vm5692_vm6 = vcmp.lt.f32.partialorder %v956_v14, 0.0004427343  ;;  %v4609_v11 = vpop.eup %4608  ;;  %v1168_v0 = vmul.f32 %v4607_v36, %v5588_v19  ;;  %vm1142_vm7 = vcmp.ge.f32.partialorder %v5512_v38, 0.0  ;;  %4626 = vrcp.f32 %v5665_v26 }
 0x150   :  { %v5705_v14 = vadd.f32 1.0, %v5546_v55  ;;  %v5707_v32 = vpop.eup %4610  ;;  %vm1125_vm9 = vcmp.ge.f32.partialorder %v7135_v24, 0.0  ;;  %v904_v31 = vsel %vm5655_vm14, %v901_v48, %v898_v35  ;;  %v1147_v33 = vmul.f32 %v4609_v11, %v7107_v54 }
 0x151   :  { %4628 = vrcp.f32 %v5668_v9  ;;  %v5715_v19 = vadd.f32 1.0, %v5527_v27  ;;  %v4613_v30 = vpop.eup %4612  ;;  %v7137_v26 = vmax.f32 %v5456_v53, 0.0  ;;  %vm5721_vm10 = vcmp.lt.f32.partialorder %v974_v29, 0.0004427343  ;;  %v7142_v9 = vld [vmem:[#allocation29_spill] sm:$0xff] }
 0x152   :  { %4630 = vrcp.f32 %v5682_v10  ;;  %v5727_v48 = vadd.f32 1.0, %v5554_v6  ;;  %v973_v1 = vmul.f32 %v5660_v28, %v972_v16  ;;  %vm1144_vm11 = vcmp.ge.f32.partialorder %v5532_v25, 0.0  ;;  %v4615_v29 = vpop.eup %4614 }
 0x153   :  { %7136 = vst [vmem:[#allocation26_spill] sm:$0xff] %v5715_v19  ;;  %v5719_v49 = vadd.f32 %v904_v31, %v7137_v26  ;;  %v1155_v35 = vmul.f32 %v4613_v30, %v7109_v39  ;;  %4632 = vrcp.f32 %v5685_v59  ;;  %v5734_v31 = vadd.f32 1.0, %v5641_v8 }
 0x154   :  { %7141 = vst [vmem:[#allocation70_spill] sm:$0xff] %v5727_v48  ;;  %v5738_v26 = vsel %vm1136_vm15, %v4607_v36, %v1168_v0  ;;  %4634 = vrcp.f32 %v5689_v22  ;;  %v5745_v16 = vadd.f32 1.0, %v5648_v21  ;;  %v4617_v10 = vpop.eup %4616  ;;  %vm1131_vm12 = vcmp.ge.f32.partialorder %v7142_v9, 0.0 }
 0x155   :  { %7138 = vst [vmem:[#allocation28_spill] sm:$0xff] %v5719_v49  ;;  %v5742_v49 = vadd.f32 1.0, %v5674_v15  ;;  %vm1139_vm13 = vcmp.ge.f32.partialorder %v5283_v4, 0.0  ;;  %v1179_v59 = vsel %vm1115_vm2, %v4609_v11, %v1147_v33  ;;  %v1187_v53 = vsel %vm1123_vm3, %v4613_v30, %v1155_v35  ;;  %v4619_v0 = vpop.eup %4618  ;;  %v7144_v15 = vld [vmem:[#allocation30_spill] sm:$0xff] }
 0x156   :  { %v1149_v36 = vmul.f32 %v4615_v29, %v7114_v42  ;;  %4636 = vrcp.f32 %v5705_v14  ;;  %v952_v22 = vmul.f32 0.6931472, %v4617_v10  ;;  %v4275_v44 = vpack.c.bf16 %v1187_v53, %v1179_v59  ;;  %v4621_v21 = vpop.eup %4620 }
 0x157   :  { %4638 = vrcp.f32 %v5715_v19  ;;  %v5757_v60 = vadd.f32 1.0, %v5707_v32  ;;  %vm1133_vm14 = vcmp.ge.f32.partialorder %v7144_v15, 0.0  ;;  %vm1141_vm15 = vcmp.ge.f32.partialorder %v5314_v40, 0.0  ;;  %v4623_v10 = vpop.eup %4622 }
 0x158   :  { %v1174_v11 = vmul.f32 %v4619_v0, %v5631_v56  ;;  %4640 = vrcp.f32 %v5727_v48  ;;  %v710_v33 = vmul.f32 -0.5, %v7107_v54  ;;  %v782_v30 = vmul.f32 -0.5, %v7109_v39  ;;  %4276 = vmatprep.subr.bf16.mxu0 %v4275_v44  ;;  %v4625_v19 = vpop.eup %4624 }
 0x159   :  { %7143 = vst [vmem:[#allocation29_spill] sm:$0xff] %v5757_v60  ;;  %v958_v59 = vsel %vm5692_vm6, %v955_v63, %v952_v22  ;;  %v1157_v35 = vmul.f32 %v4621_v21, %v5255_v51  ;;  %v1181_v53 = vsel %vm1117_vm5, %v4615_v29, %v1149_v36  ;;  %4642 = vrcp.f32 %v5734_v31  ;;  %v4627_v18 = vpop.eup %4626 }
 0x15a   :  { %vm1119_vm2 = vcmp.ge.f32.partialorder %v5339_v61, 0.0  ;;  %vm1127_vm3 = vcmp.ge.f32.partialorder %v5403_v5, 0.0  ;;  %v7145_v56 = vmax.f32 %v5512_v38, 0.0  ;;  %v5779_v22 = vsel %vm1142_vm7, %v4619_v0, %v1174_v11  ;;  %v7155_v38 = vld [vmem:[#allocation42_spill] sm:$0xff]  ;;  %v7159_v61 = vld [vmem:[#allocation44_spill] sm:$0xff] }
 0x15b   :  { %v970_v63 = vmul.f32 0.6931472, %v4623_v10  ;;  %v7147_v44 = vpack.c.bf16 %v5344_v13, %v5293_v17  ;;  %4644 = vrcp.f32 %v5742_v49  ;;  %v1176_v29 = vmul.f32 %v4625_v19, %v5660_v28  ;;  %v4629_v0 = vpop.eup %4628 }
 0x15c   :  { %v5775_v48 = vadd.f32 %v958_v59, %v7145_v56  ;;  %v1189_v36 = vsel %vm1125_vm9, %v4621_v21, %v1157_v35  ;;  %4646 = vrcp.f32 %v5745_v16  ;;  %vm1121_vm5 = vcmp.ge.f32.partialorder %v5392_v47, 0.0  ;;  %v4631_v28 = vpop.eup %4630 }
 0x15d   :  { %4278 = vmatpush1.bf16.msra.mxu0 %v7147_v44  ;;  %vm1129_vm6 = vcmp.ge.f32.partialorder %v5408_v41, 0.0  ;;  %v976_v17 = vsel %vm5721_vm10, %v973_v1, %v970_v63  ;;  %v4283_v13 = vpack.c.bf16 %v1189_v36, %v1181_v53  ;;  %v1163_v11 = vmul.f32 %v4627_v18, %v5354_v20  ;;  %v4633_v45 = vpop.eup %4632  ;;  %v7151_v36 = vld [vmem:[#allocation60_spill] sm:$0xff]  ;;  %v7154_v53 = vld [vmem:[#allocation46_spill] sm:$0xff] }
 0x15e   :  { %7146 = vst [vmem:[#allocation30_spill] sm:$0xff] %v5775_v48  ;;  %4648 = vrcp.f32 %v5757_v60  ;;  %vm1135_vm7 = vcmp.ge.f32.partialorder %v5477_v34, 0.0  ;;  %v7148_v21 = vmax.f32 %v5532_v25, 0.0  ;;  %v5804_v59 = vsel %vm1144_vm11, %v4625_v19, %v1176_v29  ;;  %v4635_v56 = vpop.eup %4634  ;;  %v7158_v60 = vld [vmem:[#allocation50_spill] sm:$0xff] }
 0x15f   :  { %v1171_v35 = vmul.f32 %v4629_v0, %v5448_v37  ;;  %4650 = vlog2.f32 %v5582_v62  ;;  %vm1143_vm9 = vcmp.ge.f32.partialorder %v5536_v46, 0.0  ;;  %4284 = vmatprep.subr.bf16.mxu1 %v4283_v13  ;;  %v1165_v1 = vmul.f32 %v4631_v28, %v5361_v2  ;;  %v7174_v46 = vld [vmem:[#allocation36_spill] sm:$0xff] }
 0x160   :  { %v5800_v10 = vadd.f32 %v976_v17, %v7148_v21  ;;  %vm1211_vm10 = vcmask 261120   ;;  %4652 = vlog2.f32 %v5593_v50  ;;  %v7150_v25 = vpack.c.bf16 %v5352_v12, %v5309_v57  ;;  %v4637_v29 = vpop.eup %4636  ;;  %v7152_v17 = vld [vmem:[#allocation48_spill] sm:$0xff] }
 0x161   :  { %v1195_v62 = vsel %vm1131_vm12, %v4627_v18, %v1163_v11  ;;  %v1203_v19 = vsel %vm1139_vm13, %v4629_v0, %v1171_v35  ;;  %v1173_v63 = vmul.f32 %v4633_v45, %v5463_v7  ;;  %v711_v44 = vadd.f32 1.0, %v710_v33  ;;  %v7153_v57 = vld [vmem:[#allocation32_spill] sm:$0xff]  ;;  %v4639_v12 = vpop.eup %4638 }
 0x162   :  { %7149 = vst [vmem:[#allocation71_spill] sm:$0xff] %v5800_v10  ;;  %4286 = vmatpush1.bf16.msra.mxu1 %v7150_v25  ;;  %vm1137_vm11 = vcmp.ge.f32.partialorder %v5481_v3, 0.0  ;;  %vm1145_vm1 = vcmp.ge.f32.partialorder %v7151_v36, 0.0  ;;  %v4279_v50 = vpack.c.bf16 %v1203_v19, %v1195_v62  ;;  %v1151_v13 = vmul.f32 %v4635_v56, %v7152_v17  ;;  %v4641_v35 = vpop.eup %4640 }
 0x163   :  { %v783_v21 = vadd.f32 1.0, %v782_v30  ;;  %4654 = vlog2.f32 %v7153_v57  ;;  %v1197_v18 = vsel %vm1133_vm14, %v4631_v28, %v1165_v1  ;;  %v1205_v0 = vsel %vm1141_vm15, %v4633_v45, %v1173_v63  ;;  %v4643_v57 = vpop.eup %4642  ;;  %v5840_v45 = vld [vmem:[%s6920_s7] sm:$0x7] }
 0x164   :  { %v1159_v33 = vmul.f32 %v4637_v29, %v5546_v55  ;;  %v713_v11 = vand.u32 2147483647, %v7107_v54  ;;  %4280 = vmatprep.subr.bf16.mxu0 %v4279_v50  ;;  %v4287_v25 = vpack.c.bf16 %v1205_v0, %v1197_v18  ;;  %v1153_v62 = vmul.f32 %v4639_v12, %v5527_v27  ;;  %v7157_v18 = vld [vmem:[#allocation63_spill] sm:$0xff] }
 0x165   :  { %v785_v30 = vand.u32 2147483647, %v7109_v39  ;;  %v728_v19 = vmul.f32 -0.5, %v7114_v42  ;;  %v7156_v28 = vpack.c.bf16 %v7154_v53, %v7155_v38  ;;  %v1183_v1 = vsel %vm1119_vm2, %v4635_v56, %v1151_v13  ;;  %v4645_v0 = vpop.eup %4644 }
 0x166   :  { %v1191_v63 = vsel %vm1127_vm3, %v4637_v29, %v1159_v33  ;;  %v1161_v50 = vmul.f32 %v4641_v35, %v5554_v6  ;;  %4656 = vlog2.f32 %v7157_v18  ;;  %4288 = vmatprep.subr.bf16.mxu1 %v4287_v25  ;;  %v1167_v38 = vmul.f32 %v4643_v57, %v5641_v8  ;;  %v4647_v48 = vpop.eup %4646  ;;  %v7161_v33 = vld [vmem:[#allocation25_spill] sm:$0xff] }
 0x167   :  { %4282 = vmatpush1.bf16.msra.mxu0 %v7156_v28  ;;  %v4291_v10 = vpack.c.bf16 %v1191_v63, %v1183_v1  ;;  %v712_v53 = vmul.f32 %v7107_v54, %v711_v44  ;;  %v784_v28 = vmul.f32 %v7109_v39, %v783_v21  ;;  %v7160_v56 = vpack.c.bf16 %v7158_v60, %v7159_v61  ;;  %v7162_v54 = vld [vmem:[#allocation64_spill] sm:$0xff] }
 0x168   :  { %v1185_v29 = vsel %vm1121_vm5, %v4639_v12, %v1153_v62  ;;  %v1193_v13 = vsel %vm1129_vm6, %v4641_v35, %v1161_v50  ;;  %v1175_v25 = vmul.f32 %v4645_v0, %v7161_v33  ;;  %v800_v1 = vmul.f32 -0.5, %v5255_v51  ;;  %v4649_v63 = vpop.eup %4648  ;;  %v7165_v12 = vld [vmem:[#allocation61_spill] sm:$0xff]  ;;  %v7166_v35 = vld [vmem:[#allocation56_spill] sm:$0xff] }
 0x169   :  { %4290 = vmatpush1.bf16.msra.mxu1 %v7160_v56  ;;  %4292 = vmatprep.subr.bf16.mxu0 %v4291_v10  ;;  %v4299_v39 = vpack.c.bf16 %v1193_v13, %v1185_v29  ;;  %v1199_v61 = vsel %vm1135_vm7, %v4643_v57, %v1167_v38  ;;  %v1169_v60 = vmul.f32 %v4647_v48, %v7162_v54  ;;  %vm5865_vm12 = vcmp.lt.f32.partialorder %v713_v11, 0.0004427343  ;;  %v4651_v21 = vpop.eup %4650  ;;  %v7169_v57 = vld [vmem:[#allocation35_spill] sm:$0xff]  ;;  %v7170_v38 = vld [vmem:[#allocation37_spill] sm:$0xff] }
 0x16a   :  { %4177 = vmatmul.mubr.msk.f32.vlgmr.msra.gmra.mrb[16].mxu0 %vm1211_vm10, %v5840_v45  ;;  %v7167_v62 = vpack.c.bf16 %v7165_v12, %v7166_v35  ;;  %v1207_v50 = vsel %vm1143_vm9, %v4645_v0, %v1175_v25  ;;  %v1177_v10 = vmul.f32 %v4649_v63, %v5707_v32  ;;  %v729_v18 = vadd.f32 1.0, %v728_v19  ;;  %v4653_v11 = vpop.eup %4652  ;;  %v7172_v0 = vld [vmem:[#allocation59_spill] sm:$0xff] }
 0x16b   :  { %v7168_v56 = vmov 0.0   ;;  %v4309_v29 = vpack.c.bf16 %v7170_v38, %v7169_v57  ;;  %4300 = vmatprep.subr.bf16.mxu1 %v4299_v39  ;;  %v4295_v13 = vpack.c.bf16 %v1207_v50, %v1199_v61  ;;  %v709_v34 = vmul.f32 0.6931472, %v4651_v21  ;;  %v7175_v39 = vld [vmem:[#allocation39_spill] sm:$0xff] }
 0x16c   :  { %4294 = vmatpush1.bf16.msra.mxu0 %v7167_v62  ;;  %1421 = vmatprep.mubr.f32.mxu0 %v7168_v56  ;;  %v731_v12 = vand.u32 2147483647, %v7114_v42  ;;  %v801_v35 = vadd.f32 1.0, %v800_v1  ;;  %v7171_v62 = vld [vmem:[#allocation62_spill] sm:$0xff]  ;;  %v1201_v19 = vsel %vm1137_vm11, %v4647_v48, %v1169_v60  ;;  %v1209_v57 = vsel %vm1145_vm1, %v4649_v63, %v1177_v10 }
 0x16d   :  { %4178 = vmatmul.mubr.msk.f32.vlgmr.msra.gmra.mrb[16].mxu1 %vm1211_vm10, %v5840_v45  ;;  %v7173_v25 = vpack.c.bf16 %v7171_v62, %v7172_v0  ;;  %v781_v38 = vmul.f32 0.6931472, %v4653_v11  ;;  %v4317_v61 = vpack.c.bf16 %v7175_v39, %v7174_v46  ;;  %v4655_v21 = vpop.eup %4654  ;;  %4296 = vmatprep.subr.bf16.mxu0 %v4295_v13  ;;  %v4303_v50 = vpack.c.bf16 %v1209_v57, %v1201_v19  ;;  %v7176_v62 = vld [vmem:[#allocation66_spill] sm:$0xff] }
 0x16e   :  { %1492 = vmatprep.mubr.f32.mxu1 %v7168_v56  ;;  %v715_v1 = vsel %vm5865_vm12, %v712_v53, %v709_v34  ;;  %vm786_vm13 = vcmp.lt.f32.partialorder %v785_v30, 0.0004427343  ;;  %4658 = vlog2.f32 %v7176_v62  ;;  %v7177_v48 = vpack.c.bf16 %v5779_v22, %v5678_v58  ;;  %v7180_v53 = vld [vmem:[#allocation67_spill] sm:$0xff] }
 0x16f   :  { %4302 = vmatpush1.bf16.msra.mxu1 %v7173_v25  ;;  %v787_v63 = vsel %vm786_vm13, %v784_v28, %v781_v38  ;;  %v727_v60 = vmul.f32 0.6931472, %v4655_v21  ;;  %v730_v10 = vmul.f32 %v7114_v42, %v729_v18  ;;  %v803_v11 = vand.u32 2147483647, %v5255_v51  ;;  %v7184_v28 = vld [vmem:[#allocation27_spill] sm:$0xff] }
 0x170   :  { %4298 = vmatpush1.bf16.msra.mxu0 %v7177_v48  ;;  %4304 = vmatprep.subr.bf16.mxu1 %v4303_v50  ;;  %v7178_v13 = vmax.f32 %v7126_v52, 0.0  ;;  %v7179_v44 = vmax.f32 %v7127_v23, 0.0  ;;  %v854_v30 = vmul.f32 -0.5, %v5354_v20  ;;  %4660 = vlog2.f32 %v7180_v53  ;;  %v4657_v25 = vpop.eup %4656  ;;  %v7188_v38 = vld [vmem:[#allocation51_spill] sm:$0xff]  ;;  %v7191_v50 = vld [vmem:[#allocation41_spill] sm:$0xff] }
 0x171   :  { %v7181_v58 = vpack.c.bf16 %v5804_v59, %v5738_v26  ;;  %vm5908_vm1 = vcmp.lt.f32.partialorder %v731_v12, 0.0004427343  ;;  %v802_v22 = vmul.f32 %v5255_v51, %v801_v35  ;;  %v857_v52 = vand.u32 2147483647, %v5354_v20  ;;  %v7185_v59 = vld [vmem:[#allocation34_spill] sm:$0xff]  ;;  %v7189_v51 = vld [vmem:[#allocation53_spill] sm:$0xff] }
 0x172   :  { %v987_v0 = vadd.f32 %v715_v1, %v7178_v13  ;;  %v995_v34 = vadd.f32 %v787_v63, %v7179_v44  ;;  %4662 = vlog2.f32 %v7184_v28  ;;  %v733_v18 = vsel %vm5908_vm1, %v730_v10, %v727_v60  ;;  %v7194_v48 = vld [vmem:[#allocation57_spill] sm:$0xff]  ;;  %v7195_v63 = vld [vmem:[#allocation31_spill] sm:$0xff]  ;;  %v7214_v28 = vld [vmem:[#allocation70_spill] sm:$0xff] }
 0x173   :  { %4306 = vmatpush1.bf16.msra.mxu1 %v7181_v58  ;;  %v799_v19 = vmul.f32 0.6931472, %v4657_v25  ;;  %4179 = vmatmul.mubr.msk.f32.vlgmr.msra.gmra.mrb[18].mxu0 %vm1211_vm10, %v5840_v45  ;;  %v926_v26 = vmul.f32 -0.5, %v5448_v37  ;;  %v7186_v12 = vmax.f32 %v7185_v59, 0.0  ;;  %v7190_v35 = vsel %vm5501_vm4, %v7188_v38, %v7189_v51 }
 0x174   :  { %v4307_v23 = vpack.c.bf16 %v995_v34, %v987_v0  ;;  %v7192_v1 = vmax.f32 %v7191_v50, 0.0  ;;  %v7196_v60 = vsel %vm5559_vm8, %v7194_v48, %v7195_v63  ;;  %vm804_vm14 = vcmp.lt.f32.partialorder %v803_v11, 0.0004427343  ;;  %1593 = vmatprep.mubr.f32.mxu0 %v7168_v56  ;;  %v7197_v34 = vld [vmem:[#allocation68_spill] sm:$0xff]  ;;  %v7209_v48 = vld [vmem:[#allocation26_spill] sm:$0xff] }
 0x175   :  { %v5927_v21 = vadd.f32 %v7190_v35, %v7186_v12  ;;  %v872_v13 = vmul.f32 -0.5, %v5361_v2  ;;  %v805_v0 = vsel %vm804_vm14, %v802_v22, %v799_v19  ;;  %v855_v44 = vadd.f32 1.0, %v854_v30  ;;  %v7203_v19 = vld [vmem:[#allocation45_spill] sm:$0xff] }
 0x176   :  { %v5936_v10 = vadd.f32 %v7196_v60, %v7192_v1  ;;  %4308 = vmatprep.subr.bf16.mxu0 %v4307_v23  ;;  %4180 = vmatmul.mubr.msk.f32.vlgmr.msra.gmra.mrb[18].mxu1 %vm1211_vm10, %v5840_v45  ;;  %4664 = vlog2.f32 %v7197_v34  ;;  %v944_v53 = vmul.f32 -0.5, %v5463_v7  ;;  %v7198_v25 = vmax.f32 %v7132_v43, 0.0  ;;  %v7202_v23 = vld [vmem:[#allocation40_spill] sm:$0xff]  ;;  %v7204_v43 = vld [vmem:[#allocation43_spill] sm:$0xff] }
 0x177   :  { %v7199_v42 = vmax.f32 %v7135_v24, 0.0  ;;  %4310 = vmatpush1.bf16.msra.mxu0 %v4309_v29  ;;  %vm5948_vm4 = vcmp.lt.f32.partialorder %v857_v52, 0.0004427343  ;;  %v929_v22 = vand.u32 2147483647, %v5448_v37  ;;  %1676 = vmatprep.mubr.f32.mxu1 %v7168_v56  ;;  %v927_v45 = vadd.f32 1.0, %v926_v26 }
 0x178   :  { %v989_v58 = vadd.f32 %v733_v18, %v7198_v25  ;;  %v875_v30 = vand.u32 2147483647, %v5361_v2  ;;  %v4313_v59 = vpack.c.bf16 %v7203_v19, %v7202_v23  ;;  %v7205_v18 = vld [vmem:[#allocation49_spill] sm:$0xff]  ;;  %v873_v57 = vadd.f32 1.0, %v872_v13  ;;  %v4659_v38 = vpop.eup %4658  ;;  %v7233_v19 = vld [vmem:[#allocation71_spill] sm:$0xff] }
 0x179   :  { %v997_v11 = vadd.f32 %v805_v0, %v7199_v42  ;;  %v4321_v12 = vpack.c.bf16 %v7205_v18, %v7204_v43  ;;  %v947_v29 = vand.u32 2147483647, %v5463_v7  ;;  %v7206_v52 = vld [vmem:[#allocation69_spill] sm:$0xff]  ;;  %v856_v51 = vmul.f32 %v5354_v20, %v855_v44  ;;  %v7231_v43 = vld [vmem:[#allocation30_spill] sm:$0xff] }
 0x17a   :  { %4666 = vlog2.f32 %v7206_v52  ;;  %v945_v35 = vadd.f32 1.0, %v944_v53  ;;  %v746_v26 = vmul.f32 -0.5, %v7152_v17  ;;  %v853_v50 = vmul.f32 0.6931472, %v4659_v38  ;;  %v4661_v63 = vpop.eup %4660 }
 0x17b   :  { %v4315_v24 = vpack.c.bf16 %v997_v11, %v989_v58  ;;  %4668 = vlog2.f32 %v5705_v14  ;;  %vm5964_vm8 = vcmp.lt.f32.partialorder %v929_v22, 0.0004427343  ;;  %v818_v62 = vmul.f32 -0.5, %v5546_v55 }
 0x17c   :  { %4670 = vlog2.f32 %v7209_v48  ;;  %v928_v20 = vmul.f32 %v5448_v37, %v927_v45  ;;  %vm5974_vm15 = vcmp.lt.f32.partialorder %v875_v30, 0.0004427343  ;;  %v749_v14 = vand.u32 2147483647, %v7152_v17  ;;  %v4663_v0 = vpop.eup %4662 }
 0x17d   :  { %4316 = vmatprep.subr.bf16.mxu1 %v4315_v24  ;;  %v764_v13 = vmul.f32 -0.5, %v5527_v27  ;;  %v859_v44 = vsel %vm5948_vm4, %v856_v51, %v853_v50  ;;  %v925_v34 = vmul.f32 0.6931472, %v4661_v63  ;;  %v874_v53 = vmul.f32 %v5361_v2, %v873_v57  ;;  %v7220_v51 = vld [vmem:[#allocation33_spill] sm:$0xff] }
 0x17e   :  { %4318 = vmatpush1.bf16.msra.mxu1 %v4317_v61  ;;  %vm5983_vm2 = vcmp.lt.f32.partialorder %v947_v29, 0.0004427343  ;;  %v871_v37 = vmul.f32 0.6931472, %v4663_v0  ;;  %v946_v39 = vmul.f32 %v5463_v7, %v945_v35  ;;  %v747_v61 = vadd.f32 1.0, %v746_v26 }
 0x17f   :  { %v821_v25 = vand.u32 2147483647, %v5546_v55  ;;  %v931_v58 = vsel %vm5964_vm8, %v928_v20, %v925_v34  ;;  %v819_v42 = vadd.f32 1.0, %v818_v62  ;;  %v765_v11 = vadd.f32 1.0, %v764_v13  ;;  %v6026_v13 = vld [vmem:[%s6918_s5] sm:$0xff] }
 0x180   :  { %4672 = vlog2.f32 %v7214_v28  ;;  %v4665_v22 = vpop.eup %4664  ;;  %v7215_v2 = vmax.f32 %v7142_v9, 0.0  ;;  %v7216_v30 = vmax.f32 %v5283_v4, 0.0  ;;  %vm5996_vm3 = vcmp.lt.f32.partialorder %v749_v14, 0.0004427343  ;;  %v7219_v4 = vld [vmem:[#allocation54_spill] sm:$0xff] }
 0x181   :  { %v767_v7 = vand.u32 2147483647, %v5527_v27  ;;  %v877_v24 = vsel %vm5974_vm15, %v874_v53, %v871_v37  ;;  %v943_v57 = vmul.f32 0.6931472, %v4665_v22  ;;  %v836_v29 = vmul.f32 -0.5, %v5554_v6  ;;  %v7225_v53 = vld [vmem:[#allocation38_spill] sm:$0xff] }
 0x182   :  { %v1003_v45 = vadd.f32 %v859_v44, %v7215_v2  ;;  %v1011_v23 = vadd.f32 %v931_v58, %v7216_v30  ;;  %v4325_v52 = vpack.c.bf16 %v5936_v10, %v5927_v21  ;;  %v748_v38 = vmul.f32 %v7152_v17, %v747_v61  ;;  %v7229_v22 = vld [vmem:[#allocation29_spill] sm:$0xff] }
 0x183   :  { %v4333_v35 = vpack.c.bf16 %v7220_v51, %v7219_v4  ;;  %4674 = vlog2.f32 %v5734_v31  ;;  %v949_v50 = vsel %vm5983_vm2, %v946_v39, %v943_v57  ;;  %v820_v1 = vmul.f32 %v5546_v55, %v819_v42 }
 0x184   :  { %v4311_v9 = vpack.c.bf16 %v1011_v23, %v1003_v45  ;;  %v4667_v26 = vpop.eup %4666  ;;  %vm6013_vm5 = vcmp.lt.f32.partialorder %v821_v25, 0.0004427343  ;;  %v766_v21 = vmul.f32 %v5527_v27, %v765_v11  ;;  %v7223_v17 = vmax.f32 %v7144_v15, 0.0 }
 0x185   :  { %v4669_v10 = vpop.eup %4668  ;;  %v7224_v63 = vmax.f32 %v5314_v40, 0.0  ;;  %v745_v20 = vmul.f32 0.6931472, %v4667_v26  ;;  %4676 = vlog2.f32 %v5742_v49  ;;  %v837_v14 = vadd.f32 1.0, %v836_v29 }
 0x186   :  { %4312 = vmatprep.subr.bf16.mxu0 %v4311_v9  ;;  %v1005_v48 = vadd.f32 %v877_v24, %v7223_v17  ;;  %v4671_v60 = vpop.eup %4670  ;;  %v817_v55 = vmul.f32 0.6931472, %v4669_v10  ;;  %v890_v27 = vmul.f32 -0.5, %v5641_v8  ;;  %4678 = vlog2.f32 %v5745_v16  ;;  %v7235_v17 = vld [vmem:[#allocation55_spill] sm:$0xff] }
 0x187   :  { %v1013_v31 = vadd.f32 %v949_v50, %v7224_v63  ;;  %4314 = vmatpush1.bf16.msra.mxu0 %v4313_v59  ;;  %v751_v40 = vsel %vm5996_vm3, %v748_v38, %v745_v20  ;;  %v763_v0 = vmul.f32 0.6931472, %v4671_v60  ;;  %v962_v49 = vmul.f32 -0.5, %v7161_v33 }
 0x188   :  { %v681_v59 = vmax.f32 %v5408_v41, 0.0  ;;  %v823_v44 = vsel %vm6013_vm5, %v820_v1, %v817_v55  ;;  %vm768_vm6 = vcmp.lt.f32.partialorder %v767_v7, 0.0004427343  ;;  %v839_v34 = vand.u32 2147483647, %v5554_v6 }
 0x189   :  { %v4319_v15 = vpack.c.bf16 %v1013_v31, %v1005_v48  ;;  %v7226_v46 = vmax.f32 %v7225_v53, 0.0  ;;  %v7227_v16 = vmax.f32 %v5403_v5, 0.0  ;;  %v769_v61 = vsel %vm768_vm6, %v766_v21, %v763_v0  ;;  %v7234_v21 = vld [vmem:[#allocation47_spill] sm:$0xff] }
 0x18a   :  { %4181 = vmatmul.mubr.msk.f32.vlgmr.msra.gmra.mrb[20].mxu0 %vm1211_vm10, %v6026_v13  ;;  %v908_v25 = vmul.f32 -0.5, %v7162_v54  ;;  %v4673_v41 = vpop.eup %4672  ;;  %v838_v58 = vmul.f32 %v5554_v6, %v837_v14  ;;  %v7228_v42 = vmax.f32 %v5392_v47, 0.0  ;;  %v891_v28 = vadd.f32 1.0, %v890_v27  ;;  %v6057_v6 = vld [vmem:[%s6918_s5 + $0x8] sm:$0xff]  ;;  %v7230_v47 = vld [vmem:[#allocation65_spill] sm:$0xff] }
 0x18b   :  { %4320 = vmatprep.subr.bf16.mxu1 %v4319_v15  ;;  %v991_v37 = vadd.f32 %v751_v40, %v7226_v46  ;;  %v999_v39 = vadd.f32 %v823_v44, %v7227_v16  ;;  %4680 = vlog2.f32 %v7229_v22  ;;  %1599 = vmatprep.mubr.f32.mxu0 %v7168_v56  ;;  %v835_v2 = vmul.f32 0.6931472, %v4673_v41  ;;  %v7238_v16 = vld [vmem:[#allocation19_spill] sm:$0xff]  ;;  %v7242_v41 = vld [vmem:[#allocation22_spill] sm:$0xff]  ;;  %v7249_v22 = vld [vmem:[#allocation24_spill] sm:$0xff] }
 0x18c   :  { %4322 = vmatpush1.bf16.msra.mxu1 %v4321_v12  ;;  %v993_v11 = vadd.f32 %v769_v61, %v7228_v42  ;;  %v893_v45 = vand.u32 2147483647, %v5641_v8  ;;  %v963_v30 = vadd.f32 1.0, %v962_v49  ;;  %vm840_vm7 = vcmp.lt.f32.partialorder %v839_v34, 0.0004427343  ;;  %v7232_v12 = vld [vmem:[#allocation28_spill] sm:$0xff] }
 0x18d   :  { %v4323_v5 = vpack.c.bf16 %v999_v39, %v991_v37  ;;  %v965_v23 = vand.u32 2147483647, %v7161_v33  ;;  %v4329_v18 = vpack.c.bf16 %v7231_v43, %v7230_v47  ;;  %v4337_v7 = vpack.c.bf16 %v7233_v19, %v7232_v12  ;;  %v4675_v24 = vpop.eup %4674  ;;  %v7239_v39 = vld [vmem:[#allocation21_spill] sm:$0xff]  ;;  %v2034_v61 = vld [vmem:[%s6922_s9 + $0x8] sm:$0xff]  ;;  %v2036_v42 = vld [vmem:[%s6922_s9 + $0x18] sm:$0xff] }
 0x18e   :  { %v841_v57 = vsel %vm840_vm7, %v838_v58, %v835_v2  ;;  %v909_v29 = vadd.f32 1.0, %v908_v25  ;;  %v980_v9 = vmul.f32 -0.5, %v5707_v32  ;;  %v889_v26 = vmul.f32 0.6931472, %v4675_v24  ;;  %4182 = vmatmul.mubr.msk.f32.gmra.mrb[22].mxu0 %vm1211_vm10, %v6057_v6  ;;  %v7241_v25 = vld [vmem:[#allocation20_spill] sm:$0xff]  ;;  %v2035_v58 = vld [vmem:[%s6922_s9 + $0x10] sm:$0xff] }
 0x18f   :  { %4324 = vmatprep.subr.bf16.mxu0 %v4323_v5  ;;  %4184 = vmatmul.mubr.msk.f32.vlgmr.msra.gmra.mrb[20].mxu1 %vm1211_vm10, %v6026_v13  ;;  %v1001_v38 = vadd.f32 %v841_v57, %v681_v59  ;;  %v892_v50 = vmul.f32 %v5641_v8, %v891_v28  ;;  %v911_v1 = vand.u32 2147483647, %v7162_v54  ;;  %v4677_v62 = vpop.eup %4676  ;;  %v687_v10 = vmax.f32 %v7234_v21, 0.0  ;;  %v1501_v8 = vld [vmem:[%s6918_s5 + $0x10] sm:$0x1]  ;;  %v7248_v28 = vld [vmem:[#allocation23_spill] sm:$0xff] }
 0x190   :  { %4326 = vmatpush1.bf16.msra.mxu0 %v4325_v52  ;;  %1682 = vmatprep.mubr.f32.mxu1 %v7168_v56  ;;  %v695_v48 = vmax.f32 %v7235_v17, 0.0  ;;  %vm894_vm9 = vcmp.lt.f32.partialorder %v893_v45, 0.0004427343  ;;  %v964_v63 = vmul.f32 %v7161_v33, %v963_v30  ;;  %v4679_v31 = vpop.eup %4678  ;;  %v961_v60 = vmul.f32 0.6931472, %v4677_v62  ;;  %v2030_v5 = vld [vmem:[%s6921_s8 + $0x8] sm:$0xff] }
 0x191   :  { %v4331_v52 = vpack.c.bf16 %v1001_v38, %v993_v11  ;;  %v895_v20 = vsel %vm894_vm9, %v892_v50, %v889_v26  ;;  %vm966_vm11 = vcmp.lt.f32.partialorder %v965_v23, 0.0004427343  ;;  %1605 = vmatprep.mubr.f32.mxu0 %v7168_v56  ;;  %v907_v14 = vmul.f32 0.6931472, %v4679_v31  ;;  %v2029_v11 = vld [vmem:[%s6921_s8] sm:$0xff]  ;;  %v2031_v2 = vld [vmem:[%s6921_s8 + $0x10] sm:$0xff] }
 0x192   :  { %v1007_v55 = vadd.f32 %v895_v20, %v687_v10  ;;  %v910_v27 = vmul.f32 %v7162_v54, %v909_v29  ;;  %v981_v15 = vadd.f32 1.0, %v980_v9  ;;  %v689_v33 = vmax.f32 %v5481_v3, 0.0  ;;  %4183 = vmatmul.mubr.msk.f32.gmra.mrb[24].mxu0 %vm1211_vm10, %v1501_v8  ;;  %v2032_v45 = vld [vmem:[%s6921_s8 + $0x18] sm:$0xff] }
 0x193   :  { %4185 = vmatmul.mubr.msk.f32.gmra.mrb[22].mxu1 %vm1211_vm10, %v6057_v6  ;;  %4332 = vmatprep.subr.bf16.mxu1 %v4331_v52  ;;  %v967_v40 = vsel %vm966_vm11, %v964_v63, %v961_v60  ;;  %vm912_vm12 = vcmp.lt.f32.partialorder %v911_v1, 0.0004427343  ;;  %v983_v0 = vand.u32 2147483647, %v5707_v32  ;;  %v697_v46 = vmax.f32 %v7151_v36, 0.0  ;;  %v7237_v36 = vld [vmem:[#allocation18_spill] sm:$0xff] }
 0x194   :  { %1688 = vmatprep.mubr.f32.mxu1 %v7168_v56  ;;  %4334 = vmatpush1.bf16.msra.mxu1 %v4333_v35  ;;  %v1015_v49 = vadd.f32 %v967_v40, %v695_v48  ;;  %v913_v59 = vsel %vm912_vm12, %v910_v27, %v907_v14  ;;  %v982_v53 = vmul.f32 %v5707_v32, %v981_v15  ;;  %v4778_v35 = vld [vmem:[%s6914_s1] sm:$0x7]  ;;  %v7236_v32 = vld [vmem:[#allocation17_spill] sm:$0xff]  ;;  %vm7240_vm1 = vcmask 23552  }
 0x195   :  { %v4681_v54 = vpop.eup %4680  ;;  %v1009_v44 = vadd.f32 %v913_v59, %v689_v33  ;;  %1759 = vmatprep.mubr.f32.mxu0 %v7168_v56  ;;  %vm984_vm13 = vcmp.lt.f32.partialorder %v983_v0, 0.0004427343  ;;  %vm7243_vm14 = vmmov %vm7240_vm1 }
 0x196   :  { %v4327_v3 = vpack.c.bf16 %v1015_v49, %v1007_v55  ;;  %v979_v34 = vmul.f32 0.6931472, %v4681_v54  ;;  %vm7244_vm4 = vmmov %vm7240_vm1 }
 0x197   :  { %4186 = vmatmul.mubr.msk.f32.gmra.mrb[24].mxu1 %vm1211_vm10, %v1501_v8  ;;  %vm7245_vm8 = vmmov %vm7240_vm1 }
 0x198   :  { %1842 = vmatprep.mubr.f32.mxu1 %v7168_v56  ;;  %4328 = vmatprep.subr.bf16.mxu0 %v4327_v3  ;;  %v985_v4 = vsel %vm984_vm13, %v982_v53, %v979_v34  ;;  %vm7246_vm15 = vmmov %vm7240_vm1 }
 0x199   :  { %v1017_v51 = vadd.f32 %v985_v4, %v697_v46  ;;  %4330 = vmatpush1.bf16.msra.mxu0 %v4329_v18  ;;  %vm7247_vm2 = vmmov %vm7240_vm1 }
 0x19a   :  { %4193 = vmatprep.subr.msk.mxu0 %vm157_vm0, %v4778_v35  ;;  %vm7250_vm3 = vmmov %vm7240_vm1 }
 0x19b   :  { %v4335_v37 = vpack.c.bf16 %v1017_v51, %v1009_v44  ;;  %vm7251_vm5 = vmmov %vm7240_vm1 }
 0x19c   :  { %4187 = vmatmul.mubr.msk.f32.vlgmr.msra.gmra.mrb[26].mxu0 %vm1211_vm10, %v6026_v13  ;;  %vm7252_vm6 = vmmov %vm7240_vm1 }
 0x19d   :  { %4336 = vmatprep.subr.bf16.mxu1 %v4335_v37  ;;  %1765 = vmatprep.mubr.f32.mxu0 %v7168_v56  ;;  %vm7253_vm7 = vmmov %vm7240_vm1 }
 0x19e   :  { %4338 = vmatpush1.bf16.msra.mxu1 %v4337_v7  ;;  %4194 = vmatpush1.msk.msra.mxu0 %vm157_vm0, %v4778_v35  ;;  %vm7254_vm9 = vmmov %vm7240_vm1 }
 0x19f   :  { %4199 = vmatprep.subr.msk.mxu1 %vm157_vm0, %v7236_v32  ;;  %4205 = vmatprep.subr.msk.mxu0 %vm157_vm0, %v7237_v36  ;;  %vm7255_vm11 = vmmov %vm7240_vm1 }
 0x1a0   :  { %4188 = vmatmul.mubr.msk.f32.gmra.mrb[28].mxu0 %vm1211_vm10, %v6057_v6  ;;  %vm7256_vm12 = vmmov %vm7240_vm1 }
 0x1a1   :  { %4190 = vmatmul.mubr.msk.f32.vlgmr.msra.gmra.mrb[26].mxu1 %vm1211_vm10, %v6026_v13  ;;  %1771 = vmatprep.mubr.f32.mxu0 %v7168_v56  ;;  %v2033_v13 = vld [vmem:[%s6922_s9] sm:$0xff]  ;;  %vm7257_vm13 = vmmov %vm7240_vm1 }
 0x1a2   :  { %1848 = vmatprep.mubr.f32.mxu1 %v7168_v56  ;;  %4200 = vmatpush1.msk.msra.mxu1 %vm157_vm0, %v7238_v16 }
 0x1a3   :  { %4211 = vmatprep.subr.msk.mxu1 %vm157_vm0, %v7239_v39 }
 0x1a4   :  { %4189 = vmatmul.mubr.msk.f32.gmra.mrb[30].mxu0 %vm1211_vm10, %v1501_v8 }
 0x1a5   :  { %4191 = vmatmul.mubr.msk.f32.gmra.mrb[28].mxu1 %vm1211_vm10, %v6057_v6  ;;  %2116 = vmatprep.mubr.f32.mxu0 %v7168_v56 }
 0x1a6   :  { %1854 = vmatprep.mubr.f32.mxu1 %v7168_v56 }
 0x1a8   :  { %4195 = vmatmul.mubr.msk.f32.vlgmr.msra.gmra.mrb[32].mxu0 %vm7240_vm1, %v2033_v13 }
 0x1a9   :  { %4192 = vmatmul.mubr.msk.f32.gmra.mrb[30].mxu1 %vm1211_vm10, %v1501_v8  ;;  %2122 = vmatprep.mubr.f32.mxu0 %v7168_v56 }
 0x1aa   :  { %2217 = vmatprep.mubr.f32.mxu1 %v7168_v56  ;;  %4206 = vmatpush1.msk.msra.mxu0 %vm157_vm0, %v7241_v25 }
 0x1ab   :  { %4217 = vmatprep.subr.msk.mxu0 %vm157_vm0, %v7242_v41 }
 0x1ac   :  { %4196 = vmatmul.mubr.msk.f32.gmra.mrb[34].mxu0 %vm7243_vm14, %v2034_v61  ;;  %vm7258_vm14 = vmmov %vm7240_vm1 }
 0x1ad   :  { %2128 = vmatprep.mubr.f32.mxu0 %v7168_v56  ;;  %4201 = vmatmul.mubr.msk.f32.vlgmr.msra.gmra.mrb[32].mxu1 %vm7246_vm15, %v2029_v11  ;;  %vm7261_vm15 = vmmov %vm7240_vm1 }
 0x1ae   :  { %2223 = vmatprep.mubr.f32.mxu1 %v7168_v56  ;;  %4212 = vmatpush1.msk.msra.mxu1 %vm157_vm0, %v7248_v28 }
 0x1b0   :  { %4197 = vmatmul.mubr.msk.f32.gmra.mrb[36].mxu0 %vm7244_vm4, %v2035_v58  ;;  %vm7259_vm4 = vmmov %vm7240_vm1 }
 0x1b1   :  { %2134 = vmatprep.mubr.f32.mxu0 %v7168_v56  ;;  %4202 = vmatmul.mubr.msk.f32.gmra.mrb[34].mxu1 %vm7250_vm3, %v2030_v5 }
 0x1b2   :  { %2229 = vmatprep.mubr.f32.mxu1 %v7168_v56 }
 0x1b4   :  { %4198 = vmatmul.mubr.msk.f32.gmra.mrb[38].mxu0 %vm7245_vm8, %v2036_v42  ;;  %vm7260_vm8 = vmmov %vm7240_vm1 }
 0x1b5   :  { %2306 = vmatprep.mubr.f32.mxu0 %v7168_v56  ;;  %4203 = vmatmul.mubr.msk.f32.gmra.mrb[36].mxu1 %vm7252_vm6, %v2031_v2 }
 0x1b6   :  { %2235 = vmatprep.mubr.f32.mxu1 %v7168_v56 }
 0x1b8   :  { %4207 = vmatmul.mubr.msk.f32.vlgmr.msra.gmra.mrb[40].mxu0 %vm7247_vm2, %v2029_v11  ;;  %vm7262_vm2 = vmmov %vm7240_vm1 }
 0x1b9   :  { %2312 = vmatprep.mubr.f32.mxu0 %v7168_v56  ;;  %4218 = vmatpush1.msk.msra.mxu0 %vm157_vm0, %v7249_v22 }
 0x1ba   :  { %4204 = vmatmul.mubr.msk.f32.gmra.mrb[38].mxu1 %vm7254_vm9, %v2032_v45 }
 0x1bb   :  { %2395 = vmatprep.mubr.f32.mxu1 %v7168_v56 }
 0x1bc   :  { %4208 = vmatmul.mubr.msk.f32.gmra.mrb[42].mxu0 %vm7251_vm5, %v2030_v5 }
 0x1bd   :  { %2318 = vmatprep.mubr.f32.mxu0 %v7168_v56 }
 0x1be   :  { %4213 = vmatmul.mubr.msk.f32.vlgmr.msra.gmra.mrb[40].mxu1 %vm7256_vm12, %v2029_v11 }
 0x1bf   :  { %2401 = vmatprep.mubr.f32.mxu1 %v7168_v56 }
 0x1c0   :  { %4209 = vmatmul.mubr.msk.f32.gmra.mrb[44].mxu0 %vm7253_vm7, %v2031_v2 }
 0x1c1   :  { %2324 = vmatprep.mubr.f32.mxu0 %v7168_v56 }
 0x1c2   :  { %4214 = vmatmul.mubr.msk.f32.gmra.mrb[42].mxu1 %vm7240_vm1, %v2030_v5 }
 0x1c3   :  { %2407 = vmatprep.mubr.f32.mxu1 %v7168_v56 }
 0x1c4   :  { %4210 = vmatmul.mubr.msk.f32.gmra.mrb[46].mxu0 %vm7255_vm11, %v2032_v45 }
 0x1c5   :  { %2484 = vmatprep.mubr.f32.mxu0 %v7168_v56 }
 0x1c6   :  { %4215 = vmatmul.mubr.msk.f32.gmra.mrb[44].mxu1 %vm7259_vm4, %v2031_v2  ;;  %vm7265_vm4 = vmmov %vm7262_vm2 }
 0x1c7   :  { %2413 = vmatprep.mubr.f32.mxu1 %v7168_v56 }
 0x1c8   :  { %4219 = vmatmul.mubr.msk.f32.vlgmr.msra.gmra.mrb[48].mxu0 %vm7257_vm13, %v2029_v11  ;;  %v6247_v11 = vpop.permute.xlu0 %1507  ;;  %vm7263_vm13 = vmmov %vm7240_vm1 }
 0x1c9   :  { %2490 = vmatprep.mubr.f32.mxu0 %v7168_v56 }
 0x1ca   :  { %4216 = vmatmul.mubr.msk.f32.gmra.mrb[46].mxu1 %vm7261_vm15, %v2032_v45  ;;  %vm7267_vm15 = vmmov %vm7262_vm2 }
 0x1cb   :  { %2613 = vmatprep.mubr.f32.mxu1 %v7168_v56 }
 0x1cc   :  { %4220 = vmatmul.mubr.msk.f32.gmra.mrb[50].mxu0 %vm7258_vm14, %v2030_v5  ;;  %vm7264_vm14 = vmmov %vm7262_vm2 }
 0x1cd   :  { %2496 = vmatprep.mubr.f32.mxu0 %v7168_v56 }
 0x1d0   :  { %4221 = vmatmul.mubr.msk.f32.gmra.mrb[52].mxu0 %vm7260_vm8, %v2031_v2  ;;  %vm7266_vm8 = vmmov %vm7262_vm2 }
 0x1d1   :  { %2502 = vmatprep.mubr.f32.mxu0 %v7168_v56 }
 0x1d4   :  { %4222 = vmatmul.mubr.msk.f32.gmra.mrb[54].mxu0 %vm7262_vm2, %v2032_v45 }
 0x1d5   :  { %2702 = vmatprep.mubr.f32.mxu0 %v7168_v56 }
 0x23d   :  { %v6194_v30 = vpop.f32.mrb[16].mxu0 }
 0x23e   :  { %v1949_v23 = vmul.f32 %v6194_v30, %v6194_v30  ;;  %v6198_v6 = vpop.f32.mrb[17].mxu0 }
 0x23f   :  { %v1950_v43 = vmul.f32 %v6198_v6, %v6198_v6  ;;  %v4052_v18 = vcombine.low %v6194_v30, %v6198_v6 }
 0x240   :  { %v6200_v47 = vpop.f32.mrb[16].mxu1  ;;  %v1957_v12 = vsel %vm157_vm0, %v1949_v23, 0.0 }
 0x241   :  { %v1951_v19 = vmul.f32 %v6200_v47, %v6200_v47  ;;  %v6209_v7 = vpop.f32.mrb[17].mxu1  ;;  %v1958_v24 = vrot.slane %v1957_v12, 4  ;;  %v1964_v57 = vsel %vm157_vm0, %v1950_v43, 0.0  ;;  %4060 = vst [vmem:[#allocation4] sm:$0x77] %v4052_v18 }
 0x242   :  { %v1952_v29 = vmul.f32 %v6209_v7, %v6209_v7  ;;  %v4053_v9 = vcombine.low %v6200_v47, %v6209_v7  ;;  %v1965_v26 = vrot.slane %v1964_v57, 4 }
 0x243   :  { %v1971_v38 = vsel %vm157_vm0, %v1951_v19, 0.0  ;;  %v1959_v50 = vadd.f32 %v1958_v24, %v1957_v12 }
 0x244   :  { %v1972_v1 = vrot.slane %v1971_v38, 4  ;;  %v1978_v62 = vsel %vm157_vm0, %v1952_v29, 0.0  ;;  %4061 = vst [vmem:[#allocation4 + $0x8] sm:$0x77] %v4053_v9  ;;  %v1966_v21 = vadd.f32 %v1965_v26, %v1964_v57  ;;  %v6256_v26 = vpop.permute.xlu0 %3348 }
 0x245   :  { %v1979_v10 = vrot.slane %v1978_v62, 4  ;;  %v1960_v17 = vrot.slane %v1959_v50, 2 }
 0x246   :  { %v1973_v48 = vadd.f32 %v1972_v1, %v1971_v38  ;;  %v6218_v63 = vpop.f32.mrb[18].mxu0  ;;  %v1967_v31 = vrot.slane %v1966_v21, 2 }
 0x247   :  { %v1980_v52 = vadd.f32 %v1979_v10, %v1978_v62  ;;  %v1953_v20 = vmul.f32 %v6218_v63, %v6218_v63  ;;  %v6222_v60 = vpop.f32.mrb[19].mxu0  ;;  %v1961_v8 = vadd.f32 %v1960_v17, %v1959_v50 }
 0x248   :  { %v1974_v55 = vrot.slane %v1973_v48, 2  ;;  %v1954_v27 = vmul.f32 %v6222_v60, %v6222_v60  ;;  %v4054_v15 = vcombine.low %v6218_v63, %v6222_v60  ;;  %v1968_v33 = vadd.f32 %v1967_v31, %v1966_v21 }
 0x249   :  { %v6224_v14 = vpop.f32.mrb[18].mxu1  ;;  %v1981_v40 = vrot.slane %v1980_v52, 2  ;;  %v1985_v0 = vsel %vm157_vm0, %v1953_v20, 0.0  ;;  %v1962_v54 = vrot.slane %v1961_v8, 1 }
 0x24a   :  { %v1955_v49 = vmul.f32 %v6224_v14, %v6224_v14  ;;  %v6233_v59 = vpop.f32.mrb[19].mxu1  ;;  %v1975_v44 = vadd.f32 %v1974_v55, %v1973_v48  ;;  %v1986_v3 = vrot.slane %v1985_v0, 4  ;;  %v1992_v34 = vsel %vm157_vm0, %v1954_v27, 0.0  ;;  %4062 = vst [vmem:[#allocation4 + $0x10] sm:$0x77] %v4054_v15 }
 0x24b   :  { %v1969_v53 = vrot.slane %v1968_v33, 1  ;;  %v1982_v46 = vadd.f32 %v1981_v40, %v1980_v52  ;;  %v1993_v51 = vrot.slane %v1992_v34, 4  ;;  %v1963_v35 = vadd.f32 %v1962_v54, %v1961_v8  ;;  %v6279_v40 = vld [vmem:[%s6923_s10] sm:$0xff] }
 0x24c   :  { %v1999_v4 = vsel %vm157_vm0, %v1955_v49, 0.0  ;;  %v1976_v37 = vrot.slane %v1975_v44, 1  ;;  %v1987_v32 = vadd.f32 %v1986_v3, %v1985_v0  ;;  %v1956_v25 = vmul.f32 %v6233_v59, %v6233_v59 }
 0x24d   :  { %v2000_v36 = vrot.slane %v1999_v4, 4  ;;  %v6237_v16 = vadd.f32 %v1969_v53, %v1968_v33  ;;  %v1983_v39 = vrot.slane %v1982_v46, 1  ;;  %4682 = vrsqrt.f32 %v1963_v35 }
 0x24e   :  { %v6239_v13 = vadd.f32 %v1976_v37, %v1975_v44  ;;  %v1994_v61 = vadd.f32 %v1993_v51, %v1992_v34  ;;  %v1988_v58 = vrot.slane %v1987_v32, 2  ;;  %v2006_v2 = vsel %vm157_vm0, %v1956_v25, 0.0  ;;  %v6292_v51 = vpop.permute.xlu0 %3358  ;;  %v6312_v25 = vld [vmem:[%s6923_s10 + $0x8] sm:$0xff] }
 0x24f   :  { %4684 = vrsqrt.f32 %v6237_v16  ;;  %v6244_v41 = vadd.f32 %v1983_v39, %v1982_v46  ;;  %v2001_v42 = vadd.f32 %v2000_v36, %v1999_v4  ;;  %v2007_v45 = vrot.slane %v2006_v2, 4 }
 0x250   :  { %4686 = vrsqrt.f32 %v6239_v13  ;;  %v1989_v28 = vadd.f32 %v1988_v58, %v1987_v32  ;;  %v1995_v5 = vrot.slane %v1994_v61, 2  ;;  %v4055_v23 = vcombine.low %v6224_v14, %v6233_v59 }
 0x251   :  { %4688 = vrsqrt.f32 %v6244_v41  ;;  %v2002_v22 = vrot.slane %v2001_v42, 2  ;;  %vm3774_vm3 = vcmp.eq.f32.partialorder %v1963_v35, inf  ;;  %vm3776_vm5 = vcmp.eq.f32.partialorder %v1963_v35, 0.0 }
 0x252   :  { %v1990_v43 = vrot.slane %v1989_v28, 1  ;;  %v1996_v12 = vadd.f32 %v1995_v5, %v1994_v61  ;;  %v3777_v19 = vand.u32 2147483648, %v1963_v35  ;;  %v2008_v24 = vadd.f32 %v2007_v45, %v2006_v2  ;;  %4063 = vst [vmem:[#allocation4 + $0x18] sm:$0x77] %v4055_v23  ;;  %v6321_v23 = vpop.permute.xlu1 %1512 }
 0x253   :  { %v2003_v18 = vadd.f32 %v2002_v22, %v2001_v42  ;;  %vm3781_vm6 = vcmp.eq.f32.partialorder %v6237_v16, inf  ;;  %vm3788_vm7 = vcmp.eq.f32.partialorder %v6239_v13, inf  ;;  %vm3783_vm9 = vcmp.eq.f32.partialorder %v6237_v16, 0.0 }
 0x254   :  { %v6254_v57 = vadd.f32 %v1990_v43, %v1989_v28  ;;  %v1997_v9 = vrot.slane %v1996_v12, 1  ;;  %v3784_v50 = vand.u32 2147483648, %v6237_v16  ;;  %v2009_v1 = vrot.slane %v2008_v24, 2 }
 0x255   :  { %v2004_v29 = vrot.slane %v2003_v18, 1  ;;  %vm3790_vm11 = vcmp.eq.f32.partialorder %v6239_v13, 0.0  ;;  %v3791_v10 = vand.u32 2147483648, %v6239_v13  ;;  %vm3795_vm12 = vcmp.eq.f32.partialorder %v6244_v41, inf }
 0x256   :  { %v3798_v52 = vand.u32 2147483648, %v6244_v41  ;;  %4690 = vrsqrt.f32 %v6254_v57  ;;  %v6272_v15 = vadd.f32 %v1997_v9, %v1996_v12  ;;  %v2010_v3 = vadd.f32 %v2009_v1, %v2008_v24  ;;  %v6329_v12 = vpop.permute.xlu0 %1517 }
 0x257   :  { %v4683_v38 = vpop.eup %4682  ;;  %v6270_v27 = vadd.f32 %v2004_v29, %v2003_v18  ;;  %vm3797_vm1 = vcmp.eq.f32.partialorder %v6244_v41, 0.0  ;;  %v4830_v2 = vmov 1966171168   ;;  %v6327_v18 = vld [vmem:[%s6923_s10 + $0x10] sm:$0xff] }
 0x258   :  { %v3773_v21 = vmul.f32 %v4683_v38, %v1963_v35  ;;  %v2021_v17 = vmul.f32 %v4683_v38, %v6194_v30  ;;  %v2011_v22 = vrot.slane %v2010_v3, 1  ;;  %v4077_v45 = vunpack.c.l.s4 %v4830_v2 }
 0x259   :  { %v4685_v62 = vpop.eup %4684  ;;  %4692 = vrsqrt.f32 %v6270_v27 }
 0x25a   :  { %v2022_v48 = vmul.f32 %v4685_v62, %v6198_v6  ;;  %v3780_v31 = vmul.f32 %v4685_v62, %v6237_v16  ;;  %v4687_v8 = vpop.eup %4686  ;;  %v3775_v55 = vsel %vm3774_vm3, %v1963_v35, %v3773_v21  ;;  %vm7270_vm3 = vmmov %vm7262_vm2 }
 0x25b   :  { %v4689_v0 = vpop.eup %4688  ;;  %v3778_v49 = vsel %vm3776_vm5, %v3777_v19, %v3775_v55  ;;  %v3787_v54 = vmul.f32 %v4687_v8, %v6239_v13  ;;  %v2023_v35 = vmul.f32 %v4687_v8, %v6200_v47  ;;  %v6331_v19 = vadd.f32 %v2011_v22, %v2010_v3  ;;  %v6372_v8 = vld [vmem:[%s6915_s2 + $0x1] ss:$2 sm:$0xff] }
 0x25c   :  { %v3782_v44 = vsel %vm3781_vm6, %v6237_v16, %v3780_v31  ;;  %4223 = vmatprep.subr.msk.mxu1 %vm157_vm0, %v2022_v48  ;;  %v3828_v34 = vadd.f32 1e-06, %v3778_v49  ;;  %v2024_v46 = vmul.f32 %v4689_v0, %v6209_v7  ;;  %v3794_v4 = vmul.f32 %v4689_v0, %v6244_v41  ;;  %v6382_v49 = vld [vmem:[%s6923_s10 + $0x18] sm:$0xff] }
 0x25d   :  { %v1595_v20 = vpop.f32.mrb[20].mxu0  ;;  %v3785_v53 = vsel %vm3783_vm9, %v3784_v50, %v3782_v44  ;;  %4224 = vmatpush1.msk.msra.mxu1 %vm157_vm0, %v2021_v17  ;;  %v3789_v37 = vsel %vm3788_vm7, %v6239_v13, %v3787_v54  ;;  %vm3809_vm5 = vcmp.eq.f32.partialorder %v6272_v15, inf  ;;  %vm3811_vm6 = vcmp.eq.f32.partialorder %v6272_v15, 0.0  ;;  %vm7271_vm7 = vmmov %vm7262_vm2 }
 0x25e   :  { %v6274_v33 = vpop.f32.mrb[21].mxu0  ;;  %v3829_v32 = vadd.f32 1e-06, %v3785_v53  ;;  %4225 = vmatmul.mubr.msk.f32.vlgmr.msra.gmra.mrb[32].mxu1 %vm7263_vm13, %v6279_v40  ;;  %4694 = vrcp.f32 %v3828_v34  ;;  %v3792_v16 = vsel %vm3790_vm11, %v3791_v10, %v3789_v37  ;;  %v3796_v39 = vsel %vm3795_vm12, %v6244_v41, %v3794_v4  ;;  %4229 = vmatprep.subr.msk.mxu0 %vm157_vm0, %v2024_v46  ;;  %v7268_v37 = vld [vmem:[#allocation8_spill] sm:$0xff]  ;;  %vm7272_vm12 = vmmov %vm7262_vm2 }
 0x25f   :  { %2619 = vmatprep.mubr.f32.mxu1 %v7168_v56  ;;  %v3830_v58 = vadd.f32 1e-06, %v3792_v16  ;;  %v3799_v13 = vsel %vm3797_vm1, %v3798_v52, %v3796_v39  ;;  %4230 = vmatpush1.msk.msra.mxu0 %vm157_vm0, %v2023_v35  ;;  %v6334_v24 = vadd.f32 %v1595_v20, %v6247_v11  ;;  %v6361_v48 = vadd.f32 %v6274_v33, %v6247_v11  ;;  %vm7273_vm13 = vmmov %vm7262_vm2 }
 0x260   :  { %4696 = vrcp.f32 %v3829_v32  ;;  %v3831_v28 = vadd.f32 1e-06, %v3799_v13  ;;  %4231 = vmatmul.mubr.msk.f32.vlgmr.msra.gmra.mrb[40].mxu0 %vm7264_vm14, %v6279_v40  ;;  %v6342_v50 = vpop.eup %4690  ;;  %v4078_v20 = vunpack.c.0.s8 %v4077_v45  ;;  %v7269_v32 = vsub.s32 1, %v7268_v37  ;;  %vm7274_vm1 = vmmov %vm7262_vm2 }
 0x261   :  { %v1601_v42 = vpop.f32.mrb[22].mxu0  ;;  %4698 = vrsqrt.f32 %v6272_v15  ;;  %2708 = vmatprep.mubr.f32.mxu0 %v7168_v56  ;;  %vm3823_vm9 = vcmp.eq.f32.partialorder %v6331_v19, inf  ;;  %vm3825_vm11 = vcmp.eq.f32.partialorder %v6331_v19, 0.0 }
 0x262   :  { %v1678_v36 = vpop.f32.mrb[20].mxu1  ;;  %v1603_v41 = vpop.f32.mrb[23].mxu0  ;;  %4700 = vrcp.f32 %v3830_v58  ;;  %4226 = vmatmul.mubr.msk.f32.gmra.mrb[34].mxu1 %vm7265_vm4, %v6312_v25  ;;  %v6340_v9 = vadd.f32 %v1601_v42, %v6321_v23 }
 0x263   :  { %v1680_v61 = vpop.f32.mrb[21].mxu1  ;;  %4702 = vrcp.f32 %v3831_v28  ;;  %2625 = vmatprep.mubr.f32.mxu1 %v7168_v56  ;;  %v6337_v29 = vadd.f32 %v1678_v36, %v6247_v11  ;;  %v6348_v62 = vadd.f32 %v1603_v41, %v6321_v23  ;;  %v6384_v54 = vpop.eup %4692  ;;  %v6402_v36 = vrot.slane %v6372_v8, %v7269_v32 }
 0x264   :  { %4232 = vmatmul.mubr.msk.f32.gmra.mrb[42].mxu0 %vm7266_vm8, %v6312_v25  ;;  %4704 = vrsqrt.f32 %v6331_v19  ;;  %v6364_v31 = vadd.f32 %v1680_v61, %v6247_v11  ;;  %v4341_v55 = vpack.c.bf16 %v6340_v9, %v6334_v24  ;;  %v6410_v61 = vsub.s32 %v4078_v20, %v7268_v37 }
 0x265   :  { %v1607_v38 = vpop.f32.mrb[24].mxu0  ;;  %2714 = vmatprep.mubr.f32.mxu0 %v7168_v56  ;;  %v4339_v44 = vpack.c.bf16 %v6348_v62, %v6361_v48  ;;  %vm2941_vm8 = vcmask 130048  }
 0x266   :  { %v1684_v5 = vpop.f32.mrb[22].mxu1  ;;  %v6354_v10 = vadd.f32 %v1607_v38, %v6329_v12  ;;  %v1609_v17 = vpop.f32.mrb[25].mxu0  ;;  %4227 = vmatmul.mubr.msk.f32.gmra.mrb[36].mxu1 %vm7267_vm15, %v6327_v18  ;;  %v3812_v38 = vand.u32 2147483648, %v6272_v15 }
 0x267   :  { %v1686_v43 = vpop.f32.mrb[23].mxu1  ;;  %v6345_v1 = vadd.f32 %v1684_v5, %v6321_v23  ;;  %2631 = vmatprep.mubr.f32.mxu1 %v7168_v56  ;;  %v6395_v4 = vadd.f32 %v1609_v17, %v6329_v12 }
 0x268   :  { %v6351_v21 = vadd.f32 %v1686_v43, %v6321_v23  ;;  %v1861_v34 = vsub.f32 0.0, %v6354_v10  ;;  %v4695_v53 = vpop.eup %4694  ;;  %4233 = vmatmul.mubr.msk.f32.gmra.mrb[44].mxu0 %vm7262_vm2, %v6327_v18  ;;  %v2025_v43 = vmul.f32 %v6342_v50, %v6218_v63 }
 0x269   :  { %v4345_v33 = vpack.c.bf16 %v6345_v1, %v6337_v29  ;;  %v6405_v16 = vmul.f32 %v4695_v53, %v6194_v30  ;;  %2720 = vmatprep.mubr.f32.mxu0 %v7168_v56  ;;  %v1862_v42 = vsub.f32 0.0, %v6395_v4 }
 0x26a   :  { %v1690_v52 = vpop.f32.mrb[24].mxu1  ;;  %v4343_v3 = vpack.c.bf16 %v6351_v21, %v6364_v31  ;;  %v4697_v35 = vpop.eup %4696  ;;  %v1869_v39 = vand.u32 2147483647, %v1861_v34  ;;  %4228 = vmatmul.mubr.msk.f32.gmra.mrb[38].mxu1 %vm7270_vm3, %v6382_v49  ;;  %vm6575_vm2 = vcmp.le.f32.partialorder %v1861_v34, 0.0 }
 0x26b   :  { %v1692_v0 = vpop.f32.mrb[25].mxu1  ;;  %v6392_v46 = vadd.f32 %v1690_v52, %v6329_v12  ;;  %v4699_v58 = vpop.eup %4698  ;;  %v6416_v13 = vmul.f32 %v4697_v35, %v6198_v6  ;;  %2791 = vmatprep.mubr.f32.mxu1 %v7168_v56  ;;  %v1870_v20 = vand.u32 2147483647, %v1862_v42 }
 0x26c   :  { %v4701_v28 = vpop.eup %4700  ;;  %v2026_v41 = vmul.f32 %v4699_v58, %v6222_v60  ;;  %v3808_v22 = vmul.f32 %v4699_v58, %v6272_v15  ;;  %v1877_v5 = vsub.f32 0.0, %v1869_v39  ;;  %4234 = vmatmul.mubr.msk.f32.gmra.mrb[46].mxu0 %vm7271_vm7, %v6382_v49 }
 0x26d   :  { %v1863_v30 = vsub.f32 0.0, %v6392_v46  ;;  %v4703_v45 = vpop.eup %4702  ;;  %v6426_v6 = vmul.f32 %v4701_v28, %v6200_v47  ;;  %2880 = vmatprep.mubr.f32.mxu0 %v7168_v56  ;;  %v1878_v58 = vsub.f32 0.0, %v1870_v20  ;;  %v4072_v28 = vcombine.low %v6354_v10, %v6395_v4 }
 0x26e   :  { %v6436_v48 = vmul.f32 %v4703_v45, %v6209_v7  ;;  %v3810_v47 = vsel %vm3809_vm5, %v6272_v15, %v3808_v22  ;;  %v1885_v52 = vmul.f32 10.0, %v1877_v5  ;;  %4235 = vmatprep.subr.msk.mxu1 %vm157_vm0, %v2026_v41  ;;  %v4705_v35 = vpop.eup %4704  ;;  %v6457_v45 = vadd.f32 %v1692_v0, %v6329_v12 }
 0x26f   :  { %v1761_v2 = vpop.f32.mrb[26].mxu0  ;;  %v1871_v62 = vand.u32 2147483647, %v1863_v30  ;;  %v3813_v53 = vsel %vm3811_vm6, %v3812_v38, %v3810_v47  ;;  %4236 = vmatpush1.msk.msra.mxu1 %vm157_vm0, %v2025_v43  ;;  %v2028_v15 = vmul.f32 %v4705_v35, %v6233_v59  ;;  %v3822_v22 = vmul.f32 %v4705_v35, %v6331_v19 }
 0x270   :  { %v1763_v17 = vpop.f32.mrb[27].mxu0  ;;  %v3833_v32 = vadd.f32 1e-06, %v3813_v53  ;;  %v1893_v39 = vmul.f32 1.442695, %v1885_v52  ;;  %4237 = vmatmul.mubr.msk.f32.vlgmr.msra.gmra.mrb[40].mxu1 %vm7272_vm12, %v6279_v40  ;;  %4340 = vmatprep.subr.bf16.mxu1 %v4339_v44  ;;  %v3826_v44 = vand.u32 2147483648, %v6331_v19 }
 0x271   :  { %v1879_v7 = vsub.f32 0.0, %v1871_v62  ;;  %4342 = vmatpush1.bf16.msra.mxu1 %v4341_v55  ;;  %2797 = vmatprep.mubr.f32.mxu1 %v7168_v56  ;;  %v2027_v62 = vmul.f32 %v6384_v54, %v6224_v14  ;;  %v1886_v47 = vmul.f32 10.0, %v1878_v58  ;;  %v3824_v0 = vsel %vm3823_vm9, %v6331_v19, %v3822_v22 }
 0x272   :  { %4706 = vrcp.f32 %v3833_v32  ;;  %v7020_v53 = vsub.f32 0.0, %v6457_v45  ;;  %4241 = vmatprep.subr.msk.mxu0 %vm157_vm0, %v2028_v15  ;;  %v3827_v24 = vsel %vm3825_vm11, %v3826_v44, %v3824_v0  ;;  %v6474_v55 = vrot.slane %v4072_v28, %v6410_v61 }
 0x273   :  { %v1767_v41 = vpop.f32.mrb[28].mxu0  ;;  %v1887_v5 = vmul.f32 10.0, %v1879_v7  ;;  %4708 = vpow2.f32 %v1893_v39  ;;  %v1895_v9 = vmul.f32 1.442695, %v1886_v47  ;;  %v4073_v7 = vcombine.low %v6392_v46, %v6457_v45  ;;  %4242 = vmatpush1.msk.msra.mxu0 %vm157_vm0, %v2027_v62  ;;  %vm7275_vm0 = vmmov %vm7274_vm1 }
 0x274   :  { %v1844_v43 = vpop.f32.mrb[26].mxu1  ;;  %v1769_v38 = vpop.f32.mrb[29].mxu0  ;;  %4238 = vmatmul.mubr.msk.f32.gmra.mrb[42].mxu1 %vm7273_vm13, %v6312_v25  ;;  %v3835_v32 = vadd.f32 1e-06, %v3827_v24  ;;  %v1872_v39 = vand.u32 2147483647, %v7020_v53  ;;  %v6484_v19 = vadd.f32 %v1761_v2, %v6247_v11  ;;  %4243 = vmatmul.mubr.msk.f32.vlgmr.msra.gmra.mrb[48].mxu0 %vm7274_vm1, %v6279_v40  ;;  %v6504_v31 = vadd.f32 %v1767_v41, %v6321_v23  ;;  %vm7276_vm14 = vmmov %vm7275_vm0 }
 0x275   :  { %v1846_v52 = vpop.f32.mrb[27].mxu1  ;;  %v1897_v20 = vmul.f32 1.442695, %v1887_v5  ;;  %4344 = vmatprep.subr.bf16.mxu0 %v4343_v3  ;;  %v6492_v15 = vrot.slane %v4073_v7, %v6410_v61  ;;  %v6495_v22 = vadd.f32 %v1844_v43, %v6247_v11  ;;  %v1764_v5 = vadd.f32 %v1763_v17, %v6247_v11  ;;  %2886 = vmatprep.mubr.f32.mxu0 %v7168_v56  ;;  %vm7279_vm4 = vmmov %vm7275_vm0 }
 0x276   :  { %4346 = vmatpush1.bf16.msra.mxu0 %v4345_v33  ;;  %v1880_v40 = vsub.f32 0.0, %v1872_v39  ;;  %v1847_v21 = vadd.f32 %v1846_v52, %v6247_v11  ;;  %2803 = vmatprep.mubr.f32.mxu1 %v7168_v56  ;;  %v1770_v29 = vadd.f32 %v1769_v38, %v6321_v23  ;;  %v4349_v41 = vpack.c.bf16 %v6504_v31, %v6484_v19  ;;  %v7277_v38 = vld [vmem:[#allocation9_spill] sm:$0xff]  ;;  %vm7280_vm15 = vmmov %vm7275_vm0  ;;  %v6569_v31 = vld [vmem:[%s6924_s11] sm:$0xff] }
 0x277   :  { %v1773_v35 = vpop.f32.mrb[30].mxu0  ;;  %4710 = vpow2.f32 %v1897_v20  ;;  %v3864_v47 = vrot.slane %v6372_v8, %v7277_v38  ;;  %v7278_v52 = vsub.s32 2, %v7268_v37  ;;  %vm6586_vm3 = vcmp.le.f32.partialorder %v1863_v30, 0.0  ;;  %vm7287_vm6 = vmmov %vm7275_vm0 }
 0x278   :  { %v1850_v58 = vpop.f32.mrb[28].mxu1  ;;  %v1775_v28 = vpop.f32.mrb[31].mxu0  ;;  %4712 = vpow2.f32 %v1895_v9  ;;  %4239 = vmatmul.mubr.msk.f32.gmra.mrb[44].mxu1 %vm7275_vm0, %v6327_v18  ;;  %v1888_v11 = vmul.f32 10.0, %v1880_v40  ;;  %v6521_v43 = vadd.f32 %v1773_v35, %v6329_v12  ;;  %4244 = vmatmul.mubr.msk.f32.gmra.mrb[50].mxu0 %vm7276_vm14, %v6312_v25  ;;  %v4347_v24 = vpack.c.bf16 %v1770_v29, %v1764_v5 }
 0x279   :  { %v1852_v2 = vpop.f32.mrb[29].mxu1  ;;  %4714 = vrcp.f32 %v3835_v32  ;;  %v6510_v17 = vadd.f32 %v1850_v58, %v6321_v23  ;;  %v6524_v44 = vadd.f32 %v1775_v28, %v6329_v12  ;;  %2809 = vmatprep.mubr.f32.mxu1 %v7168_v56  ;;  %v6536_v0 = vrot.slane %v6372_v8, %v7278_v52  ;;  %2892 = vmatprep.mubr.f32.mxu0 %v7168_v56 }
 0x27a   :  { %v1853_v1 = vadd.f32 %v1852_v2, %v6321_v23  ;;  %v1899_v25 = vmul.f32 1.442695, %v1888_v11  ;;  %v7018_v35 = vsub.f32 0.0, %v6521_v43  ;;  %4348 = vmatprep.subr.bf16.mxu1 %v4347_v24  ;;  %v6557_v40 = vmul.f32 %v6342_v50, %v6254_v57  ;;  %v6596_v24 = vld [vmem:[%s6924_s11 + $0x8] sm:$0xff] }
 0x27b   :  { %v6516_v33 = vpop.f32.mrb[32].mxu0  ;;  %v4353_v20 = vpack.c.bf16 %v6510_v17, %v6495_v22  ;;  %v7017_v19 = vsub.f32 0.0, %v6524_v44  ;;  %v4074_v58 = vcombine.low %v6521_v43, %v6524_v44  ;;  %vm6600_vm5 = vcmp.le.f32.partialorder %v1862_v42, 0.0 }
 0x27c   :  { %v1856_v62 = vpop.f32.mrb[30].mxu1  ;;  %v6529_v23 = vpop.f32.mrb[33].mxu0  ;;  %v4351_v7 = vpack.c.bf16 %v1853_v1, %v1847_v21  ;;  %4240 = vmatmul.mubr.msk.f32.gmra.mrb[46].mxu1 %vm7279_vm4, %v6382_v49  ;;  %4716 = vpow2.f32 %v1899_v25  ;;  %4245 = vmatmul.mubr.msk.f32.gmra.mrb[52].mxu0 %vm7280_vm15, %v6327_v18  ;;  %v3815_v46 = vmul.f32 %v6384_v54, %v6270_v27  ;;  %v6661_v54 = vld [vmem:[%s6924_s11 + $0x18] sm:$0xff]  ;;  %vm3802_vm9 = vcmp.eq.f32.partialorder %v6254_v57, inf }
 0x27d   :  { %v1858_v9 = vpop.f32.mrb[31].mxu1  ;;  %v6543_v32 = vadd.f32 %v1856_v62, %v6329_v12  ;;  %v4707_v39 = vpop.eup %4706  ;;  %v1874_v11 = vand.u32 2147483647, %v7017_v19  ;;  %2898 = vmatprep.mubr.f32.mxu0 %v7168_v56  ;;  %3018 = vmatprep.mubr.f32.mxu1 %v7168_v56  ;;  %vm3816_vm11 = vcmp.eq.f32.partialorder %v6270_v27, inf  ;;  %vm3804_vm12 = vcmp.eq.f32.partialorder %v6254_v57, 0.0 }
 0x27e   :  { %v6549_v28 = vadd.f32 %v1858_v9, %v6329_v12  ;;  %v4709_v2 = vpop.eup %4708  ;;  %v6560_v21 = vmul.f32 %v4707_v39, %v6222_v60  ;;  %v1873_v12 = vand.u32 2147483647, %v7018_v35  ;;  %4352 = vmatprep.subr.bf16.mxu0 %v4351_v7  ;;  %vm3818_vm13 = vcmp.eq.f32.partialorder %v6270_v27, 0.0 }
 0x27f   :  { %v6553_v5 = vpop.f32.mrb[34].mxu0  ;;  %v1917_v50 = vmul.f32 0.5, %v4709_v2  ;;  %v7019_v1 = vsub.f32 0.0, %v6543_v32  ;;  %v1882_v35 = vsub.f32 0.0, %v1874_v11 }
 0x280   :  { %v6571_v29 = vpop.f32.mrb[35].mxu0  ;;  %v1881_v10 = vsub.f32 0.0, %v1873_v12  ;;  %v7021_v34 = vsub.f32 0.0, %v6549_v28  ;;  %v4075_v52 = vcombine.low %v6543_v32, %v6549_v28  ;;  %4247 = vmatmul.mubr.msk.f32.vlgmr.msra.gmra.mrb[32].mxu1 %vm2941_vm8, %v6569_v31  ;;  %4246 = vmatmul.mubr.msk.f32.gmra.mrb[54].mxu0 %vm7287_vm6, %v6382_v49 }
 0x281   :  { %v4711_v18 = vpop.eup %4710  ;;  %v1925_v25 = vsub.f32 1.0, %v1917_v50  ;;  %v1875_v30 = vand.u32 2147483647, %v7019_v1  ;;  %4350 = vmatpush1.bf16.msra.mxu1 %v4349_v41  ;;  %3107 = vmatprep.mubr.f32.mxu0 %v7168_v56 }
 0x282   :  { %v4713_v9 = vpop.eup %4712  ;;  %v1919_v7 = vmul.f32 0.5, %v4711_v18  ;;  %v1889_v19 = vmul.f32 10.0, %v1881_v10  ;;  %v1876_v18 = vand.u32 2147483647, %v7021_v34  ;;  %3024 = vmatprep.mubr.f32.mxu1 %v7168_v56  ;;  %v1890_v34 = vmul.f32 10.0, %v1882_v35 }
 0x283   :  { %v6608_v39 = vpop.f32.mrb[36].mxu0  ;;  %v4715_v2 = vpop.eup %4714  ;;  %v1918_v12 = vmul.f32 0.5, %v4713_v9  ;;  %v1933_v1 = vsel %vm6575_vm2, %v1917_v50, %v1925_v25  ;;  %v1883_v53 = vsub.f32 0.0, %v1875_v30 }
 0x284   :  { %v6614_v4 = vpop.f32.mrb[37].mxu0  ;;  %v6617_v42 = vmul.f32 %v4715_v2, %v6233_v59  ;;  %v1927_v3 = vsub.f32 1.0, %v1919_v7  ;;  %v1941_v11 = vmul.f32 10.0, %v1933_v1  ;;  %v1901_v9 = vmul.f32 1.442695, %v1889_v19  ;;  %4248 = vmatmul.mubr.msk.f32.gmra.mrb[34].mxu1 %vm2941_vm8, %v6596_v24  ;;  %4251 = vmatmul.mubr.msk.f32.vlgmr.msra.gmra.mrb[40].mxu0 %vm2941_vm8, %v6569_v31 }
 0x285   :  { %v1926_v10 = vsub.f32 1.0, %v1918_v12  ;;  %v1891_v41 = vmul.f32 10.0, %v1883_v53  ;;  %v4096_v59 = vrot.slane %v4074_v58, %v6410_v61  ;;  %v1884_v2 = vsub.f32 0.0, %v1876_v18  ;;  %3030 = vmatprep.mubr.f32.mxu1 %v7168_v56  ;;  %v6638_v53 = vld [vmem:[%s6924_s11 + $0x10] sm:$0xff]  ;;  %4354 = vmatpush1.bf16.msra.mxu0 %v4353_v20 }
 0x286   :  { %v1935_v49 = vsel %vm6586_vm3, %v1919_v7, %v1927_v3  ;;  %v3852_v50 = vsub.f32 0.0, %v1941_v11  ;;  %4718 = vpow2.f32 %v1901_v9  ;;  %v1903_v58 = vmul.f32 1.442695, %v1890_v34  ;;  %3113 = vmatprep.mubr.f32.mxu0 %v7168_v56  ;;  %v4717_v7 = vpop.eup %4716 }
 0x287   :  { %v6628_v60 = vpop.f32.mrb[38].mxu0  ;;  %v1943_v25 = vmul.f32 10.0, %v1935_v49  ;;  %v1934_v1 = vsel %vm6600_vm5, %v1918_v12, %v1926_v10  ;;  %v1905_v19 = vmul.f32 1.442695, %v1891_v41  ;;  %v1892_v62 = vmul.f32 10.0, %v1884_v2 }
 0x288   :  { %v6640_v3 = vpop.f32.mrb[39].mxu0  ;;  %v1942_v35 = vmul.f32 10.0, %v1934_v1  ;;  %v3901_v30 = vmul.f32 %v3864_v47, %v3852_v50  ;;  %v4103_v18 = vrot.slane %v4075_v52, %v6410_v61  ;;  %v1920_v34 = vmul.f32 0.5, %v4717_v7  ;;  %4249 = vmatmul.mubr.msk.f32.gmra.mrb[36].mxu1 %vm2941_vm8, %v6638_v53  ;;  %4252 = vmatmul.mubr.msk.f32.gmra.mrb[42].mxu0 %vm2941_vm8, %v6596_v24 }
 0x289   :  { %v3854_v12 = vsub.f32 0.0, %v1943_v25  ;;  %4720 = vpow2.f32 %v1905_v19  ;;  %v1907_v10 = vmul.f32 1.442695, %v1892_v62  ;;  %3036 = vmatprep.mubr.f32.mxu1 %v7168_v56  ;;  %v7288_v52 = vsub.f32 0.0, %v6457_v45  ;;  %3119 = vmatprep.mubr.f32.mxu0 %v7168_v56 }
 0x28a   :  { %v3853_v11 = vsub.f32 0.0, %v1942_v35  ;;  %v3909_v22 = vmul.f32 1.442695, %v3901_v30  ;;  %4722 = vpow2.f32 %v1903_v58  ;;  %v4105_v20 = vcombine.low %v4096_v59, %v4103_v18 }
 0x28b   :  { %v3903_v17 = vmul.f32 %v6536_v0, %v3854_v12  ;;  %vm1912_vm7 = vcmp.le.f32.partialorder %v7288_v52, 0.0  ;;  %v1928_v9 = vsub.f32 1.0, %v1920_v34  ;;  %4724 = vpow2.f32 %v1907_v10 }
 0x28c   :  { %v3902_v47 = vmul.f32 %v6402_v36, %v3853_v11  ;;  %4726 = vpow2.f32 %v3909_v22  ;;  %v7289_v49 = vcombine.low %v6474_v55, %v6492_v15  ;;  %v4119_v59 = vrot.slane %v4105_v20, %v6410_v61  ;;  %4250 = vmatmul.mubr.msk.f32.gmra.mrb[38].mxu1 %vm2941_vm8, %v6661_v54  ;;  %4253 = vmatmul.mubr.msk.f32.gmra.mrb[44].mxu0 %vm2941_vm8, %v6638_v53 }
 0x28d   :  { %v3939_v0 = vmul.f32 1.442695, %v3903_v17  ;;  %v7290_v2 = vsub.s32 3, %v7268_v37  ;;  %v1936_v50 = vsel %vm1912_vm7, %v1920_v34, %v1928_v9  ;;  %3196 = vmatprep.mubr.f32.mxu1 %v7168_v56  ;;  %v3817_v55 = vsel %vm3816_vm11, %v6270_v27, %v3815_v46  ;;  %3125 = vmatprep.mubr.f32.mxu0 %v7168_v56 }
 0x28e   :  { %v4112_v41 = vrot.slane %v7289_v49, %v6410_v61  ;;  %v3923_v45 = vmul.f32 1.442695, %v3902_v47  ;;  %v1944_v25 = vmul.f32 10.0, %v1936_v50  ;;  %v3803_v61 = vsel %vm3802_vm9, %v6254_v57, %v6557_v40 }
 0x28f   :  { %v3876_v36 = vrot.slane %v6372_v8, %v7290_v2  ;;  %4728 = vpow2.f32 %v3939_v0  ;;  %v3805_v35 = vand.u32 2147483648, %v6254_v57  ;;  %v3819_v19 = vand.u32 2147483648, %v6270_v27 }
 0x290   :  { %v4120_v1 = vcombine.low %v4112_v41, %v4119_v59  ;;  %4730 = vpow2.f32 %v3923_v45  ;;  %v4719_v15 = vpop.eup %4718  ;;  %v3855_v58 = vsub.f32 0.0, %v1944_v25  ;;  %4255 = vmatmul.mubr.msk.f32.vlgmr.msra.gmra.mrb[40].mxu1 %vm2941_vm8, %v6569_v31  ;;  %4254 = vmatmul.mubr.msk.f32.gmra.mrb[46].mxu0 %vm2941_vm8, %v6661_v54  ;;  %v7291_v18 = vsub.s32 4, %v7268_v37 }
 0x291   :  { %v1921_v62 = vmul.f32 0.5, %v4719_v15  ;;  %v3806_v40 = vsel %vm3804_vm12, %v3805_v35, %v3803_v61  ;;  %v3820_v7 = vsel %vm3818_vm13, %v3819_v19, %v3817_v55  ;;  %3202 = vmatprep.mubr.f32.mxu1 %v7168_v56  ;;  %v7292_v27 = vsub.s32 6, %v7268_v37  ;;  %3285 = vmatprep.mubr.f32.mxu0 %v7168_v56 }
 0x292   :  { %4123 = vst [vmem:[#allocation4 + $0x3] ss:$4 sm:$0xff] %v4120_v1  ;;  %v3904_v46 = vmul.f32 %v3876_v36, %v3855_v58  ;;  %v3880_v57 = vrot.slane %v6372_v8, %v7291_v18  ;;  %v7293_v22 = vsub.f32 0.0, %v6521_v43  ;;  %v7294_v20 = vsub.s32 5, %v7268_v37 }
 0x293   :  { %v4721_v30 = vpop.eup %4720  ;;  %v1929_v12 = vsub.f32 1.0, %v1921_v62  ;;  %v3888_v11 = vrot.slane %v6372_v8, %v7292_v27  ;;  %v3832_v9 = vadd.f32 1e-06, %v3806_v40  ;;  %v3834_v0 = vadd.f32 1e-06, %v3820_v7 }
 0x294   :  { %v4723_v34 = vpop.eup %4722  ;;  %v3955_v10 = vmul.f32 1.442695, %v3904_v46  ;;  %vm1913_vm1 = vcmp.le.f32.partialorder %v7293_v22, 0.0  ;;  %v1923_v17 = vmul.f32 0.5, %v4721_v30  ;;  %v3884_v47 = vrot.slane %v6372_v8, %v7294_v20  ;;  %4256 = vmatmul.mubr.msk.f32.gmra.mrb[42].mxu1 %vm2941_vm8, %v6596_v24  ;;  %4259 = vmatmul.mubr.msk.f32.vlgmr.msra.gmra.mrb[48].mxu0 %vm2941_vm8, %v6569_v31 }
 0x295   :  { %v4725_v52 = vpop.eup %4724  ;;  %v1937_v49 = vsel %vm1913_vm1, %v1921_v62, %v1929_v12  ;;  %v1922_v41 = vmul.f32 0.5, %v4723_v34  ;;  %3208 = vmatprep.mubr.f32.mxu1 %v7168_v56  ;;  %v7295_v43 = vsub.f32 0.0, %v6543_v32  ;;  %v7296_v50 = vsub.f32 0.0, %v6524_v44  ;;  %3291 = vmatprep.mubr.f32.mxu0 %v7168_v56 }
 0x296   :  { %v4727_v59 = vpop.eup %4726  ;;  %4732 = vpow2.f32 %v3955_v10  ;;  %v1945_v2 = vmul.f32 10.0, %v1937_v49  ;;  %v1931_v36 = vsub.f32 1.0, %v1923_v17  ;;  %v1924_v45 = vmul.f32 0.5, %v4725_v52 }
 0x297   :  { %vm1915_vm0 = vcmp.le.f32.partialorder %v7295_v43, 0.0  ;;  %vm1914_vm14 = vcmp.le.f32.partialorder %v7296_v50, 0.0  ;;  %v1930_v25 = vsub.f32 1.0, %v1922_v41  ;;  %v3911_v1 = vsub.f32 1.0, %v4727_v59 }
 0x298   :  { %v3856_v55 = vsub.f32 0.0, %v1945_v2  ;;  %v1939_v15 = vsel %vm1915_vm0, %v1923_v17, %v1931_v36  ;;  %v7297_v35 = vsub.f32 0.0, %v6549_v28  ;;  %v1932_v31 = vsub.f32 1.0, %v1924_v45  ;;  %4257 = vmatmul.mubr.msk.f32.gmra.mrb[44].mxu1 %vm2941_vm8, %v6638_v53  ;;  %4260 = vmatmul.mubr.msk.f32.gmra.mrb[50].mxu0 %vm2941_vm8, %v6596_v24 }
 0x299   :  { %v4729_v61 = vpop.eup %4728  ;;  %v1947_v62 = vmul.f32 10.0, %v1939_v15  ;;  %v1938_v40 = vsel %vm1914_vm14, %v1922_v41, %v1930_v25  ;;  %v6726_v44 = vrot.slane %v3911_v1, %v7277_v38  ;;  %3214 = vmatprep.mubr.f32.mxu1 %v7168_v56  ;;  %4734 = vrcp.f32 %v3832_v9  ;;  %3297 = vmatprep.mubr.f32.mxu0 %v7168_v56  ;;  %v7301_v41 = vld [vmem:[#allocation10_spill] sm:$0xff]  ;;  %v7302_v15 = vld [vmem:[#allocation12_spill] sm:$0xff] }
 0x29a   :  { %vm6719_vm4 = vcmp.le.f32.partialorder %v7297_v35, 0.0  ;;  %v4731_v58 = vpop.eup %4730  ;;  %v3941_v32 = vsub.f32 1.0, %v4729_v61  ;;  %v3905_v30 = vmul.f32 %v3880_v57, %v3856_v55  ;;  %v1946_v12 = vmul.f32 10.0, %v1938_v40 }
 0x29b   :  { %v3925_v7 = vsub.f32 1.0, %v4731_v58  ;;  %v3938_v46 = vmul.f32 %v4731_v58, %v4727_v59  ;;  %v3858_v28 = vsub.f32 0.0, %v1947_v62  ;;  %v1940_v18 = vsel %vm6719_vm4, %v1924_v45, %v1932_v31 }
 0x29c   :  { %v7300_v27 = vsub.s32 7, %v7268_v37  ;;  %v3971_v22 = vmul.f32 1.442695, %v3905_v30  ;;  %v3857_v57 = vsub.f32 0.0, %v1946_v12  ;;  %v1948_v17 = vmul.f32 10.0, %v1940_v18  ;;  %4258 = vmatmul.mubr.msk.f32.gmra.mrb[46].mxu1 %vm2941_vm8, %v6661_v54  ;;  %4261 = vmatmul.mubr.msk.f32.gmra.mrb[52].mxu0 %vm2941_vm8, %v6638_v53 }
 0x29d   :  { %v3954_v10 = vmul.f32 %v4729_v61, %v3938_v46  ;;  %4736 = vrcp.f32 %v3834_v0  ;;  %v3907_v20 = vmul.f32 %v3888_v11, %v3858_v28  ;;  %v3926_v24 = vmul.f32 %v4727_v59, %v3925_v7  ;;  %3504 = vmatprep.mubr.f32.mxu1 %v7168_v56  ;;  %3303 = vmatprep.mubr.f32.mxu0 %v7168_v56  ;;  %v4779_v53 = vld [vmem:[%s6915_s2] ss:$2 sm:$0xff] }
 0x29e   :  { %v3892_v34 = vrot.slane %v6372_v8, %v7300_v27  ;;  %v3942_v52 = vmul.f32 %v3941_v32, %v3938_v46  ;;  %4738 = vpow2.f32 %v3971_v22  ;;  %v3906_v9 = vmul.f32 %v3884_v47, %v3857_v57  ;;  %v7303_v7 = vld [vmem:[#allocation11_spill] sm:$0xff] }
 0x29f   :  { %v3859_v49 = vsub.f32 0.0, %v1948_v17  ;;  %v3920_v8 = vmul.f32 %v6726_v44, %v6405_v16  ;;  %v4003_v37 = vmul.f32 1.442695, %v3907_v20  ;;  %v6746_v11 = vrot.slane %v3926_v24, %v7277_v38 }
 0x2a0   :  { %v6749_v0 = vrot.slane %v3942_v52, %v7277_v38  ;;  %v3933_v47 = vmul.f32 %v3926_v24, %v7301_v41  ;;  %v4733_v59 = vpop.eup %4732  ;;  %v3987_v2 = vmul.f32 1.442695, %v3906_v9  ;;  %v3918_v45 = vmul.f32 %v4779_v53, %v3911_v1  ;;  %4262 = vmatmul.mubr.msk.f32.gmra.mrb[54].mxu0 %vm2941_vm8, %v6661_v54 }
 0x2a1   :  { %v3908_v36 = vmul.f32 %v3892_v34, %v3859_v49  ;;  %v3937_v16 = vadd.f32 %v3926_v24, %v3911_v1  ;;  %v3957_v43 = vsub.f32 1.0, %v4733_v59  ;;  %v3970_v50 = vmul.f32 %v4733_v59, %v3954_v10  ;;  %3646 = vmatprep.mubr.f32.mxu0 %v7168_v56  ;;  %v7304_v24 = vld [vmem:[#allocation15_spill] sm:$0xff] }
 0x2a2   :  { %4740 = vpow2.f32 %v4003_v37  ;;  %v3935_v25 = vmul.f32 %v6746_v11, %v6416_v13  ;;  %v3934_v55 = vadd.f32 %v3933_v47, %v3918_v45  ;;  %v3949_v35 = vmul.f32 %v3942_v52, %v7302_v15 }
 0x2a3   :  { %4742 = vpow2.f32 %v3987_v2  ;;  %v4019_v61 = vmul.f32 1.442695, %v3908_v36  ;;  %v3958_v19 = vmul.f32 %v3957_v43, %v3954_v10  ;;  %v3951_v1 = vmul.f32 %v6749_v0, %v6426_v6  ;;  %v4735_v62 = vpop.eup %4734 }
 0x2a4   :  { %v3936_v31 = vadd.f32 %v3935_v25, %v3920_v8  ;;  %v3953_v58 = vadd.f32 %v3942_v52, %v3937_v16  ;;  %v3950_v32 = vadd.f32 %v3949_v35, %v3934_v55  ;;  %v3848_v17 = vmul.f32 %v4735_v62, %v6218_v63  ;;  %v7305_v16 = vld [vmem:[#allocation13_spill] sm:$0xff] }
 0x2a5   :  { %4744 = vpow2.f32 %v4019_v61  ;;  %v6764_v13 = vrot.slane %v3958_v19, %v7277_v38  ;;  %v3965_v54 = vmul.f32 %v3958_v19, %v7303_v7  ;;  %v7307_v7 = vld [vmem:[#allocation14_spill] sm:$0xff] }
 0x2a6   :  { %v3952_v40 = vadd.f32 %v3951_v1, %v3936_v31  ;;  %v3969_v46 = vadd.f32 %v3958_v19, %v3953_v58  ;;  %v7306_v19 = vld [vmem:[#allocation16_spill] sm:$0xff] }
 0x2a7   :  { %v4737_v30 = vpop.eup %4736  ;;  %v3966_v12 = vadd.f32 %v3965_v54, %v3950_v32  ;;  %v3967_v28 = vmul.f32 %v6764_v13, %v6436_v48 }
 0x2a8   :  { %v4739_v18 = vpop.eup %4738  ;;  %v3850_v25 = vmul.f32 %v4737_v30, %v6224_v14 }
 0x2a9   :  { %v3973_v27 = vsub.f32 1.0, %v4739_v18  ;;  %v3968_v34 = vadd.f32 %v3967_v28, %v3952_v40  ;;  %v3986_v6 = vmul.f32 %v4739_v18, %v3970_v50 }
 0x2ab   :  { %v3974_v22 = vmul.f32 %v3973_v27, %v3970_v50 }
 0x2ac   :  { %v4741_v10 = vpop.eup %4740 }
 0x2ad   :  { %v4743_v57 = vpop.eup %4742  ;;  %v6771_v20 = vrot.slane %v3974_v22, %v7277_v38  ;;  %v3981_v52 = vmul.f32 %v3974_v22, %v7304_v24  ;;  %v3985_v9 = vadd.f32 %v3974_v22, %v3969_v46  ;;  %v4005_v41 = vsub.f32 1.0, %v4741_v10  ;;  %v6800_v24 = vpop.permute.xlu1 %3353 }
 0x2ae   :  { %v3989_v49 = vsub.f32 1.0, %v4743_v57  ;;  %v4002_v37 = vmul.f32 %v4743_v57, %v3986_v6 }
 0x2af   :  { %v4745_v8 = vpop.eup %4744  ;;  %v3982_v48 = vadd.f32 %v3981_v52, %v3966_v12  ;;  %v3983_v47 = vmul.f32 %v6771_v20, %v3848_v17 }
 0x2b0   :  { %v3990_v59 = vmul.f32 %v3989_v49, %v3986_v6  ;;  %v4021_v2 = vsub.f32 1.0, %v4745_v8  ;;  %v4006_v36 = vmul.f32 %v4005_v41, %v4002_v37  ;;  %v4018_v53 = vmul.f32 %v4741_v10, %v4002_v37 }
 0x2b1   :  { %v3984_v45 = vadd.f32 %v3983_v47, %v3968_v34 }
 0x2b2   :  { %v6776_v63 = vrot.slane %v3990_v59, %v7277_v38  ;;  %v3997_v43 = vmul.f32 %v3990_v59, %v7305_v16  ;;  %v4001_v50 = vadd.f32 %v3990_v59, %v3985_v9  ;;  %v6781_v61 = vrot.slane %v4006_v36, %v7277_v38 }
 0x2b3   :  { %v4022_v55 = vmul.f32 %v4021_v2, %v4018_v53  ;;  %v4013_v31 = vmul.f32 %v4006_v36, %v7306_v19 }
 0x2b4   :  { %v3998_v15 = vadd.f32 %v3997_v43, %v3982_v48  ;;  %v3999_v35 = vmul.f32 %v6776_v63, %v6560_v21  ;;  %v4017_v1 = vadd.f32 %v4006_v36, %v4001_v50  ;;  %v4015_v58 = vmul.f32 %v6781_v61, %v3850_v25 }
 0x2b5   :  { %v6788_v32 = vrot.slane %v4022_v55, %v7277_v38  ;;  %v4029_v14 = vmul.f32 %v4022_v55, %v7307_v7 }
 0x2b6   :  { %v4000_v62 = vadd.f32 %v3999_v35, %v3984_v45  ;;  %v4014_v40 = vadd.f32 %v4013_v31, %v3998_v15  ;;  %v6791_v54 = vadd.f32 %v4022_v55, %v4017_v1 }
 0x2b7   :  { %v4031_v12 = vmul.f32 %v6788_v32, %v6617_v42 }
 0x2b8   :  { %v4016_v46 = vadd.f32 %v4015_v58, %v4000_v62  ;;  %v4030_v30 = vadd.f32 %v4029_v14, %v4014_v40  ;;  %4043 = vst [vmem:[#allocation2 + $0x7] sm:$0x1] %v6791_v54 }
 0x2ba   :  { %v4032_v21 = vadd.f32 %v4031_v12, %v4016_v46  ;;  %4041 = vst [vmem:[#allocation2 + $0x3] sm:$0x1] %v4030_v30  ;;  %v6818_v12 = vpop.permute.xlu1 %3363 }
 0x2bc   :  { %4042 = vst [vmem:[#allocation2 + $0x4] sm:$0x7] %v4032_v21 }
 0x353   :  { %v3020_v28 = vpop.f32.mrb[32].mxu1 }
 0x354   :  { %v4387_v18 = vadd.f32 %v3020_v28, %v6516_v33  ;;  %v3022_v27 = vpop.f32.mrb[33].mxu1 }
 0x355   :  { %v4388_v34 = vadd.f32 %v3022_v27, %v6529_v23 }
 0x356   :  { %v3366_v10 = vadd.f32 %v4387_v18, %v6256_v26 }
 0x357   :  { %v3026_v6 = vpop.f32.mrb[34].mxu1  ;;  %v3109_v22 = vpop.f32.mrb[40].mxu0  ;;  %v3367_v52 = vadd.f32 %v4388_v34, %v6256_v26 }
 0x358   :  { %v4389_v57 = vadd.f32 %v3026_v6, %v6553_v5  ;;  %v3028_v17 = vpop.f32.mrb[35].mxu1  ;;  %v4395_v42 = vadd.f32 %v3109_v22, %v6516_v33  ;;  %v3111_v9 = vpop.f32.mrb[41].mxu0  ;;  %v3398_v47 = vmax.f32 %v3366_v10, 0.0 }
 0x359   :  { %v4390_v49 = vadd.f32 %v3028_v17, %v6571_v29  ;;  %v4396_v8 = vadd.f32 %v3111_v9, %v6529_v23  ;;  %v3399_v16 = vmax.f32 %v3367_v52, 0.0 }
 0x35a   :  { %v3374_v37 = vadd.f32 %v4389_v57, %v6800_v24  ;;  %v3368_v59 = vadd.f32 %v4395_v42, %v6256_v26 }
 0x35b   :  { %v3375_v41 = vadd.f32 %v4390_v49, %v6800_v24  ;;  %v3032_v48 = vpop.f32.mrb[36].mxu1  ;;  %v3115_v36 = vpop.f32.mrb[42].mxu0  ;;  %v3369_v15 = vadd.f32 %v4396_v8, %v6256_v26 }
 0x35c   :  { %v3406_v2 = vmax.f32 %v3374_v37, 0.0  ;;  %v4391_v53 = vadd.f32 %v3032_v48, %v6608_v39  ;;  %v3034_v45 = vpop.f32.mrb[37].mxu1  ;;  %v4397_v43 = vadd.f32 %v3115_v36, %v6553_v5  ;;  %v3117_v25 = vpop.f32.mrb[43].mxu0  ;;  %v3400_v40 = vmax.f32 %v3368_v59, 0.0 }
 0x35d   :  { %v3407_v50 = vmax.f32 %v3375_v41, 0.0  ;;  %v4392_v55 = vadd.f32 %v3034_v45, %v6614_v4  ;;  %v4398_v19 = vadd.f32 %v3117_v25, %v6571_v29  ;;  %v3401_v6 = vmax.f32 %v3369_v15, 0.0 }
 0x35e   :  { %v4357_v35 = vpack.c.bf16 %v3406_v2, %v3398_v47  ;;  %v3376_v31 = vadd.f32 %v4397_v43, %v6800_v24  ;;  %v3382_v1 = vadd.f32 %v4391_v53, %v6292_v51 }
 0x35f   :  { %v3038_v58 = vpop.f32.mrb[38].mxu1  ;;  %v4355_v62 = vpack.c.bf16 %v3407_v50, %v3399_v16  ;;  %v3377_v7 = vadd.f32 %v4398_v19, %v6800_v24  ;;  %v3121_v14 = vpop.f32.mrb[44].mxu0  ;;  %v3383_v18 = vadd.f32 %v4392_v55, %v6292_v51 }
 0x360   :  { %v4393_v46 = vadd.f32 %v3038_v58, %v6628_v60  ;;  %v3040_v30 = vpop.f32.mrb[39].mxu1  ;;  %v3408_v21 = vmax.f32 %v3376_v31, 0.0  ;;  %v4399_v28 = vadd.f32 %v3121_v14, %v6608_v39  ;;  %v3123_v27 = vpop.f32.mrb[45].mxu0  ;;  %v3414_v42 = vmax.f32 %v3382_v1, 0.0 }
 0x361   :  { %v4394_v34 = vadd.f32 %v3040_v30, %v6640_v3  ;;  %4356 = vmatprep.subr.bf16.mxu1 %v4355_v62  ;;  %v3409_v10 = vmax.f32 %v3377_v7, 0.0  ;;  %v4400_v22 = vadd.f32 %v3123_v27, %v6614_v4  ;;  %v3415_v59 = vmax.f32 %v3383_v18, 0.0 }
 0x362   :  { %v3390_v57 = vadd.f32 %v4393_v46, %v6818_v12  ;;  %4358 = vmatpush1.bf16.msra.mxu1 %v4357_v35  ;;  %v4365_v17 = vpack.c.bf16 %v3408_v21, %v3400_v40  ;;  %v3384_v49 = vadd.f32 %v4399_v28, %v6292_v51 }
 0x363   :  { %v3391_v52 = vadd.f32 %v4394_v34, %v6818_v12  ;;  %v3198_v9 = vpop.f32.mrb[40].mxu1  ;;  %v3127_v37 = vpop.f32.mrb[46].mxu0  ;;  %v4363_v47 = vpack.c.bf16 %v3409_v10, %v3401_v6  ;;  %v3385_v16 = vadd.f32 %v4400_v22, %v6292_v51  ;;  %v6844_v34 = vld [vmem:[%s6926_s13] sm:$0x7]  ;;  %s4831_s13 = smov [#allocation4]  }
 0x364   :  { %v3422_v8 = vmax.f32 %v3390_v57, 0.0  ;;  %v4403_v41 = vadd.f32 %v3198_v9, %v6516_v33  ;;  %v3200_v48 = vpop.f32.mrb[41].mxu1  ;;  %v4401_v2 = vadd.f32 %v3127_v37, %v6628_v60  ;;  %v3129_v53 = vpop.f32.mrb[47].mxu0  ;;  %v3416_v19 = vmax.f32 %v3384_v49, 0.0  ;;  %s4140_s9 = sshll.u32 %s4831_s13, 4  ;;  %s4141_s9 = int_to_ptr.vmem [resolvable:$true] %s4140_s9 }
 0x365   :  { %v3423_v36 = vmax.f32 %v3391_v52, 0.0  ;;  %v4404_v45 = vadd.f32 %v3200_v48, %v6529_v23  ;;  %v4402_v50 = vadd.f32 %v3129_v53, %v6640_v3  ;;  %v3417_v21 = vmax.f32 %v3385_v16, 0.0  ;;  %s4780_s24 = scalar_lea.vmem %s4141_s9, 512  ;;  %p4785_p1 = scmp.lt.s32.totalorder %s4141_s9, %s4141_s9 }
 0x366   :  { %v4361_v43 = vpack.c.bf16 %v3422_v8, %v3414_v42  ;;  %v3392_v25 = vadd.f32 %v4401_v2, %v6818_v12  ;;  %v3370_v55 = vadd.f32 %v4403_v41, %v6256_v26  ;;  %p4781_p0 = scmp.ne.s32.totalorder %s4141_s9, %s4780_s24  ;;  %p4786_p2 = scmp.lt.s32.totalorder %s4780_s24, %s4780_s24 }
 0x367   :  { %v3204_v15 = vpop.f32.mrb[42].mxu1  ;;  %v4359_v35 = vpack.c.bf16 %v3423_v36, %v3415_v59  ;;  %v3393_v31 = vadd.f32 %v4402_v50, %v6818_v12  ;;  %v3287_v1 = vpop.f32.mrb[48].mxu0  ;;  %v3371_v14 = vadd.f32 %v4404_v45, %v6256_v26 }
 0x368   :  { %v4405_v58 = vadd.f32 %v3204_v15, %v6553_v5  ;;  %v3206_v62 = vpop.f32.mrb[43].mxu1  ;;  %v3424_v40 = vmax.f32 %v3392_v25, 0.0  ;;  %v4411_v7 = vadd.f32 %v3287_v1, %v6516_v33  ;;  %v3289_v46 = vpop.f32.mrb[49].mxu0  ;;  %v3402_v33 = vmax.f32 %v3370_v55, 0.0  ;;  %p4787_p3 = por %p4786_p2, %p4785_p1 }
 0x369   :  { %v4406_v30 = vadd.f32 %v3206_v62, %v6571_v29  ;;  %4360 = vmatprep.subr.bf16.mxu1 %v4359_v35  ;;  %v3425_v28 = vmax.f32 %v3393_v31, 0.0  ;;  %v4412_v18 = vadd.f32 %v3289_v46, %v6529_v23  ;;  %v3403_v8 = vmax.f32 %v3371_v14, 0.0 }
 0x36a   :  { %v3378_v27 = vadd.f32 %v4405_v58, %v6800_v24  ;;  %4362 = vmatpush1.bf16.msra.mxu1 %v4361_v43  ;;  %v4369_v6 = vpack.c.bf16 %v3424_v40, %v3416_v19  ;;  %v3372_v57 = vadd.f32 %v4411_v7, %v6256_v26  ;;  %p4788_p4 = pnand %p4787_p3, %p4781_p0 }
 0x36b   :  { %v3379_v10 = vadd.f32 %v4406_v30, %v6800_v24  ;;  %v3210_v22 = vpop.f32.mrb[44].mxu1  ;;  %4364 = vmatprep.subr.bf16.mxu1 %v4363_v47  ;;  %v3293_v52 = vpop.f32.mrb[50].mxu0  ;;  %v4367_v49 = vpack.c.bf16 %v3425_v28, %v3417_v21  ;;  %v3373_v47 = vadd.f32 %v4412_v18, %v6256_v26 }
 0x36c   :  { %v3410_v42 = vmax.f32 %v3378_v27, 0.0  ;;  %v4407_v23 = vadd.f32 %v3210_v22, %v6608_v39  ;;  %v3212_v9 = vpop.f32.mrb[45].mxu1  ;;  %v4413_v37 = vadd.f32 %v3293_v52, %v6553_v5  ;;  %v3295_v48 = vpop.f32.mrb[51].mxu0  ;;  %v3404_v16 = vmax.f32 %v3372_v57, 0.0 }
 0x36d   :  { %v3411_v41 = vmax.f32 %v3379_v10, 0.0  ;;  %v4408_v59 = vadd.f32 %v3212_v9, %v6614_v4  ;;  %4263 = vmatmul.mubr.msk.f32.vlgmr.msra.gmra.mrb[48].mxu1 %vm1211_vm10, %v6844_v34  ;;  %v4414_v36 = vadd.f32 %v3295_v48, %v6571_v29  ;;  %v3405_v31 = vmax.f32 %v3373_v47, 0.0 }
 0x36e   :  { %v4373_v2 = vpack.c.bf16 %v3410_v42, %v3402_v33  ;;  %4366 = vmatpush1.bf16.msra.mxu1 %v4365_v17  ;;  %3575 = vmatprep.mubr.f32.mxu1 %v7168_v56  ;;  %v3380_v53 = vadd.f32 %v4413_v37, %v6800_v24  ;;  %v3386_v50 = vadd.f32 %v4407_v23, %v6292_v51 }
 0x36f   :  { %v3216_v45 = vpop.f32.mrb[46].mxu1  ;;  %4368 = vmatprep.subr.bf16.mxu1 %v4367_v49  ;;  %v4371_v5 = vpack.c.bf16 %v3411_v41, %v3403_v8  ;;  %v3381_v43 = vadd.f32 %v4414_v36, %v6800_v24  ;;  %v3299_v25 = vpop.f32.mrb[52].mxu0  ;;  %v3387_v17 = vadd.f32 %v4408_v59, %v6292_v51 }
 0x370   :  { %v4409_v55 = vadd.f32 %v3216_v45, %v6628_v60  ;;  %v3218_v26 = vpop.f32.mrb[47].mxu1  ;;  %v3412_v15 = vmax.f32 %v3380_v53, 0.0  ;;  %v4415_v29 = vadd.f32 %v3299_v25, %v6608_v39  ;;  %v3301_v35 = vpop.f32.mrb[53].mxu0  ;;  %v3418_v7 = vmax.f32 %v3386_v50, 0.0 }
 0x371   :  { %v4410_v19 = vadd.f32 %v3218_v26, %v6640_v3  ;;  %4372 = vmatprep.subr.bf16.mxu0 %v4371_v5  ;;  %v3413_v1 = vmax.f32 %v3381_v43, 0.0  ;;  %v4416_v58 = vadd.f32 %v3301_v35, %v6614_v4  ;;  %v3419_v21 = vmax.f32 %v3387_v17, 0.0 }
 0x372   :  { %v3394_v24 = vadd.f32 %v4409_v55, %v6818_v12  ;;  %4370 = vmatpush1.bf16.msra.mxu1 %v4369_v6  ;;  %4374 = vmatpush1.bf16.msra.mxu0 %v4373_v2  ;;  %v4381_v62 = vpack.c.bf16 %v3412_v15, %v3404_v16  ;;  %v3388_v30 = vadd.f32 %v4415_v29, %v6292_v51 }
 0x373   :  { %v3395_v40 = vadd.f32 %v4410_v19, %v6818_v12  ;;  %v3305_v39 = vpop.f32.mrb[54].mxu0  ;;  %v4379_v46 = vpack.c.bf16 %v3413_v1, %v3405_v31  ;;  %v3389_v4 = vadd.f32 %v4416_v58, %v6292_v51 }
 0x374   :  { %v3426_v14 = vmax.f32 %v3394_v24, 0.0  ;;  %v4417_v28 = vadd.f32 %v3305_v39, %v6628_v60  ;;  %v3307_v27 = vpop.f32.mrb[55].mxu0  ;;  %v3420_v60 = vmax.f32 %v3388_v30, 0.0 }
 0x375   :  { %v3427_v18 = vmax.f32 %v3395_v40, 0.0  ;;  %4264 = vmatmul.mubr.msk.f32.vlgmr.msra.gmra.mrb[50].mxu1 %vm1211_vm10, %v6844_v34  ;;  %v4418_v33 = vadd.f32 %v3307_v27, %v6640_v3  ;;  %4380 = vmatprep.subr.bf16.mxu1 %v4379_v46  ;;  %v3421_v52 = vmax.f32 %v3389_v4, 0.0 }
 0x376   :  { %v4377_v6 = vpack.c.bf16 %v3426_v14, %v3418_v7  ;;  %3717 = vmatprep.mubr.f32.mxu1 %v7168_v56  ;;  %v3396_v10 = vadd.f32 %v4417_v28, %v6818_v12  ;;  %4382 = vmatpush1.bf16.msra.mxu1 %v4381_v62 }
 0x377   :  { %v4375_v22 = vpack.c.bf16 %v3427_v18, %v3419_v21  ;;  %v3397_v57 = vadd.f32 %v4418_v33, %v6818_v12 }
 0x378   :  { %v3428_v42 = vmax.f32 %v3396_v10, 0.0 }
 0x379   :  { %4376 = vmatprep.subr.bf16.mxu0 %v4375_v22  ;;  %v3429_v23 = vmax.f32 %v3397_v57, 0.0 }
 0x37a   :  { %4378 = vmatpush1.bf16.msra.mxu0 %v4377_v6  ;;  %v4385_v9 = vpack.c.bf16 %v3428_v42, %v3420_v60 }
 0x37b   :  { %v4383_v51 = vpack.c.bf16 %v3429_v23, %v3421_v52 }
 0x37d   :  { %4265 = vmatmul.mubr.msk.f32.vlgmr.msra.gmra.mrb[56].mxu0 %vm1211_vm10, %v6844_v34  ;;  %4384 = vmatprep.subr.bf16.mxu1 %v4383_v51 }
 0x37e   :  { %4386 = vmatpush1.bf16.msra.mxu1 %v4385_v9 }
 0x381   :  { %4266 = vmatmul.mubr.msk.f32.vlgmr.msra.gmra.mrb[52].mxu1 %vm1211_vm10, %v6844_v34 }
 0x382   :  { %4791 = shalt.err (!%p4788_p4)
}
 0x383   :  { %s4792_s6 = scalar_lea.hbm %s6929_s16, 512 }
 0x384   :  { %p4793_p5 = scmp.ne.s32.totalorder %s6929_s16, %s4792_s6  ;;  %p4796_p6 = scmp.lt.u32.totalorder %s4792_s6, %s6929_s16 }
 0x386   :  { %p4798_p7 = pnand %p4796_p6, %p4793_p5 }
 0x388   :  { %4801 = shalt.err (!%p4798_p7)
}
 0x389   :  { %4143 = dma.vmem_to_hbm [thread:$0]  %s4141_s9, 512, %s6929_s16, [#allocation5]   ;;  %v3435_v56 = vpop.permute.xlu1 %3434 }
 0x38a   :  { %s4832_s16 = smov [#allocation2]  }
 0x38b   :  { %s4130_s29 = sshll.u32 %s4832_s16, 4  ;;  %s4131_s29 = int_to_ptr.vmem [resolvable:$true] %s4130_s29 }
 0x38c   :  { %s4802_s30 = scalar_lea.vmem %s4131_s29, 128  ;;  %p4807_p9 = scmp.lt.s32.totalorder %s4131_s29, %s4131_s29 }
 0x38d   :  { %p4803_p8 = scmp.ne.s32.totalorder %s4131_s29, %s4802_s30  ;;  %p4808_p10 = scmp.lt.s32.totalorder %s4802_s30, %s4802_s30 }
 0x38f   :  { %p4809_p11 = por %p4808_p10, %p4807_p9 }
 0x391   :  { %p4810_p12 = pnand %p4809_p11, %p4803_p8 }
 0x440   :  { %v3506_v3 = vpop.f32.mrb[48].mxu1 }
 0x441   :  { %v3507_v12 = vadd.f32 %v3506_v3, %v3435_v56  ;;  %v3508_v34 = vpop.f32.mrb[49].mxu1 }
 0x442   :  { %v3509_v49 = vadd.f32 %v3508_v34, %v3435_v56 }
 0x443   :  { %v4267_v8 = vmul.f32 -1.442695, %v3507_v12 }
 0x444   :  { %v4268_v37 = vmul.f32 -1.442695, %v3509_v49 }
 0x445   :  { %4746 = vpow2.f32 %v4267_v8 }
 0x446   :  { %4748 = vpow2.f32 %v4268_v37 }
 0x448   :  { %v3577_v41 = vpop.f32.mrb[50].mxu1 }
 0x449   :  { %v3578_v48 = vadd.f32 %v3577_v41, %v3435_v56  ;;  %v3579_v59 = vpop.f32.mrb[51].mxu1 }
 0x44a   :  { %v3580_v47 = vadd.f32 %v3579_v59, %v3435_v56 }
 0x44b   :  { %v4269_v2 = vmul.f32 -1.442695, %v3578_v48 }
 0x44c   :  { %v4270_v36 = vmul.f32 -1.442695, %v3580_v47 }
 0x44d   :  { %4750 = vpow2.f32 %v4269_v2 }
 0x44e   :  { %4752 = vpow2.f32 %v4270_v36 }
 0x44f   :  { %v4747_v53 = vpop.eup %4746 }
 0x450   :  { %v4749_v45 = vpop.eup %4748  ;;  %v3748_v5 = vadd.f32 1.0, %v4747_v53  ;;  %v3648_v16 = vpop.f32.mrb[56].mxu0 }
 0x451   :  { %v3749_v43 = vadd.f32 1.0, %v4749_v45  ;;  %v3649_v50 = vadd.f32 %v3648_v16, %v3435_v56  ;;  %v3650_v25 = vpop.f32.mrb[57].mxu0 }
 0x452   :  { %4754 = vrcp.f32 %v3748_v5  ;;  %v3651_v55 = vadd.f32 %v3650_v25, %v3435_v56 }
 0x453   :  { %4756 = vrcp.f32 %v3749_v43  ;;  %v4271_v26 = vmul.f32 -1.442695, %v3649_v50 }
 0x454   :  { %v4272_v15 = vmul.f32 -1.442695, %v3651_v55  ;;  %v3719_v29 = vpop.f32.mrb[52].mxu1 }
 0x455   :  { %4758 = vpow2.f32 %v4271_v26  ;;  %v3720_v17 = vadd.f32 %v3719_v29, %v3435_v56  ;;  %v3721_v35 = vpop.f32.mrb[53].mxu1 }
 0x456   :  { %4760 = vpow2.f32 %v4272_v15  ;;  %v3722_v31 = vadd.f32 %v3721_v35, %v3435_v56 }
 0x457   :  { %v4751_v19 = vpop.eup %4750  ;;  %v4273_v24 = vmul.f32 -1.442695, %v3720_v17 }
 0x458   :  { %v4753_v1 = vpop.eup %4752  ;;  %v3750_v58 = vadd.f32 1.0, %v4751_v19  ;;  %v4274_v40 = vmul.f32 -1.442695, %v3722_v31 }
 0x459   :  { %v3751_v62 = vadd.f32 1.0, %v4753_v1 }
 0x45a   :  { %4762 = vrcp.f32 %v3750_v58 }
 0x45b   :  { %4764 = vrcp.f32 %v3751_v62 }
 0x45c   :  { %v4755_v7 = vpop.eup %4754  ;;  %4766 = vpow2.f32 %v4273_v24 }
 0x45d   :  { %v4757_v14 = vpop.eup %4756  ;;  %v3916_v39 = vmul.f32 %v4755_v7, %v6726_v44  ;;  %4768 = vpow2.f32 %v4274_v40 }
 0x45e   :  { %v3931_v46 = vmul.f32 %v4757_v14, %v6746_v11 }
 0x45f   :  { %v4759_v30 = vpop.eup %4758 }
 0x460   :  { %v4761_v21 = vpop.eup %4760  ;;  %v3932_v28 = vadd.f32 %v3931_v46, %v3916_v39  ;;  %v3752_v18 = vadd.f32 1.0, %v4759_v30 }
 0x461   :  { %v3753_v27 = vadd.f32 1.0, %v4761_v21 }
 0x462   :  { %4770 = vrcp.f32 %v3752_v18 }
 0x463   :  { %4772 = vrcp.f32 %v3753_v27 }
 0x464   :  { %v4763_v4 = vpop.eup %4762 }
 0x465   :  { %v4765_v6 = vpop.eup %4764  ;;  %v3947_v33 = vmul.f32 %v4763_v4, %v6749_v0 }
 0x466   :  { %v4767_v10 = vpop.eup %4766  ;;  %v3963_v22 = vmul.f32 %v4765_v6, %v6764_v13  ;;  %v4034_v13 = vsub.f32 1.0, %v6791_v54 }
 0x467   :  { %v4769_v57 = vpop.eup %4768  ;;  %v3948_v60 = vadd.f32 %v3947_v33, %v3932_v28  ;;  %v3754_v44 = vadd.f32 1.0, %v4767_v10 }
 0x468   :  { %v3755_v42 = vadd.f32 1.0, %v4769_v57  ;;  %v4038_v41 = vrot.slane %v4034_v13, %v7277_v38 }
 0x469   :  { %4774 = vrcp.f32 %v3754_v44  ;;  %v3964_v11 = vadd.f32 %v3963_v22, %v3948_v60 }
 0x46a   :  { %4776 = vrcp.f32 %v3755_v42 }
 0x46c   :  { %v4771_v52 = vpop.eup %4770 }
 0x46d   :  { %v4773_v23 = vpop.eup %4772  ;;  %v3979_v9 = vmul.f32 %v4771_v52, %v6771_v20 }
 0x46e   :  { %v3995_v51 = vmul.f32 %v4773_v23, %v6776_v63 }
 0x46f   :  { %v3980_v56 = vadd.f32 %v3979_v9, %v3964_v11 }
 0x471   :  { %v3996_v3 = vadd.f32 %v3995_v51, %v3980_v56 }
 0x473   :  { %v4775_v12 = vpop.eup %4774 }
 0x474   :  { %v4777_v0 = vpop.eup %4776  ;;  %v4011_v34 = vmul.f32 %v4775_v12, %v6781_v61 }
 0x475   :  { %v4027_v8 = vmul.f32 %v4777_v0, %v6788_v32 }
 0x476   :  { %v4012_v49 = vadd.f32 %v4011_v34, %v3996_v3 }
 0x478   :  { %v4028_v37 = vadd.f32 %v4027_v8, %v4012_v49 }
 0x47a   :  { %v4039_v48 = vadd.f32 %v4038_v41, %v4028_v37 }
 0x47c   :  { %4040 = vst [vmem:[#allocation2] sm:$0x7] %v4039_v48 }
 0x47d   :  { %4813 = shalt.err (!%p4810_p12)
}
 0x47e   :  { %s4814_s1 = scalar_lea.hbm %s6928_s15, 128 }
 0x47f   :  { %p4815_p13 = scmp.ne.s32.totalorder %s6928_s15, %s4814_s1  ;;  %p4818_p0 = scmp.lt.u32.totalorder %s4814_s1, %s6928_s15 }
 0x481   :  { %p4820_p1 = pnand %p4818_p0, %p4815_p13 }
 0x483   :  { %4823 = shalt.err (!%p4820_p1)
}
 0x484   :  { %4133 = dma.vmem_to_hbm [thread:$0]  %s4131_s29, 128, %s6928_s15, [#allocation3]  }
 0x485   :  { %4824 = dma.done.wait [#allocation3], 128  }
 0x486   :  { %4825 = vsyncadd [#allocation3], 4294967168 }
 0x487   :  { %4826 = dma.done.wait [#allocation5], 512  }
 0x488   :  { %4827 = vsyncadd [#allocation5], 4294966784 }
 0x489   :  { %4150 = vsyncpa [#allocation3], 1 }
 0x48a   :  { %4151 = vsyncpa [#allocation5], 1 }

</bundles_post_ra>
